<compile_context>
chip_gen: v5e
topology: v5e:2x2
jax: 0.10.0
libtpu: 0.0.40
codegen_flags: <defaults>
</compile_context>

<pallas_src>
import functools
import math

import jax
import jax.numpy as jnp
from jax import lax
from jax.experimental import pallas as pl
from jax.experimental.pallas import tpu as pltpu


_VMEM_SPEC = pl.BlockSpec(memory_space=pltpu.MemorySpace.VMEM)


# ----------------------------------------------------------------------------
# Fused bidirectional GRU layer kernel (optionally with fused fc_out + tanh)
# ----------------------------------------------------------------------------
def _bigru_kernel(*refs, seq_len, batch, hid_dim, with_fc):
    """One bidirectional GRU layer over the whole sequence.

    Ref layout (in order):
      inputs : x (T*B, Din),
               w_in (Din, 6H)  columns [fwd r z n | bwd r z n],
               b_in (1, 6H)    folded b_ih + b_hh[r,z] per direction,
               w_hh (2H, 6H)   block-diagonal, interleaved cols
                               [r_f r_b | z_f z_b | n_f n_b],
               b_hn (1, 2H)    n-gate hidden bias [fwd | bwd],
               [fc_w (2H, H), fc_b (1, H)]        if with_fc
      outputs: out (T*B, 2H) = [h_f(t) | h_b(t)] per time row,
               [hidden (B, H)]                    if with_fc
    """
    T, Bp, H = seq_len, batch, hid_dim
    if with_fc:
        (x_ref, w_in_ref, b_in_ref, w_hh_ref, b_hn_ref,
         fc_w_ref, fc_b_ref, out_ref, hid_ref) = refs
    else:
        (x_ref, w_in_ref, b_in_ref, w_hh_ref, b_hn_ref, out_ref) = refs

    # ---- Hoisted input projection: ONE matmul for BOTH directions ----------
    # gx (T*B, 6H), columns [fwd r z n | bwd r z n], kept in vregs.
    gx = (jnp.dot(x_ref[...], w_in_ref[...], preferred_element_type=jnp.float32)
          + b_in_ref[...])

    w_hh = w_hh_ref[...]                                   # (2H, 6H) block-diag
    bhn = jnp.broadcast_to(b_hn_ref[...], (Bp, 2 * H))     # broadcast hoisted

    # ---- Recurrence: fully unrolled, h = [h_f | h_b] kept in vregs ----------
    # Per step: one block-diag MXU push, one sigmoid issue, one tanh issue.
    h = jnp.zeros((Bp, 2 * H), jnp.float32)
    for t in range(T):
        rf = t * Bp                 # fwd consumes time t
        rb = (T - 1 - t) * Bp       # bwd consumes time T-1-t (in-kernel reversal)

        # Off the h critical path: interleave the per-direction gate inputs
        # into the [r_f r_b | z_f z_b | n_f n_b] column order of w_hh.
        gf = gx[rf:rf + Bp, 0:3 * H]
        gb = gx[rb:rb + Bp, 3 * H:6 * H]
        gxt = jnp.concatenate(
            [gf[:, 0:H], gb[:, 0:H],
             gf[:, H:2 * H], gb[:, H:2 * H],
             gf[:, 2 * H:3 * H], gb[:, 2 * H:3 * H]], axis=-1)   # (Bp, 6H)

        gh = jnp.dot(h, w_hh, preferred_element_type=jnp.float32)   # (Bp, 6H)

        rz = jax.nn.sigmoid(gxt[:, 0:4 * H] + gh[:, 0:4 * H])       # r|z, one issue
        r = rz[:, 0:2 * H]
        z = rz[:, 2 * H:4 * H]
        n = jnp.tanh(gxt[:, 4 * H:] + r * (gh[:, 4 * H:] + bhn))    # one issue
        h = (1.0 - z) * n + z * h

        # Lane-dense combined output slab: fwd cols at row rf, bwd cols at rb.
        out_ref[rf:rf + Bp, 0:H] = h[:, 0:H]
        out_ref[rb:rb + Bp, H:2 * H] = h[:, H:2 * H]

    # ---- Fused fc_out + tanh on the final hiddens (last layer only) ---------
    if with_fc:
        hid_ref[...] = jnp.tanh(
            jnp.dot(h, fc_w_ref[...], preferred_element_type=jnp.float32)
            + fc_b_ref[...])


def bigru_layer(x, p, seq_len, batch_pad, hid_dim, fc=None):
    """x: flat activations of shape (T*B_pad, Din)."""
    T, Bp, H = seq_len, batch_pad, hid_dim
    TB = T * Bp
    din = x.shape[-1]
    with_fc = fc is not None

    kernel = functools.partial(
        _bigru_kernel, seq_len=T, batch=Bp, hid_dim=H, with_fc=with_fc)

    args = (x, p["w_in"], p["b_in"], p["w_hh"], p["b_hn"])
    out_shapes = [jax.ShapeDtypeStruct((TB, 2 * H), jnp.float32)]
    if with_fc:
        args = args + (fc["w"], fc["b"])
        out_shapes.append(jax.ShapeDtypeStruct((Bp, H), jnp.float32))

    # Advisory cost estimate for XLA scheduling of the surrounding glue.
    flops = 2 * TB * din * 6 * H + 2 * TB * (2 * H) * (6 * H)
    transcendentals = TB * 6 * H
    bytes_accessed = 4 * (TB * din + din * 6 * H + 6 * H
                          + 2 * H * 6 * H + 2 * H + TB * 2 * H)
    if with_fc:
        flops += 2 * Bp * 2 * H * H
        transcendentals += Bp * H
        bytes_accessed += 4 * (2 * H * H + H + Bp * H)

    results = pl.pallas_call(
        kernel,
        out_shape=tuple(out_shapes),
        in_specs=[_VMEM_SPEC] * len(args),
        out_specs=tuple([_VMEM_SPEC] * len(out_shapes)),
        cost_estimate=pl.CostEstimate(
            flops=flops, transcendentals=transcendentals,
            bytes_accessed=bytes_accessed),
    )(*args)

    if with_fc:
        return results[0], results[1]
    return results[0], None


# ----------------------------------------------------------------------------
# Parameter init (PyTorch-style uniform(-1/sqrt(H), 1/sqrt(H)))
# ----------------------------------------------------------------------------
def init_params(key, input_dim, emb_dim, hid_dim, n_layers):
    H = hid_dim
    k = 1.0 / math.sqrt(H)

    def uni(key, shape):
        return jax.random.uniform(key, shape, jnp.float32, minval=-k, maxval=k)

    keys = iter(jax.random.split(key, 1 + n_layers * 2 * 4 + 2))
    params = {"embedding": jax.random.normal(next(keys), (input_dim, emb_dim),
                                             jnp.float32)}

    zero_hh = jnp.zeros((H, H), jnp.float32)
    gru = []
    for layer in range(n_layers):
        in_dim = emb_dim if layer == 0 else 2 * H
        raw = {}
        for d in ("fwd", "bwd"):
            w_ih = uni(next(keys), (3 * H, in_dim))   # PyTorch layout [r,z,n]
            w_hh = uni(next(keys), (3 * H, H))
            b_ih = uni(next(keys), (3 * H,))
            b_hh = uni(next(keys), (3 * H,))
            raw[d] = dict(
                w_ih_T=w_ih.T, w_hh_T=w_hh.T,
                b_ih=b_ih.reshape(1, -1), b_hh=b_hh.reshape(1, -1),
                b_ih_raw=b_ih, b_hh_raw=b_hh)

        def fold_bias(r):
            # b_ih + [b_hh_r, b_hh_z, 0]  (n-gate hidden bias stays separate)
            return r["b_ih_raw"] + jnp.concatenate(
                [r["b_hh_raw"][:2 * H], jnp.zeros((H,), jnp.float32)])

        def interleave_whh(wT, is_fwd):
            # (H, 3H) [r|z|n] -> (H, 6H) interleaved cols [r_f r_b z_f z_b n_f n_b]
            blocks = [wT[:, 0:H], wT[:, H:2 * H], wT[:, 2 * H:3 * H]]
            cols = []
            for blk in blocks:
                cols.extend([blk, zero_hh] if is_fwd else [zero_hh, blk])
            return jnp.concatenate(cols, axis=1)

        w_in = jnp.concatenate([raw["fwd"]["w_ih_T"], raw["bwd"]["w_ih_T"]],
                               axis=1)                               # (Din, 6H)
        b_in = jnp.concatenate([fold_bias(raw["fwd"]),
                                fold_bias(raw["bwd"])]).reshape(1, 6 * H)
        w_hh = jnp.concatenate([interleave_whh(raw["fwd"]["w_hh_T"], True),
                                interleave_whh(raw["bwd"]["w_hh_T"], False)],
                               axis=0)                               # (2H, 6H)
        b_hn = jnp.concatenate([raw["fwd"]["b_hh_raw"][2 * H:],
                                raw["bwd"]["b_hh_raw"][2 * H:]]).reshape(1, 2 * H)

        gru.append(dict(w_in=w_in, b_in=b_in, w_hh=w_hh, b_hn=b_hn, raw=raw))
    params["gru"] = gru

    fc_w = uni(next(keys), (H, 2 * H))
    fc_b = uni(next(keys), (H,))
    params["fc"] = dict(w=fc_w.T, b=fc_b.reshape(1, H))   # (2H, H), (1, H)
    return params


# ----------------------------------------------------------------------------
# Encoder forward (Pallas)
# ----------------------------------------------------------------------------
def encoder_forward(src, params, hid_dim, n_layers):
    T, B = src.shape
    Bp = max(8, ((B + 7) // 8) * 8)                   # pad batch to 8 sublanes

    # TODO(synk): embedding lookup is a data-dependent gather; left as XLA glue
    #             (a scalar-prefetch row-gather kernel is overkill at this size).
    x = params["embedding"][src]                      # (T, B, E)
    # nn.Dropout: identity in eval/inference mode.
    if Bp != B:
        x = jnp.pad(x, ((0, 0), (0, Bp - B), (0, 0)))
    x = x.reshape(T * Bp, -1)                         # flat (T*Bp, E)

    hid = None
    for layer in range(n_layers):
        is_last = layer == n_layers - 1
        fc = params["fc"] if is_last else None
        x, hid = bigru_layer(x, params["gru"][layer], T, Bp, hid_dim, fc=fc)
        # Inter-layer dropout: identity in eval mode.

    output = x.reshape(T, Bp, 2 * hid_dim)[:, :B, :]  # (T, B, 2H), no concat pass
    hidden = hid[:B][None]                            # (1, B, H)
    return output, hidden


# ----------------------------------------------------------------------------
# Pure-JAX reference (for correctness check)
# ----------------------------------------------------------------------------
def gru_dir_ref(x, p, hid_dim):
    T, B, _ = x.shape
    H = hid_dim

    def step(h, x_t):
        gx = x_t @ p["w_ih_T"] + p["b_ih"]
        gh = h @ p["w_hh_T"] + p["b_hh"]
        r = jax.nn.sigmoid(gx[:, :H] + gh[:, :H])
        z = jax.nn.sigmoid(gx[:, H:2 * H] + gh[:, H:2 * H])
        n = jnp.tanh(gx[:, 2 * H:] + r * gh[:, 2 * H:])
        h_new = (1.0 - z) * n + z * h
        return h_new, h_new

    h0 = jnp.zeros((B, H), jnp.float32)
    hN, outs = lax.scan(step, h0, x)
    return outs, hN


def encoder_forward_ref(src, params, hid_dim, n_layers):
    x = params["embedding"][src]
    last = None
    for layer in range(n_layers):
        raw = params["gru"][layer]["raw"]
        out_f, h_f = gru_dir_ref(x, raw["fwd"], hid_dim)
        out_b_rev, h_b = gru_dir_ref(x[::-1], raw["bwd"], hid_dim)
        x = jnp.concatenate([out_f, out_b_rev[::-1]], axis=-1)
        last = (h_f, h_b)
    h_cat = jnp.concatenate(last, axis=-1)
    hidden = jnp.tanh(h_cat @ params["fc"]["w"] + params["fc"]["b"])[None]
    return x, hidden


# ----------------------------------------------------------------------------
# Main
# ----------------------------------------------------------------------------
if __name__ == "__main__":
    INPUT_DIM = 50     # vocab size
    EMB_DIM = 16
    HID_DIM = 32
    N_LAYERS = 2
    SEQ_LEN = 8
    BATCH = 2

    key = jax.random.PRNGKey(0)
    k_par, k_src = jax.random.split(key)
    params = init_params(k_par, INPUT_DIM, EMB_DIM, HID_DIM, N_LAYERS)
    src = jax.random.randint(k_src, (SEQ_LEN, BATCH), 0, INPUT_DIM, jnp.int32)

    fwd = jax.jit(functools.partial(encoder_forward,
                                    hid_dim=HID_DIM, n_layers=N_LAYERS))
    output, hidden = fwd(src, params)
    output = jax.block_until_ready(output)
    hidden = jax.block_until_ready(hidden)

    assert output.shape == (SEQ_LEN, BATCH, 2 * HID_DIM)
    assert hidden.shape == (1, BATCH, HID_DIM)

    out_ref, hid_ref = encoder_forward_ref(src, params, HID_DIM, N_LAYERS)
    assert jnp.allclose(output, out_ref, atol=2e-3, rtol=2e-3)
    assert jnp.allclose(hidden, hid_ref, atol=2e-3, rtol=2e-3)

    print("KERNEL_OK")
</pallas_src>

<mosaic_0001>
module attributes {stable_mosaic.version = 11 : i64} {
  func.func @_bigru_kernel(%arg0: memref<64x64xf32, #tpu.memory_space<vmem>>, %arg1: memref<64x192xf32, #tpu.memory_space<vmem>>, %arg2: memref<1x192xf32, #tpu.memory_space<vmem>>, %arg3: memref<64x192xf32, #tpu.memory_space<vmem>>, %arg4: memref<1x64xf32, #tpu.memory_space<vmem>>, %arg5: memref<64x32xf32, #tpu.memory_space<vmem>>, %arg6: memref<1x32xf32, #tpu.memory_space<vmem>>, %arg7: memref<64x64xf32, #tpu.memory_space<vmem>>, %arg8: memref<8x32xf32, #tpu.memory_space<vmem>>) attributes {dimension_semantics = [], scalar_prefetch = 0 : i64, scratch_operands = 0 : i64, tpu.core_type = #tpu.core_type<tc>} {
    %c0 = arith.constant 0 : index
    %c0_0 = arith.constant 0 : index
    %0 = vector.load %arg0[%c0, %c0_0] : memref<64x64xf32, #tpu.memory_space<vmem>>, vector<64x64xf32>
    %c0_1 = arith.constant 0 : index
    %c0_2 = arith.constant 0 : index
    %1 = vector.load %arg1[%c0_1, %c0_2] : memref<64x192xf32, #tpu.memory_space<vmem>>, vector<64x192xf32>
    %cst = arith.constant dense<0.000000e+00> : vector<64x192xf32>
    %2 = tpu.matmul %0, %1, %cst {dimension_numbers = #tpu.dot_dimension_numbers<[1], [0], [0], [1], [0, 0, 1, 1], [], []>} : vector<64x64xf32>, vector<64x192xf32>, vector<64x192xf32> -> vector<64x192xf32>
    %c0_3 = arith.constant 0 : index
    %c0_4 = arith.constant 0 : index
    %3 = vector.load %arg2[%c0_3, %c0_4] : memref<1x192xf32, #tpu.memory_space<vmem>>, vector<1x192xf32>
    %4 = vector.broadcast %3 : vector<1x192xf32> to vector<64x192xf32>
    %5 = arith.addf %2, %4 : vector<64x192xf32>
    %c0_5 = arith.constant 0 : index
    %c0_6 = arith.constant 0 : index
    %6 = vector.load %arg3[%c0_5, %c0_6] : memref<64x192xf32, #tpu.memory_space<vmem>>, vector<64x192xf32>
    %c0_7 = arith.constant 0 : index
    %c0_8 = arith.constant 0 : index
    %7 = vector.load %arg4[%c0_7, %c0_8] : memref<1x64xf32, #tpu.memory_space<vmem>>, vector<1x64xf32>
    %8 = vector.shape_cast %7 : vector<1x64xf32> to vector<1x64xf32>
    %9 = vector.broadcast %8 : vector<1x64xf32> to vector<8x64xf32>
    %cst_9 = arith.constant 0.000000e+00 : f32
    %10 = vector.broadcast %cst_9 : f32 to vector<8x64xf32>
    %11 = vector.extract_strided_slice %5 {offsets = [0, 0], sizes = [8, 96], strides = [1, 1]} : vector<64x192xf32> to vector<8x96xf32>
    %12 = vector.extract_strided_slice %5 {offsets = [56, 96], sizes = [8, 96], strides = [1, 1]} : vector<64x192xf32> to vector<8x96xf32>
    %13 = vector.extract_strided_slice %11 {offsets = [0, 0], sizes = [8, 32], strides = [1, 1]} : vector<8x96xf32> to vector<8x32xf32>
    %14 = vector.extract_strided_slice %12 {offsets = [0, 0], sizes = [8, 32], strides = [1, 1]} : vector<8x96xf32> to vector<8x32xf32>
    %15 = vector.extract_strided_slice %11 {offsets = [0, 32], sizes = [8, 32], strides = [1, 1]} : vector<8x96xf32> to vector<8x32xf32>
    %16 = vector.extract_strided_slice %12 {offsets = [0, 32], sizes = [8, 32], strides = [1, 1]} : vector<8x96xf32> to vector<8x32xf32>
    %17 = vector.extract_strided_slice %11 {offsets = [0, 64], sizes = [8, 32], strides = [1, 1]} : vector<8x96xf32> to vector<8x32xf32>
    %18 = vector.extract_strided_slice %12 {offsets = [0, 64], sizes = [8, 32], strides = [1, 1]} : vector<8x96xf32> to vector<8x32xf32>
    %19 = tpu.concatenate %13, %14, %15, %16, %17, %18 in 1 : vector<8x32xf32>, vector<8x32xf32>, vector<8x32xf32>, vector<8x32xf32>, vector<8x32xf32>, vector<8x32xf32> -> vector<8x192xf32>
    %cst_10 = arith.constant dense<0.000000e+00> : vector<8x192xf32>
    %20 = tpu.matmul %10, %6, %cst_10 {dimension_numbers = #tpu.dot_dimension_numbers<[1], [0], [0], [1], [0, 0, 1, 1], [], []>} : vector<8x64xf32>, vector<64x192xf32>, vector<8x192xf32> -> vector<8x192xf32>
    %21 = vector.extract_strided_slice %19 {offsets = [0, 0], sizes = [8, 128], strides = [1, 1]} : vector<8x192xf32> to vector<8x128xf32>
    %22 = vector.extract_strided_slice %20 {offsets = [0, 0], sizes = [8, 128], strides = [1, 1]} : vector<8x192xf32> to vector<8x128xf32>
    %23 = arith.addf %21, %22 : vector<8x128xf32>
    %24 = arith.negf %23 : vector<8x128xf32>
    %25 = math.exp %24 : vector<8x128xf32>
    %cst_11 = arith.constant 1.000000e+00 : f32
    %26 = vector.broadcast %cst_11 : f32 to vector<8x128xf32>
    %27 = arith.addf %26, %25 : vector<8x128xf32>
    %28 = arith.divf %26, %27 : vector<8x128xf32>
    %29 = vector.extract_strided_slice %28 {offsets = [0, 0], sizes = [8, 64], strides = [1, 1]} : vector<8x128xf32> to vector<8x64xf32>
    %30 = vector.extract_strided_slice %28 {offsets = [0, 64], sizes = [8, 64], strides = [1, 1]} : vector<8x128xf32> to vector<8x64xf32>
    %31 = vector.extract_strided_slice %19 {offsets = [0, 128], sizes = [8, 64], strides = [1, 1]} : vector<8x192xf32> to vector<8x64xf32>
    %32 = vector.extract_strided_slice %20 {offsets = [0, 128], sizes = [8, 64], strides = [1, 1]} : vector<8x192xf32> to vector<8x64xf32>
    %33 = arith.addf %32, %9 : vector<8x64xf32>
    %34 = arith.mulf %29, %33 : vector<8x64xf32>
    %35 = arith.addf %31, %34 : vector<8x64xf32>
    %36 = math.tanh %35 : vector<8x64xf32>
    %cst_12 = arith.constant 1.000000e+00 : f32
    %37 = vector.broadcast %cst_12 : f32 to vector<8x64xf32>
    %38 = arith.subf %37, %30 : vector<8x64xf32>
    %39 = arith.mulf %38, %36 : vector<8x64xf32>
    %40 = arith.mulf %30, %10 : vector<8x64xf32>
    %41 = arith.addf %39, %40 : vector<8x64xf32>
    %42 = vector.extract_strided_slice %41 {offsets = [0, 0], sizes = [8, 32], strides = [1, 1]} : vector<8x64xf32> to vector<8x32xf32>
    %c0_13 = arith.constant 0 : index
    %c0_14 = arith.constant 0 : index
    %43 = vector.load %arg7[%c0_13, %c0_14] : memref<64x64xf32, #tpu.memory_space<vmem>>, vector<8x32xf32>
    tpu.vector_store %arg7[%c0_13, %c0_14], %42 {strides = array<i32>} : memref<64x64xf32, #tpu.memory_space<vmem>>, vector<8x32xf32>,
    %44 = vector.extract_strided_slice %41 {offsets = [0, 32], sizes = [8, 32], strides = [1, 1]} : vector<8x64xf32> to vector<8x32xf32>
    %c56 = arith.constant 56 : index
    %c32 = arith.constant 32 : index
    %45 = vector.load %arg7[%c56, %c32] : memref<64x64xf32, #tpu.memory_space<vmem>>, vector<8x32xf32>
    tpu.vector_store %arg7[%c56, %c32], %44 {strides = array<i32>} : memref<64x64xf32, #tpu.memory_space<vmem>>, vector<8x32xf32>,
    %46 = vector.extract_strided_slice %5 {offsets = [8, 0], sizes = [8, 96], strides = [1, 1]} : vector<64x192xf32> to vector<8x96xf32>
    %47 = vector.extract_strided_slice %5 {offsets = [48, 96], sizes = [8, 96], strides = [1, 1]} : vector<64x192xf32> to vector<8x96xf32>
    %48 = vector.extract_strided_slice %46 {offsets = [0, 0], sizes = [8, 32], strides = [1, 1]} : vector<8x96xf32> to vector<8x32xf32>
    %49 = vector.extract_strided_slice %47 {offsets = [0, 0], sizes = [8, 32], strides = [1, 1]} : vector<8x96xf32> to vector<8x32xf32>
    %50 = vector.extract_strided_slice %46 {offsets = [0, 32], sizes = [8, 32], strides = [1, 1]} : vector<8x96xf32> to vector<8x32xf32>
    %51 = vector.extract_strided_slice %47 {offsets = [0, 32], sizes = [8, 32], strides = [1, 1]} : vector<8x96xf32> to vector<8x32xf32>
    %52 = vector.extract_strided_slice %46 {offsets = [0, 64], sizes = [8, 32], strides = [1, 1]} : vector<8x96xf32> to vector<8x32xf32>
    %53 = vector.extract_strided_slice %47 {offsets = [0, 64], sizes = [8, 32], strides = [1, 1]} : vector<8x96xf32> to vector<8x32xf32>
    %54 = tpu.concatenate %48, %49, %50, %51, %52, %53 in 1 : vector<8x32xf32>, vector<8x32xf32>, vector<8x32xf32>, vector<8x32xf32>, vector<8x32xf32>, vector<8x32xf32> -> vector<8x192xf32>
    %cst_15 = arith.constant dense<0.000000e+00> : vector<8x192xf32>
    %55 = tpu.matmul %41, %6, %cst_15 {dimension_numbers = #tpu.dot_dimension_numbers<[1], [0], [0], [1], [0, 0, 1, 1], [], []>} : vector<8x64xf32>, vector<64x192xf32>, vector<8x192xf32> -> vector<8x192xf32>
    %56 = vector.extract_strided_slice %54 {offsets = [0, 0], sizes = [8, 128], strides = [1, 1]} : vector<8x192xf32> to vector<8x128xf32>
    %57 = vector.extract_strided_slice %55 {offsets = [0, 0], sizes = [8, 128], strides = [1, 1]} : vector<8x192xf32> to vector<8x128xf32>
    %58 = arith.addf %56, %57 : vector<8x128xf32>
    %59 = arith.negf %58 : vector<8x128xf32>
    %60 = math.exp %59 : vector<8x128xf32>
    %cst_16 = arith.constant 1.000000e+00 : f32
    %61 = vector.broadcast %cst_16 : f32 to vector<8x128xf32>
    %62 = arith.addf %61, %60 : vector<8x128xf32>
    %63 = arith.divf %61, %62 : vector<8x128xf32>
    %64 = vector.extract_strided_slice %63 {offsets = [0, 0], sizes = [8, 64], strides = [1, 1]} : vector<8x128xf32> to vector<8x64xf32>
    %65 = vector.extract_strided_slice %63 {offsets = [0, 64], sizes = [8, 64], strides = [1, 1]} : vector<8x128xf32> to vector<8x64xf32>
    %66 = vector.extract_strided_slice %54 {offsets = [0, 128], sizes = [8, 64], strides = [1, 1]} : vector<8x192xf32> to vector<8x64xf32>
    %67 = vector.extract_strided_slice %55 {offsets = [0, 128], sizes = [8, 64], strides = [1, 1]} : vector<8x192xf32> to vector<8x64xf32>
    %68 = arith.addf %67, %9 : vector<8x64xf32>
    %69 = arith.mulf %64, %68 : vector<8x64xf32>
    %70 = arith.addf %66, %69 : vector<8x64xf32>
    %71 = math.tanh %70 : vector<8x64xf32>
    %cst_17 = arith.constant 1.000000e+00 : f32
    %72 = vector.broadcast %cst_17 : f32 to vector<8x64xf32>
    %73 = arith.subf %72, %65 : vector<8x64xf32>
    %74 = arith.mulf %73, %71 : vector<8x64xf32>
    %75 = arith.mulf %65, %41 : vector<8x64xf32>
    %76 = arith.addf %74, %75 : vector<8x64xf32>
    %77 = vector.extract_strided_slice %76 {offsets = [0, 0], sizes = [8, 32], strides = [1, 1]} : vector<8x64xf32> to vector<8x32xf32>
    %c8 = arith.constant 8 : index
    %c0_18 = arith.constant 0 : index
    %78 = vector.load %arg7[%c8, %c0_18] : memref<64x64xf32, #tpu.memory_space<vmem>>, vector<8x32xf32>
    tpu.vector_store %arg7[%c8, %c0_18], %77 {strides = array<i32>} : memref<64x64xf32, #tpu.memory_space<vmem>>, vector<8x32xf32>,
    %79 = vector.extract_strided_slice %76 {offsets = [0, 32], sizes = [8, 32], strides = [1, 1]} : vector<8x64xf32> to vector<8x32xf32>
    %c48 = arith.constant 48 : index
    %c32_19 = arith.constant 32 : index
    %80 = vector.load %arg7[%c48, %c32_19] : memref<64x64xf32, #tpu.memory_space<vmem>>, vector<8x32xf32>
    tpu.vector_store %arg7[%c48, %c32_19], %79 {strides = array<i32>} : memref<64x64xf32, #tpu.memory_space<vmem>>, vector<8x32xf32>,
    %81 = vector.extract_strided_slice %5 {offsets = [16, 0], sizes = [8, 96], strides = [1, 1]} : vector<64x192xf32> to vector<8x96xf32>
    %82 = vector.extract_strided_slice %5 {offsets = [40, 96], sizes = [8, 96], strides = [1, 1]} : vector<64x192xf32> to vector<8x96xf32>
    %83 = vector.extract_strided_slice %81 {offsets = [0, 0], sizes = [8, 32], strides = [1, 1]} : vector<8x96xf32> to vector<8x32xf32>
    %84 = vector.extract_strided_slice %82 {offsets = [0, 0], sizes = [8, 32], strides = [1, 1]} : vector<8x96xf32> to vector<8x32xf32>
    %85 = vector.extract_strided_slice %81 {offsets = [0, 32], sizes = [8, 32], strides = [1, 1]} : vector<8x96xf32> to vector<8x32xf32>
    %86 = vector.extract_strided_slice %82 {offsets = [0, 32], sizes = [8, 32], strides = [1, 1]} : vector<8x96xf32> to vector<8x32xf32>
    %87 = vector.extract_strided_slice %81 {offsets = [0, 64], sizes = [8, 32], strides = [1, 1]} : vector<8x96xf32> to vector<8x32xf32>
    %88 = vector.extract_strided_slice %82 {offsets = [0, 64], sizes = [8, 32], strides = [1, 1]} : vector<8x96xf32> to vector<8x32xf32>
    %89 = tpu.concatenate %83, %84, %85, %86, %87, %88 in 1 : vector<8x32xf32>, vector<8x32xf32>, vector<8x32xf32>, vector<8x32xf32>, vector<8x32xf32>, vector<8x32xf32> -> vector<8x192xf32>
    %cst_20 = arith.constant dense<0.000000e+00> : vector<8x192xf32>
    %90 = tpu.matmul %76, %6, %cst_20 {dimension_numbers = #tpu.dot_dimension_numbers<[1], [0], [0], [1], [0, 0, 1, 1], [], []>} : vector<8x64xf32>, vector<64x192xf32>, vector<8x192xf32> -> vector<8x192xf32>
    %91 = vector.extract_strided_slice %89 {offsets = [0, 0], sizes = [8, 128], strides = [1, 1]} : vector<8x192xf32> to vector<8x128xf32>
    %92 = vector.extract_strided_slice %90 {offsets = [0, 0], sizes = [8, 128], strides = [1, 1]} : vector<8x192xf32> to vector<8x128xf32>
    %93 = arith.addf %91, %92 : vector<8x128xf32>
    %94 = arith.negf %93 : vector<8x128xf32>
    %95 = math.exp %94 : vector<8x128xf32>
    %cst_21 = arith.constant 1.000000e+00 : f32
    %96 = vector.broadcast %cst_21 : f32 to vector<8x128xf32>
    %97 = arith.addf %96, %95 : vector<8x128xf32>
    %98 = arith.divf %96, %97 : vector<8x128xf32>
    %99 = vector.extract_strided_slice %98 {offsets = [0, 0], sizes = [8, 64], strides = [1, 1]} : vector<8x128xf32> to vector<8x64xf32>
    %100 = vector.extract_strided_slice %98 {offsets = [0, 64], sizes = [8, 64], strides = [1, 1]} : vector<8x128xf32> to vector<8x64xf32>
    %101 = vector.extract_strided_slice %89 {offsets = [0, 128], sizes = [8, 64], strides = [1, 1]} : vector<8x192xf32> to vector<8x64xf32>
    %102 = vector.extract_strided_slice %90 {offsets = [0, 128], sizes = [8, 64], strides = [1, 1]} : vector<8x192xf32> to vector<8x64xf32>
    %103 = arith.addf %102, %9 : vector<8x64xf32>
    %104 = arith.mulf %99, %103 : vector<8x64xf32>
    %105 = arith.addf %101, %104 : vector<8x64xf32>
    %106 = math.tanh %105 : vector<8x64xf32>
    %cst_22 = arith.constant 1.000000e+00 : f32
    %107 = vector.broadcast %cst_22 : f32 to vector<8x64xf32>
    %108 = arith.subf %107, %100 : vector<8x64xf32>
    %109 = arith.mulf %108, %106 : vector<8x64xf32>
    %110 = arith.mulf %100, %76 : vector<8x64xf32>
    %111 = arith.addf %109, %110 : vector<8x64xf32>
    %112 = vector.extract_strided_slice %111 {offsets = [0, 0], sizes = [8, 32], strides = [1, 1]} : vector<8x64xf32> to vector<8x32xf32>
    %c16 = arith.constant 16 : index
    %c0_23 = arith.constant 0 : index
    %113 = vector.load %arg7[%c16, %c0_23] : memref<64x64xf32, #tpu.memory_space<vmem>>, vector<8x32xf32>
    tpu.vector_store %arg7[%c16, %c0_23], %112 {strides = array<i32>} : memref<64x64xf32, #tpu.memory_space<vmem>>, vector<8x32xf32>,
    %114 = vector.extract_strided_slice %111 {offsets = [0, 32], sizes = [8, 32], strides = [1, 1]} : vector<8x64xf32> to vector<8x32xf32>
    %c40 = arith.constant 40 : index
    %c32_24 = arith.constant 32 : index
    %115 = vector.load %arg7[%c40, %c32_24] : memref<64x64xf32, #tpu.memory_space<vmem>>, vector<8x32xf32>
    tpu.vector_store %arg7[%c40, %c32_24], %114 {strides = array<i32>} : memref<64x64xf32, #tpu.memory_space<vmem>>, vector<8x32xf32>,
    %116 = vector.extract_strided_slice %5 {offsets = [24, 0], sizes = [8, 96], strides = [1, 1]} : vector<64x192xf32> to vector<8x96xf32>
    %117 = vector.extract_strided_slice %5 {offsets = [32, 96], sizes = [8, 96], strides = [1, 1]} : vector<64x192xf32> to vector<8x96xf32>
    %118 = vector.extract_strided_slice %116 {offsets = [0, 0], sizes = [8, 32], strides = [1, 1]} : vector<8x96xf32> to vector<8x32xf32>
    %119 = vector.extract_strided_slice %117 {offsets = [0, 0], sizes = [8, 32], strides = [1, 1]} : vector<8x96xf32> to vector<8x32xf32>
    %120 = vector.extract_strided_slice %116 {offsets = [0, 32], sizes = [8, 32], strides = [1, 1]} : vector<8x96xf32> to vector<8x32xf32>
    %121 = vector.extract_strided_slice %117 {offsets = [0, 32], sizes = [8, 32], strides = [1, 1]} : vector<8x96xf32> to vector<8x32xf32>
    %122 = vector.extract_strided_slice %116 {offsets = [0, 64], sizes = [8, 32], strides = [1, 1]} : vector<8x96xf32> to vector<8x32xf32>
    %123 = vector.extract_strided_slice %117 {offsets = [0, 64], sizes = [8, 32], strides = [1, 1]} : vector<8x96xf32> to vector<8x32xf32>
    %124 = tpu.concatenate %118, %119, %120, %121, %122, %123 in 1 : vector<8x32xf32>, vector<8x32xf32>, vector<8x32xf32>, vector<8x32xf32>, vector<8x32xf32>, vector<8x32xf32> -> vector<8x192xf32>
    %cst_25 = arith.constant dense<0.000000e+00> : vector<8x192xf32>
    %125 = tpu.matmul %111, %6, %cst_25 {dimension_numbers = #tpu.dot_dimension_numbers<[1], [0], [0], [1], [0, 0, 1, 1], [], []>} : vector<8x64xf32>, vector<64x192xf32>, vector<8x192xf32> -> vector<8x192xf32>
    %126 = vector.extract_strided_slice %124 {offsets = [0, 0], sizes = [8, 128], strides = [1, 1]} : vector<8x192xf32> to vector<8x128xf32>
    %127 = vector.extract_strided_slice %125 {offsets = [0, 0], sizes = [8, 128], strides = [1, 1]} : vector<8x192xf32> to vector<8x128xf32>
    %128 = arith.addf %126, %127 : vector<8x128xf32>
    %129 = arith.negf %128 : vector<8x128xf32>
    %130 = math.exp %129 : vector<8x128xf32>
    %cst_26 = arith.constant 1.000000e+00 : f32
    %131 = vector.broadcast %cst_26 : f32 to vector<8x128xf32>
    %132 = arith.addf %131, %130 : vector<8x128xf32>
    %133 = arith.divf %131, %132 : vector<8x128xf32>
    %134 = vector.extract_strided_slice %133 {offsets = [0, 0], sizes = [8, 64], strides = [1, 1]} : vector<8x128xf32> to vector<8x64xf32>
    %135 = vector.extract_strided_slice %133 {offsets = [0, 64], sizes = [8, 64], strides = [1, 1]} : vector<8x128xf32> to vector<8x64xf32>
    %136 = vector.extract_strided_slice %124 {offsets = [0, 128], sizes = [8, 64], strides = [1, 1]} : vector<8x192xf32> to vector<8x64xf32>
    %137 = vector.extract_strided_slice %125 {offsets = [0, 128], sizes = [8, 64], strides = [1, 1]} : vector<8x192xf32> to vector<8x64xf32>
    %138 = arith.addf %137, %9 : vector<8x64xf32>
    %139 = arith.mulf %134, %138 : vector<8x64xf32>
    %140 = arith.addf %136, %139 : vector<8x64xf32>
    %141 = math.tanh %140 : vector<8x64xf32>
    %cst_27 = arith.constant 1.000000e+00 : f32
    %142 = vector.broadcast %cst_27 : f32 to vector<8x64xf32>
    %143 = arith.subf %142, %135 : vector<8x64xf32>
    %144 = arith.mulf %143, %141 : vector<8x64xf32>
    %145 = arith.mulf %135, %111 : vector<8x64xf32>
    %146 = arith.addf %144, %145 : vector<8x64xf32>
    %147 = vector.extract_strided_slice %146 {offsets = [0, 0], sizes = [8, 32], strides = [1, 1]} : vector<8x64xf32> to vector<8x32xf32>
    %c24 = arith.constant 24 : index
    %c0_28 = arith.constant 0 : index
    %148 = vector.load %arg7[%c24, %c0_28] : memref<64x64xf32, #tpu.memory_space<vmem>>, vector<8x32xf32>
    tpu.vector_store %arg7[%c24, %c0_28], %147 {strides = array<i32>} : memref<64x64xf32, #tpu.memory_space<vmem>>, vector<8x32xf32>,
    %149 = vector.extract_strided_slice %146 {offsets = [0, 32], sizes = [8, 32], strides = [1, 1]} : vector<8x64xf32> to vector<8x32xf32>
    %c32_29 = arith.constant 32 : index
    %c32_30 = arith.constant 32 : index
    %150 = vector.load %arg7[%c32_29, %c32_30] : memref<64x64xf32, #tpu.memory_space<vmem>>, vector<8x32xf32>
    tpu.vector_store %arg7[%c32_29, %c32_30], %149 {strides = array<i32>} : memref<64x64xf32, #tpu.memory_space<vmem>>, vector<8x32xf32>,
    %151 = vector.extract_strided_slice %5 {offsets = [32, 0], sizes = [8, 96], strides = [1, 1]} : vector<64x192xf32> to vector<8x96xf32>
    %152 = vector.extract_strided_slice %5 {offsets = [24, 96], sizes = [8, 96], strides = [1, 1]} : vector<64x192xf32> to vector<8x96xf32>
    %153 = vector.extract_strided_slice %151 {offsets = [0, 0], sizes = [8, 32], strides = [1, 1]} : vector<8x96xf32> to vector<8x32xf32>
    %154 = vector.extract_strided_slice %152 {offsets = [0, 0], sizes = [8, 32], strides = [1, 1]} : vector<8x96xf32> to vector<8x32xf32>
    %155 = vector.extract_strided_slice %151 {offsets = [0, 32], sizes = [8, 32], strides = [1, 1]} : vector<8x96xf32> to vector<8x32xf32>
    %156 = vector.extract_strided_slice %152 {offsets = [0, 32], sizes = [8, 32], strides = [1, 1]} : vector<8x96xf32> to vector<8x32xf32>
    %157 = vector.extract_strided_slice %151 {offsets = [0, 64], sizes = [8, 32], strides = [1, 1]} : vector<8x96xf32> to vector<8x32xf32>
    %158 = vector.extract_strided_slice %152 {offsets = [0, 64], sizes = [8, 32], strides = [1, 1]} : vector<8x96xf32> to vector<8x32xf32>
    %159 = tpu.concatenate %153, %154, %155, %156, %157, %158 in 1 : vector<8x32xf32>, vector<8x32xf32>, vector<8x32xf32>, vector<8x32xf32>, vector<8x32xf32>, vector<8x32xf32> -> vector<8x192xf32>
    %cst_31 = arith.constant dense<0.000000e+00> : vector<8x192xf32>
    %160 = tpu.matmul %146, %6, %cst_31 {dimension_numbers = #tpu.dot_dimension_numbers<[1], [0], [0], [1], [0, 0, 1, 1], [], []>} : vector<8x64xf32>, vector<64x192xf32>, vector<8x192xf32> -> vector<8x192xf32>
    %161 = vector.extract_strided_slice %159 {offsets = [0, 0], sizes = [8, 128], strides = [1, 1]} : vector<8x192xf32> to vector<8x128xf32>
    %162 = vector.extract_strided_slice %160 {offsets = [0, 0], sizes = [8, 128], strides = [1, 1]} : vector<8x192xf32> to vector<8x128xf32>
    %163 = arith.addf %161, %162 : vector<8x128xf32>
    %164 = arith.negf %163 : vector<8x128xf32>
    %165 = math.exp %164 : vector<8x128xf32>
    %cst_32 = arith.constant 1.000000e+00 : f32
    %166 = vector.broadcast %cst_32 : f32 to vector<8x128xf32>
    %167 = arith.addf %166, %165 : vector<8x128xf32>
    %168 = arith.divf %166, %167 : vector<8x128xf32>
    %169 = vector.extract_strided_slice %168 {offsets = [0, 0], sizes = [8, 64], strides = [1, 1]} : vector<8x128xf32> to vector<8x64xf32>
    %170 = vector.extract_strided_slice %168 {offsets = [0, 64], sizes = [8, 64], strides = [1, 1]} : vector<8x128xf32> to vector<8x64xf32>
    %171 = vector.extract_strided_slice %159 {offsets = [0, 128], sizes = [8, 64], strides = [1, 1]} : vector<8x192xf32> to vector<8x64xf32>
    %172 = vector.extract_strided_slice %160 {offsets = [0, 128], sizes = [8, 64], strides = [1, 1]} : vector<8x192xf32> to vector<8x64xf32>
    %173 = arith.addf %172, %9 : vector<8x64xf32>
    %174 = arith.mulf %169, %173 : vector<8x64xf32>
    %175 = arith.addf %171, %174 : vector<8x64xf32>
    %176 = math.tanh %175 : vector<8x64xf32>
    %cst_33 = arith.constant 1.000000e+00 : f32
    %177 = vector.broadcast %cst_33 : f32 to vector<8x64xf32>
    %178 = arith.subf %177, %170 : vector<8x64xf32>
    %179 = arith.mulf %178, %176 : vector<8x64xf32>
    %180 = arith.mulf %170, %146 : vector<8x64xf32>
    %181 = arith.addf %179, %180 : vector<8x64xf32>
    %182 = vector.extract_strided_slice %181 {offsets = [0, 0], sizes = [8, 32], strides = [1, 1]} : vector<8x64xf32> to vector<8x32xf32>
    %c32_34 = arith.constant 32 : index
    %c0_35 = arith.constant 0 : index
    %183 = vector.load %arg7[%c32_34, %c0_35] : memref<64x64xf32, #tpu.memory_space<vmem>>, vector<8x32xf32>
    tpu.vector_store %arg7[%c32_34, %c0_35], %182 {strides = array<i32>} : memref<64x64xf32, #tpu.memory_space<vmem>>, vector<8x32xf32>,
    %184 = vector.extract_strided_slice %181 {offsets = [0, 32], sizes = [8, 32], strides = [1, 1]} : vector<8x64xf32> to vector<8x32xf32>
    %c24_36 = arith.constant 24 : index
    %c32_37 = arith.constant 32 : index
    %185 = vector.load %arg7[%c24_36, %c32_37] : memref<64x64xf32, #tpu.memory_space<vmem>>, vector<8x32xf32>
    tpu.vector_store %arg7[%c24_36, %c32_37], %184 {strides = array<i32>} : memref<64x64xf32, #tpu.memory_space<vmem>>, vector<8x32xf32>,
    %186 = vector.extract_strided_slice %5 {offsets = [40, 0], sizes = [8, 96], strides = [1, 1]} : vector<64x192xf32> to vector<8x96xf32>
    %187 = vector.extract_strided_slice %5 {offsets = [16, 96], sizes = [8, 96], strides = [1, 1]} : vector<64x192xf32> to vector<8x96xf32>
    %188 = vector.extract_strided_slice %186 {offsets = [0, 0], sizes = [8, 32], strides = [1, 1]} : vector<8x96xf32> to vector<8x32xf32>
    %189 = vector.extract_strided_slice %187 {offsets = [0, 0], sizes = [8, 32], strides = [1, 1]} : vector<8x96xf32> to vector<8x32xf32>
    %190 = vector.extract_strided_slice %186 {offsets = [0, 32], sizes = [8, 32], strides = [1, 1]} : vector<8x96xf32> to vector<8x32xf32>
    %191 = vector.extract_strided_slice %187 {offsets = [0, 32], sizes = [8, 32], strides = [1, 1]} : vector<8x96xf32> to vector<8x32xf32>
    %192 = vector.extract_strided_slice %186 {offsets = [0, 64], sizes = [8, 32], strides = [1, 1]} : vector<8x96xf32> to vector<8x32xf32>
    %193 = vector.extract_strided_slice %187 {offsets = [0, 64], sizes = [8, 32], strides = [1, 1]} : vector<8x96xf32> to vector<8x32xf32>
    %194 = tpu.concatenate %188, %189, %190, %191, %192, %193 in 1 : vector<8x32xf32>, vector<8x32xf32>, vector<8x32xf32>, vector<8x32xf32>, vector<8x32xf32>, vector<8x32xf32> -> vector<8x192xf32>
    %cst_38 = arith.constant dense<0.000000e+00> : vector<8x192xf32>
    %195 = tpu.matmul %181, %6, %cst_38 {dimension_numbers = #tpu.dot_dimension_numbers<[1], [0], [0], [1], [0, 0, 1, 1], [], []>} : vector<8x64xf32>, vector<64x192xf32>, vector<8x192xf32> -> vector<8x192xf32>
    %196 = vector.extract_strided_slice %194 {offsets = [0, 0], sizes = [8, 128], strides = [1, 1]} : vector<8x192xf32> to vector<8x128xf32>
    %197 = vector.extract_strided_slice %195 {offsets = [0, 0], sizes = [8, 128], strides = [1, 1]} : vector<8x192xf32> to vector<8x128xf32>
    %198 = arith.addf %196, %197 : vector<8x128xf32>
    %199 = arith.negf %198 : vector<8x128xf32>
    %200 = math.exp %199 : vector<8x128xf32>
    %cst_39 = arith.constant 1.000000e+00 : f32
    %201 = vector.broadcast %cst_39 : f32 to vector<8x128xf32>
    %202 = arith.addf %201, %200 : vector<8x128xf32>
    %203 = arith.divf %201, %202 : vector<8x128xf32>
    %204 = vector.extract_strided_slice %203 {offsets = [0, 0], sizes = [8, 64], strides = [1, 1]} : vector<8x128xf32> to vector<8x64xf32>
    %205 = vector.extract_strided_slice %203 {offsets = [0, 64], sizes = [8, 64], strides = [1, 1]} : vector<8x128xf32> to vector<8x64xf32>
    %206 = vector.extract_strided_slice %194 {offsets = [0, 128], sizes = [8, 64], strides = [1, 1]} : vector<8x192xf32> to vector<8x64xf32>
    %207 = vector.extract_strided_slice %195 {offsets = [0, 128], sizes = [8, 64], strides = [1, 1]} : vector<8x192xf32> to vector<8x64xf32>
    %208 = arith.addf %207, %9 : vector<8x64xf32>
    %209 = arith.mulf %204, %208 : vector<8x64xf32>
    %210 = arith.addf %206, %209 : vector<8x64xf32>
    %211 = math.tanh %210 : vector<8x64xf32>
    %cst_40 = arith.constant 1.000000e+00 : f32
    %212 = vector.broadcast %cst_40 : f32 to vector<8x64xf32>
    %213 = arith.subf %212, %205 : vector<8x64xf32>
    %214 = arith.mulf %213, %211 : vector<8x64xf32>
    %215 = arith.mulf %205, %181 : vector<8x64xf32>
    %216 = arith.addf %214, %215 : vector<8x64xf32>
    %217 = vector.extract_strided_slice %216 {offsets = [0, 0], sizes = [8, 32], strides = [1, 1]} : vector<8x64xf32> to vector<8x32xf32>
    %c40_41 = arith.constant 40 : index
    %c0_42 = arith.constant 0 : index
    %218 = vector.load %arg7[%c40_41, %c0_42] : memref<64x64xf32, #tpu.memory_space<vmem>>, vector<8x32xf32>
    tpu.vector_store %arg7[%c40_41, %c0_42], %217 {strides = array<i32>} : memref<64x64xf32, #tpu.memory_space<vmem>>, vector<8x32xf32>,
    %219 = vector.extract_strided_slice %216 {offsets = [0, 32], sizes = [8, 32], strides = [1, 1]} : vector<8x64xf32> to vector<8x32xf32>
    %c16_43 = arith.constant 16 : index
    %c32_44 = arith.constant 32 : index
    %220 = vector.load %arg7[%c16_43, %c32_44] : memref<64x64xf32, #tpu.memory_space<vmem>>, vector<8x32xf32>
    tpu.vector_store %arg7[%c16_43, %c32_44], %219 {strides = array<i32>} : memref<64x64xf32, #tpu.memory_space<vmem>>, vector<8x32xf32>,
    %221 = vector.extract_strided_slice %5 {offsets = [48, 0], sizes = [8, 96], strides = [1, 1]} : vector<64x192xf32> to vector<8x96xf32>
    %222 = vector.extract_strided_slice %5 {offsets = [8, 96], sizes = [8, 96], strides = [1, 1]} : vector<64x192xf32> to vector<8x96xf32>
    %223 = vector.extract_strided_slice %221 {offsets = [0, 0], sizes = [8, 32], strides = [1, 1]} : vector<8x96xf32> to vector<8x32xf32>
    %224 = vector.extract_strided_slice %222 {offsets = [0, 0], sizes = [8, 32], strides = [1, 1]} : vector<8x96xf32> to vector<8x32xf32>
    %225 = vector.extract_strided_slice %221 {offsets = [0, 32], sizes = [8, 32], strides = [1, 1]} : vector<8x96xf32> to vector<8x32xf32>
    %226 = vector.extract_strided_slice %222 {offsets = [0, 32], sizes = [8, 32], strides = [1, 1]} : vector<8x96xf32> to vector<8x32xf32>
    %227 = vector.extract_strided_slice %221 {offsets = [0, 64], sizes = [8, 32], strides = [1, 1]} : vector<8x96xf32> to vector<8x32xf32>
    %228 = vector.extract_strided_slice %222 {offsets = [0, 64], sizes = [8, 32], strides = [1, 1]} : vector<8x96xf32> to vector<8x32xf32>
    %229 = tpu.concatenate %223, %224, %225, %226, %227, %228 in 1 : vector<8x32xf32>, vector<8x32xf32>, vector<8x32xf32>, vector<8x32xf32>, vector<8x32xf32>, vector<8x32xf32> -> vector<8x192xf32>
    %cst_45 = arith.constant dense<0.000000e+00> : vector<8x192xf32>
    %230 = tpu.matmul %216, %6, %cst_45 {dimension_numbers = #tpu.dot_dimension_numbers<[1], [0], [0], [1], [0, 0, 1, 1], [], []>} : vector<8x64xf32>, vector<64x192xf32>, vector<8x192xf32> -> vector<8x192xf32>
    %231 = vector.extract_strided_slice %229 {offsets = [0, 0], sizes = [8, 128], strides = [1, 1]} : vector<8x192xf32> to vector<8x128xf32>
    %232 = vector.extract_strided_slice %230 {offsets = [0, 0], sizes = [8, 128], strides = [1, 1]} : vector<8x192xf32> to vector<8x128xf32>
    %233 = arith.addf %231, %232 : vector<8x128xf32>
    %234 = arith.negf %233 : vector<8x128xf32>
    %235 = math.exp %234 : vector<8x128xf32>
    %cst_46 = arith.constant 1.000000e+00 : f32
    %236 = vector.broadcast %cst_46 : f32 to vector<8x128xf32>
    %237 = arith.addf %236, %235 : vector<8x128xf32>
    %238 = arith.divf %236, %237 : vector<8x128xf32>
    %239 = vector.extract_strided_slice %238 {offsets = [0, 0], sizes = [8, 64], strides = [1, 1]} : vector<8x128xf32> to vector<8x64xf32>
    %240 = vector.extract_strided_slice %238 {offsets = [0, 64], sizes = [8, 64], strides = [1, 1]} : vector<8x128xf32> to vector<8x64xf32>
    %241 = vector.extract_strided_slice %229 {offsets = [0, 128], sizes = [8, 64], strides = [1, 1]} : vector<8x192xf32> to vector<8x64xf32>
    %242 = vector.extract_strided_slice %230 {offsets = [0, 128], sizes = [8, 64], strides = [1, 1]} : vector<8x192xf32> to vector<8x64xf32>
    %243 = arith.addf %242, %9 : vector<8x64xf32>
    %244 = arith.mulf %239, %243 : vector<8x64xf32>
    %245 = arith.addf %241, %244 : vector<8x64xf32>
    %246 = math.tanh %245 : vector<8x64xf32>
    %cst_47 = arith.constant 1.000000e+00 : f32
    %247 = vector.broadcast %cst_47 : f32 to vector<8x64xf32>
    %248 = arith.subf %247, %240 : vector<8x64xf32>
    %249 = arith.mulf %248, %246 : vector<8x64xf32>
    %250 = arith.mulf %240, %216 : vector<8x64xf32>
    %251 = arith.addf %249, %250 : vector<8x64xf32>
    %252 = vector.extract_strided_slice %251 {offsets = [0, 0], sizes = [8, 32], strides = [1, 1]} : vector<8x64xf32> to vector<8x32xf32>
    %c48_48 = arith.constant 48 : index
    %c0_49 = arith.constant 0 : index
    %253 = vector.load %arg7[%c48_48, %c0_49] : memref<64x64xf32, #tpu.memory_space<vmem>>, vector<8x32xf32>
    tpu.vector_store %arg7[%c48_48, %c0_49], %252 {strides = array<i32>} : memref<64x64xf32, #tpu.memory_space<vmem>>, vector<8x32xf32>,
    %254 = vector.extract_strided_slice %251 {offsets = [0, 32], sizes = [8, 32], strides = [1, 1]} : vector<8x64xf32> to vector<8x32xf32>
    %c8_50 = arith.constant 8 : index
    %c32_51 = arith.constant 32 : index
    %255 = vector.load %arg7[%c8_50, %c32_51] : memref<64x64xf32, #tpu.memory_space<vmem>>, vector<8x32xf32>
    tpu.vector_store %arg7[%c8_50, %c32_51], %254 {strides = array<i32>} : memref<64x64xf32, #tpu.memory_space<vmem>>, vector<8x32xf32>,
    %256 = vector.extract_strided_slice %5 {offsets = [56, 0], sizes = [8, 96], strides = [1, 1]} : vector<64x192xf32> to vector<8x96xf32>
    %257 = vector.extract_strided_slice %5 {offsets = [0, 96], sizes = [8, 96], strides = [1, 1]} : vector<64x192xf32> to vector<8x96xf32>
    %258 = vector.extract_strided_slice %256 {offsets = [0, 0], sizes = [8, 32], strides = [1, 1]} : vector<8x96xf32> to vector<8x32xf32>
    %259 = vector.extract_strided_slice %257 {offsets = [0, 0], sizes = [8, 32], strides = [1, 1]} : vector<8x96xf32> to vector<8x32xf32>
    %260 = vector.extract_strided_slice %256 {offsets = [0, 32], sizes = [8, 32], strides = [1, 1]} : vector<8x96xf32> to vector<8x32xf32>
    %261 = vector.extract_strided_slice %257 {offsets = [0, 32], sizes = [8, 32], strides = [1, 1]} : vector<8x96xf32> to vector<8x32xf32>
    %262 = vector.extract_strided_slice %256 {offsets = [0, 64], sizes = [8, 32], strides = [1, 1]} : vector<8x96xf32> to vector<8x32xf32>
    %263 = vector.extract_strided_slice %257 {offsets = [0, 64], sizes = [8, 32], strides = [1, 1]} : vector<8x96xf32> to vector<8x32xf32>
    %264 = tpu.concatenate %258, %259, %260, %261, %262, %263 in 1 : vector<8x32xf32>, vector<8x32xf32>, vector<8x32xf32>, vector<8x32xf32>, vector<8x32xf32>, vector<8x32xf32> -> vector<8x192xf32>
    %cst_52 = arith.constant dense<0.000000e+00> : vector<8x192xf32>
    %265 = tpu.matmul %251, %6, %cst_52 {dimension_numbers = #tpu.dot_dimension_numbers<[1], [0], [0], [1], [0, 0, 1, 1], [], []>} : vector<8x64xf32>, vector<64x192xf32>, vector<8x192xf32> -> vector<8x192xf32>
    %266 = vector.extract_strided_slice %264 {offsets = [0, 0], sizes = [8, 128], strides = [1, 1]} : vector<8x192xf32> to vector<8x128xf32>
    %267 = vector.extract_strided_slice %265 {offsets = [0, 0], sizes = [8, 128], strides = [1, 1]} : vector<8x192xf32> to vector<8x128xf32>
    %268 = arith.addf %266, %267 : vector<8x128xf32>
    %269 = arith.negf %268 : vector<8x128xf32>
    %270 = math.exp %269 : vector<8x128xf32>
    %cst_53 = arith.constant 1.000000e+00 : f32
    %271 = vector.broadcast %cst_53 : f32 to vector<8x128xf32>
    %272 = arith.addf %271, %270 : vector<8x128xf32>
    %273 = arith.divf %271, %272 : vector<8x128xf32>
    %274 = vector.extract_strided_slice %273 {offsets = [0, 0], sizes = [8, 64], strides = [1, 1]} : vector<8x128xf32> to vector<8x64xf32>
    %275 = vector.extract_strided_slice %273 {offsets = [0, 64], sizes = [8, 64], strides = [1, 1]} : vector<8x128xf32> to vector<8x64xf32>
    %276 = vector.extract_strided_slice %264 {offsets = [0, 128], sizes = [8, 64], strides = [1, 1]} : vector<8x192xf32> to vector<8x64xf32>
    %277 = vector.extract_strided_slice %265 {offsets = [0, 128], sizes = [8, 64], strides = [1, 1]} : vector<8x192xf32> to vector<8x64xf32>
    %278 = arith.addf %277, %9 : vector<8x64xf32>
    %279 = arith.mulf %274, %278 : vector<8x64xf32>
    %280 = arith.addf %276, %279 : vector<8x64xf32>
    %281 = math.tanh %280 : vector<8x64xf32>
    %cst_54 = arith.constant 1.000000e+00 : f32
    %282 = vector.broadcast %cst_54 : f32 to vector<8x64xf32>
    %283 = arith.subf %282, %275 : vector<8x64xf32>
    %284 = arith.mulf %283, %281 : vector<8x64xf32>
    %285 = arith.mulf %275, %251 : vector<8x64xf32>
    %286 = arith.addf %284, %285 : vector<8x64xf32>
    %287 = vector.extract_strided_slice %286 {offsets = [0, 0], sizes = [8, 32], strides = [1, 1]} : vector<8x64xf32> to vector<8x32xf32>
    %c56_55 = arith.constant 56 : index
    %c0_56 = arith.constant 0 : index
    %288 = vector.load %arg7[%c56_55, %c0_56] : memref<64x64xf32, #tpu.memory_space<vmem>>, vector<8x32xf32>
    tpu.vector_store %arg7[%c56_55, %c0_56], %287 {strides = array<i32>} : memref<64x64xf32, #tpu.memory_space<vmem>>, vector<8x32xf32>,
    %289 = vector.extract_strided_slice %286 {offsets = [0, 32], sizes = [8, 32], strides = [1, 1]} : vector<8x64xf32> to vector<8x32xf32>
    %c0_57 = arith.constant 0 : index
    %c32_58 = arith.constant 32 : index
    %290 = vector.load %arg7[%c0_57, %c32_58] : memref<64x64xf32, #tpu.memory_space<vmem>>, vector<8x32xf32>
    tpu.vector_store %arg7[%c0_57, %c32_58], %289 {strides = array<i32>} : memref<64x64xf32, #tpu.memory_space<vmem>>, vector<8x32xf32>,
    %c0_59 = arith.constant 0 : index
    %c0_60 = arith.constant 0 : index
    %291 = vector.load %arg5[%c0_59, %c0_60] : memref<64x32xf32, #tpu.memory_space<vmem>>, vector<64x32xf32>
    %cst_61 = arith.constant dense<0.000000e+00> : vector<8x32xf32>
    %292 = tpu.matmul %286, %291, %cst_61 {dimension_numbers = #tpu.dot_dimension_numbers<[1], [0], [0], [1], [0, 0, 1, 1], [], []>} : vector<8x64xf32>, vector<64x32xf32>, vector<8x32xf32> -> vector<8x32xf32>
    %c0_62 = arith.constant 0 : index
    %c0_63 = arith.constant 0 : index
    %293 = vector.load %arg6[%c0_62, %c0_63] : memref<1x32xf32, #tpu.memory_space<vmem>>, vector<1x32xf32>
    %294 = vector.broadcast %293 : vector<1x32xf32> to vector<8x32xf32>
    %295 = arith.addf %292, %294 : vector<8x32xf32>
    %296 = math.tanh %295 : vector<8x32xf32>
    %c0_64 = arith.constant 0 : index
    %c0_65 = arith.constant 0 : index
    %297 = vector.load %arg8[%c0_64, %c0_65] : memref<8x32xf32, #tpu.memory_space<vmem>>, vector<8x32xf32>
    tpu.vector_store %arg8[%c0_64, %c0_65], %296 {strides = array<i32>} : memref<8x32xf32, #tpu.memory_space<vmem>>, vector<8x32xf32>,
    return
  }
}

module attributes {stable_mosaic.version = 11 : i64} {
  func.func @_bigru_kernel(%arg0: memref<64x16xf32, #tpu.memory_space<vmem>>, %arg1: memref<16x192xf32, #tpu.memory_space<vmem>>, %arg2: memref<1x192xf32, #tpu.memory_space<vmem>>, %arg3: memref<64x192xf32, #tpu.memory_space<vmem>>, %arg4: memref<1x64xf32, #tpu.memory_space<vmem>>, %arg5: memref<64x64xf32, #tpu.memory_space<vmem>>) attributes {dimension_semantics = [], scalar_prefetch = 0 : i64, scratch_operands = 0 : i64, tpu.core_type = #tpu.core_type<tc>} {
    %c0 = arith.constant 0 : index
    %c0_0 = arith.constant 0 : index
    %0 = vector.load %arg0[%c0, %c0_0] : memref<64x16xf32, #tpu.memory_space<vmem>>, vector<64x16xf32>
    %c0_1 = arith.constant 0 : index
    %c0_2 = arith.constant 0 : index
    %1 = vector.load %arg1[%c0_1, %c0_2] : memref<16x192xf32, #tpu.memory_space<vmem>>, vector<16x192xf32>
    %cst = arith.constant dense<0.000000e+00> : vector<64x192xf32>
    %2 = tpu.matmul %0, %1, %cst {dimension_numbers = #tpu.dot_dimension_numbers<[1], [0], [0], [1], [0, 0, 1, 1], [], []>} : vector<64x16xf32>, vector<16x192xf32>, vector<64x192xf32> -> vector<64x192xf32>
    %c0_3 = arith.constant 0 : index
    %c0_4 = arith.constant 0 : index
    %3 = vector.load %arg2[%c0_3, %c0_4] : memref<1x192xf32, #tpu.memory_space<vmem>>, vector<1x192xf32>
    %4 = vector.broadcast %3 : vector<1x192xf32> to vector<64x192xf32>
    %5 = arith.addf %2, %4 : vector<64x192xf32>
    %c0_5 = arith.constant 0 : index
    %c0_6 = arith.constant 0 : index
    %6 = vector.load %arg3[%c0_5, %c0_6] : memref<64x192xf32, #tpu.memory_space<vmem>>, vector<64x192xf32>
    %c0_7 = arith.constant 0 : index
    %c0_8 = arith.constant 0 : index
    %7 = vector.load %arg4[%c0_7, %c0_8] : memref<1x64xf32, #tpu.memory_space<vmem>>, vector<1x64xf32>
    %8 = vector.shape_cast %7 : vector<1x64xf32> to vector<1x64xf32>
    %9 = vector.broadcast %8 : vector<1x64xf32> to vector<8x64xf32>
    %cst_9 = arith.constant 0.000000e+00 : f32
    %10 = vector.broadcast %cst_9 : f32 to vector<8x64xf32>
    %11 = vector.extract_strided_slice %5 {offsets = [0, 0], sizes = [8, 96], strides = [1, 1]} : vector<64x192xf32> to vector<8x96xf32>
    %12 = vector.extract_strided_slice %5 {offsets = [56, 96], sizes = [8, 96], strides = [1, 1]} : vector<64x192xf32> to vector<8x96xf32>
    %13 = vector.extract_strided_slice %11 {offsets = [0, 0], sizes = [8, 32], strides = [1, 1]} : vector<8x96xf32> to vector<8x32xf32>
    %14 = vector.extract_strided_slice %12 {offsets = [0, 0], sizes = [8, 32], strides = [1, 1]} : vector<8x96xf32> to vector<8x32xf32>
    %15 = vector.extract_strided_slice %11 {offsets = [0, 32], sizes = [8, 32], strides = [1, 1]} : vector<8x96xf32> to vector<8x32xf32>
    %16 = vector.extract_strided_slice %12 {offsets = [0, 32], sizes = [8, 32], strides = [1, 1]} : vector<8x96xf32> to vector<8x32xf32>
    %17 = vector.extract_strided_slice %11 {offsets = [0, 64], sizes = [8, 32], strides = [1, 1]} : vector<8x96xf32> to vector<8x32xf32>
    %18 = vector.extract_strided_slice %12 {offsets = [0, 64], sizes = [8, 32], strides = [1, 1]} : vector<8x96xf32> to vector<8x32xf32>
    %19 = tpu.concatenate %13, %14, %15, %16, %17, %18 in 1 : vector<8x32xf32>, vector<8x32xf32>, vector<8x32xf32>, vector<8x32xf32>, vector<8x32xf32>, vector<8x32xf32> -> vector<8x192xf32>
    %cst_10 = arith.constant dense<0.000000e+00> : vector<8x192xf32>
    %20 = tpu.matmul %10, %6, %cst_10 {dimension_numbers = #tpu.dot_dimension_numbers<[1], [0], [0], [1], [0, 0, 1, 1], [], []>} : vector<8x64xf32>, vector<64x192xf32>, vector<8x192xf32> -> vector<8x192xf32>
    %21 = vector.extract_strided_slice %19 {offsets = [0, 0], sizes = [8, 128], strides = [1, 1]} : vector<8x192xf32> to vector<8x128xf32>
    %22 = vector.extract_strided_slice %20 {offsets = [0, 0], sizes = [8, 128], strides = [1, 1]} : vector<8x192xf32> to vector<8x128xf32>
    %23 = arith.addf %21, %22 : vector<8x128xf32>
    %24 = arith.negf %23 : vector<8x128xf32>
    %25 = math.exp %24 : vector<8x128xf32>
    %cst_11 = arith.constant 1.000000e+00 : f32
    %26 = vector.broadcast %cst_11 : f32 to vector<8x128xf32>
    %27 = arith.addf %26, %25 : vector<8x128xf32>
    %28 = arith.divf %26, %27 : vector<8x128xf32>
    %29 = vector.extract_strided_slice %28 {offsets = [0, 0], sizes = [8, 64], strides = [1, 1]} : vector<8x128xf32> to vector<8x64xf32>
    %30 = vector.extract_strided_slice %28 {offsets = [0, 64], sizes = [8, 64], strides = [1, 1]} : vector<8x128xf32> to vector<8x64xf32>
    %31 = vector.extract_strided_slice %19 {offsets = [0, 128], sizes = [8, 64], strides = [1, 1]} : vector<8x192xf32> to vector<8x64xf32>
    %32 = vector.extract_strided_slice %20 {offsets = [0, 128], sizes = [8, 64], strides = [1, 1]} : vector<8x192xf32> to vector<8x64xf32>
    %33 = arith.addf %32, %9 : vector<8x64xf32>
    %34 = arith.mulf %29, %33 : vector<8x64xf32>
    %35 = arith.addf %31, %34 : vector<8x64xf32>
    %36 = math.tanh %35 : vector<8x64xf32>
    %cst_12 = arith.constant 1.000000e+00 : f32
    %37 = vector.broadcast %cst_12 : f32 to vector<8x64xf32>
    %38 = arith.subf %37, %30 : vector<8x64xf32>
    %39 = arith.mulf %38, %36 : vector<8x64xf32>
    %40 = arith.mulf %30, %10 : vector<8x64xf32>
    %41 = arith.addf %39, %40 : vector<8x64xf32>
    %42 = vector.extract_strided_slice %41 {offsets = [0, 0], sizes = [8, 32], strides = [1, 1]} : vector<8x64xf32> to vector<8x32xf32>
    %c0_13 = arith.constant 0 : index
    %c0_14 = arith.constant 0 : index
    %43 = vector.load %arg5[%c0_13, %c0_14] : memref<64x64xf32, #tpu.memory_space<vmem>>, vector<8x32xf32>
    tpu.vector_store %arg5[%c0_13, %c0_14], %42 {strides = array<i32>} : memref<64x64xf32, #tpu.memory_space<vmem>>, vector<8x32xf32>,
    %44 = vector.extract_strided_slice %41 {offsets = [0, 32], sizes = [8, 32], strides = [1, 1]} : vector<8x64xf32> to vector<8x32xf32>
    %c56 = arith.constant 56 : index
    %c32 = arith.constant 32 : index
    %45 = vector.load %arg5[%c56, %c32] : memref<64x64xf32, #tpu.memory_space<vmem>>, vector<8x32xf32>
    tpu.vector_store %arg5[%c56, %c32], %44 {strides = array<i32>} : memref<64x64xf32, #tpu.memory_space<vmem>>, vector<8x32xf32>,
    %46 = vector.extract_strided_slice %5 {offsets = [8, 0], sizes = [8, 96], strides = [1, 1]} : vector<64x192xf32> to vector<8x96xf32>
    %47 = vector.extract_strided_slice %5 {offsets = [48, 96], sizes = [8, 96], strides = [1, 1]} : vector<64x192xf32> to vector<8x96xf32>
    %48 = vector.extract_strided_slice %46 {offsets = [0, 0], sizes = [8, 32], strides = [1, 1]} : vector<8x96xf32> to vector<8x32xf32>
    %49 = vector.extract_strided_slice %47 {offsets = [0, 0], sizes = [8, 32], strides = [1, 1]} : vector<8x96xf32> to vector<8x32xf32>
    %50 = vector.extract_strided_slice %46 {offsets = [0, 32], sizes = [8, 32], strides = [1, 1]} : vector<8x96xf32> to vector<8x32xf32>
    %51 = vector.extract_strided_slice %47 {offsets = [0, 32], sizes = [8, 32], strides = [1, 1]} : vector<8x96xf32> to vector<8x32xf32>
    %52 = vector.extract_strided_slice %46 {offsets = [0, 64], sizes = [8, 32], strides = [1, 1]} : vector<8x96xf32> to vector<8x32xf32>
    %53 = vector.extract_strided_slice %47 {offsets = [0, 64], sizes = [8, 32], strides = [1, 1]} : vector<8x96xf32> to vector<8x32xf32>
    %54 = tpu.concatenate %48, %49, %50, %51, %52, %53 in 1 : vector<8x32xf32>, vector<8x32xf32>, vector<8x32xf32>, vector<8x32xf32>, vector<8x32xf32>, vector<8x32xf32> -> vector<8x192xf32>
    %cst_15 = arith.constant dense<0.000000e+00> : vector<8x192xf32>
    %55 = tpu.matmul %41, %6, %cst_15 {dimension_numbers = #tpu.dot_dimension_numbers<[1], [0], [0], [1], [0, 0, 1, 1], [], []>} : vector<8x64xf32>, vector<64x192xf32>, vector<8x192xf32> -> vector<8x192xf32>
    %56 = vector.extract_strided_slice %54 {offsets = [0, 0], sizes = [8, 128], strides = [1, 1]} : vector<8x192xf32> to vector<8x128xf32>
    %57 = vector.extract_strided_slice %55 {offsets = [0, 0], sizes = [8, 128], strides = [1, 1]} : vector<8x192xf32> to vector<8x128xf32>
    %58 = arith.addf %56, %57 : vector<8x128xf32>
    %59 = arith.negf %58 : vector<8x128xf32>
    %60 = math.exp %59 : vector<8x128xf32>
    %cst_16 = arith.constant 1.000000e+00 : f32
    %61 = vector.broadcast %cst_16 : f32 to vector<8x128xf32>
    %62 = arith.addf %61, %60 : vector<8x128xf32>
    %63 = arith.divf %61, %62 : vector<8x128xf32>
    %64 = vector.extract_strided_slice %63 {offsets = [0, 0], sizes = [8, 64], strides = [1, 1]} : vector<8x128xf32> to vector<8x64xf32>
    %65 = vector.extract_strided_slice %63 {offsets = [0, 64], sizes = [8, 64], strides = [1, 1]} : vector<8x128xf32> to vector<8x64xf32>
    %66 = vector.extract_strided_slice %54 {offsets = [0, 128], sizes = [8, 64], strides = [1, 1]} : vector<8x192xf32> to vector<8x64xf32>
    %67 = vector.extract_strided_slice %55 {offsets = [0, 128], sizes = [8, 64], strides = [1, 1]} : vector<8x192xf32> to vector<8x64xf32>
    %68 = arith.addf %67, %9 : vector<8x64xf32>
    %69 = arith.mulf %64, %68 : vector<8x64xf32>
    %70 = arith.addf %66, %69 : vector<8x64xf32>
    %71 = math.tanh %70 : vector<8x64xf32>
    %cst_17 = arith.constant 1.000000e+00 : f32
    %72 = vector.broadcast %cst_17 : f32 to vector<8x64xf32>
    %73 = arith.subf %72, %65 : vector<8x64xf32>
    %74 = arith.mulf %73, %71 : vector<8x64xf32>
    %75 = arith.mulf %65, %41 : vector<8x64xf32>
    %76 = arith.addf %74, %75 : vector<8x64xf32>
    %77 = vector.extract_strided_slice %76 {offsets = [0, 0], sizes = [8, 32], strides = [1, 1]} : vector<8x64xf32> to vector<8x32xf32>
    %c8 = arith.constant 8 : index
    %c0_18 = arith.constant 0 : index
    %78 = vector.load %arg5[%c8, %c0_18] : memref<64x64xf32, #tpu.memory_space<vmem>>, vector<8x32xf32>
    tpu.vector_store %arg5[%c8, %c0_18], %77 {strides = array<i32>} : memref<64x64xf32, #tpu.memory_space<vmem>>, vector<8x32xf32>,
    %79 = vector.extract_strided_slice %76 {offsets = [0, 32], sizes = [8, 32], strides = [1, 1]} : vector<8x64xf32> to vector<8x32xf32>
    %c48 = arith.constant 48 : index
    %c32_19 = arith.constant 32 : index
    %80 = vector.load %arg5[%c48, %c32_19] : memref<64x64xf32, #tpu.memory_space<vmem>>, vector<8x32xf32>
    tpu.vector_store %arg5[%c48, %c32_19], %79 {strides = array<i32>} : memref<64x64xf32, #tpu.memory_space<vmem>>, vector<8x32xf32>,
    %81 = vector.extract_strided_slice %5 {offsets = [16, 0], sizes = [8, 96], strides = [1, 1]} : vector<64x192xf32> to vector<8x96xf32>
    %82 = vector.extract_strided_slice %5 {offsets = [40, 96], sizes = [8, 96], strides = [1, 1]} : vector<64x192xf32> to vector<8x96xf32>
    %83 = vector.extract_strided_slice %81 {offsets = [0, 0], sizes = [8, 32], strides = [1, 1]} : vector<8x96xf32> to vector<8x32xf32>
    %84 = vector.extract_strided_slice %82 {offsets = [0, 0], sizes = [8, 32], strides = [1, 1]} : vector<8x96xf32> to vector<8x32xf32>
    %85 = vector.extract_strided_slice %81 {offsets = [0, 32], sizes = [8, 32], strides = [1, 1]} : vector<8x96xf32> to vector<8x32xf32>
    %86 = vector.extract_strided_slice %82 {offsets = [0, 32], sizes = [8, 32], strides = [1, 1]} : vector<8x96xf32> to vector<8x32xf32>
    %87 = vector.extract_strided_slice %81 {offsets = [0, 64], sizes = [8, 32], strides = [1, 1]} : vector<8x96xf32> to vector<8x32xf32>
    %88 = vector.extract_strided_slice %82 {offsets = [0, 64], sizes = [8, 32], strides = [1, 1]} : vector<8x96xf32> to vector<8x32xf32>
    %89 = tpu.concatenate %83, %84, %85, %86, %87, %88 in 1 : vector<8x32xf32>, vector<8x32xf32>, vector<8x32xf32>, vector<8x32xf32>, vector<8x32xf32>, vector<8x32xf32> -> vector<8x192xf32>
    %cst_20 = arith.constant dense<0.000000e+00> : vector<8x192xf32>
    %90 = tpu.matmul %76, %6, %cst_20 {dimension_numbers = #tpu.dot_dimension_numbers<[1], [0], [0], [1], [0, 0, 1, 1], [], []>} : vector<8x64xf32>, vector<64x192xf32>, vector<8x192xf32> -> vector<8x192xf32>
    %91 = vector.extract_strided_slice %89 {offsets = [0, 0], sizes = [8, 128], strides = [1, 1]} : vector<8x192xf32> to vector<8x128xf32>
    %92 = vector.extract_strided_slice %90 {offsets = [0, 0], sizes = [8, 128], strides = [1, 1]} : vector<8x192xf32> to vector<8x128xf32>
    %93 = arith.addf %91, %92 : vector<8x128xf32>
    %94 = arith.negf %93 : vector<8x128xf32>
    %95 = math.exp %94 : vector<8x128xf32>
    %cst_21 = arith.constant 1.000000e+00 : f32
    %96 = vector.broadcast %cst_21 : f32 to vector<8x128xf32>
    %97 = arith.addf %96, %95 : vector<8x128xf32>
    %98 = arith.divf %96, %97 : vector<8x128xf32>
    %99 = vector.extract_strided_slice %98 {offsets = [0, 0], sizes = [8, 64], strides = [1, 1]} : vector<8x128xf32> to vector<8x64xf32>
    %100 = vector.extract_strided_slice %98 {offsets = [0, 64], sizes = [8, 64], strides = [1, 1]} : vector<8x128xf32> to vector<8x64xf32>
    %101 = vector.extract_strided_slice %89 {offsets = [0, 128], sizes = [8, 64], strides = [1, 1]} : vector<8x192xf32> to vector<8x64xf32>
    %102 = vector.extract_strided_slice %90 {offsets = [0, 128], sizes = [8, 64], strides = [1, 1]} : vector<8x192xf32> to vector<8x64xf32>
    %103 = arith.addf %102, %9 : vector<8x64xf32>
    %104 = arith.mulf %99, %103 : vector<8x64xf32>
    %105 = arith.addf %101, %104 : vector<8x64xf32>
    %106 = math.tanh %105 : vector<8x64xf32>
    %cst_22 = arith.constant 1.000000e+00 : f32
    %107 = vector.broadcast %cst_22 : f32 to vector<8x64xf32>
    %108 = arith.subf %107, %100 : vector<8x64xf32>
    %109 = arith.mulf %108, %106 : vector<8x64xf32>
    %110 = arith.mulf %100, %76 : vector<8x64xf32>
    %111 = arith.addf %109, %110 : vector<8x64xf32>
    %112 = vector.extract_strided_slice %111 {offsets = [0, 0], sizes = [8, 32], strides = [1, 1]} : vector<8x64xf32> to vector<8x32xf32>
    %c16 = arith.constant 16 : index
    %c0_23 = arith.constant 0 : index
    %113 = vector.load %arg5[%c16, %c0_23] : memref<64x64xf32, #tpu.memory_space<vmem>>, vector<8x32xf32>
    tpu.vector_store %arg5[%c16, %c0_23], %112 {strides = array<i32>} : memref<64x64xf32, #tpu.memory_space<vmem>>, vector<8x32xf32>,
    %114 = vector.extract_strided_slice %111 {offsets = [0, 32], sizes = [8, 32], strides = [1, 1]} : vector<8x64xf32> to vector<8x32xf32>
    %c40 = arith.constant 40 : index
    %c32_24 = arith.constant 32 : index
    %115 = vector.load %arg5[%c40, %c32_24] : memref<64x64xf32, #tpu.memory_space<vmem>>, vector<8x32xf32>
    tpu.vector_store %arg5[%c40, %c32_24], %114 {strides = array<i32>} : memref<64x64xf32, #tpu.memory_space<vmem>>, vector<8x32xf32>,
    %116 = vector.extract_strided_slice %5 {offsets = [24, 0], sizes = [8, 96], strides = [1, 1]} : vector<64x192xf32> to vector<8x96xf32>
    %117 = vector.extract_strided_slice %5 {offsets = [32, 96], sizes = [8, 96], strides = [1, 1]} : vector<64x192xf32> to vector<8x96xf32>
    %118 = vector.extract_strided_slice %116 {offsets = [0, 0], sizes = [8, 32], strides = [1, 1]} : vector<8x96xf32> to vector<8x32xf32>
    %119 = vector.extract_strided_slice %117 {offsets = [0, 0], sizes = [8, 32], strides = [1, 1]} : vector<8x96xf32> to vector<8x32xf32>
    %120 = vector.extract_strided_slice %116 {offsets = [0, 32], sizes = [8, 32], strides = [1, 1]} : vector<8x96xf32> to vector<8x32xf32>
    %121 = vector.extract_strided_slice %117 {offsets = [0, 32], sizes = [8, 32], strides = [1, 1]} : vector<8x96xf32> to vector<8x32xf32>
    %122 = vector.extract_strided_slice %116 {offsets = [0, 64], sizes = [8, 32], strides = [1, 1]} : vector<8x96xf32> to vector<8x32xf32>
    %123 = vector.extract_strided_slice %117 {offsets = [0, 64], sizes = [8, 32], strides = [1, 1]} : vector<8x96xf32> to vector<8x32xf32>
    %124 = tpu.concatenate %118, %119, %120, %121, %122, %123 in 1 : vector<8x32xf32>, vector<8x32xf32>, vector<8x32xf32>, vector<8x32xf32>, vector<8x32xf32>, vector<8x32xf32> -> vector<8x192xf32>
    %cst_25 = arith.constant dense<0.000000e+00> : vector<8x192xf32>
    %125 = tpu.matmul %111, %6, %cst_25 {dimension_numbers = #tpu.dot_dimension_numbers<[1], [0], [0], [1], [0, 0, 1, 1], [], []>} : vector<8x64xf32>, vector<64x192xf32>, vector<8x192xf32> -> vector<8x192xf32>
    %126 = vector.extract_strided_slice %124 {offsets = [0, 0], sizes = [8, 128], strides = [1, 1]} : vector<8x192xf32> to vector<8x128xf32>
    %127 = vector.extract_strided_slice %125 {offsets = [0, 0], sizes = [8, 128], strides = [1, 1]} : vector<8x192xf32> to vector<8x128xf32>
    %128 = arith.addf %126, %127 : vector<8x128xf32>
    %129 = arith.negf %128 : vector<8x128xf32>
    %130 = math.exp %129 : vector<8x128xf32>
    %cst_26 = arith.constant 1.000000e+00 : f32
    %131 = vector.broadcast %cst_26 : f32 to vector<8x128xf32>
    %132 = arith.addf %131, %130 : vector<8x128xf32>
    %133 = arith.divf %131, %132 : vector<8x128xf32>
    %134 = vector.extract_strided_slice %133 {offsets = [0, 0], sizes = [8, 64], strides = [1, 1]} : vector<8x128xf32> to vector<8x64xf32>
    %135 = vector.extract_strided_slice %133 {offsets = [0, 64], sizes = [8, 64], strides = [1, 1]} : vector<8x128xf32> to vector<8x64xf32>
    %136 = vector.extract_strided_slice %124 {offsets = [0, 128], sizes = [8, 64], strides = [1, 1]} : vector<8x192xf32> to vector<8x64xf32>
    %137 = vector.extract_strided_slice %125 {offsets = [0, 128], sizes = [8, 64], strides = [1, 1]} : vector<8x192xf32> to vector<8x64xf32>
    %138 = arith.addf %137, %9 : vector<8x64xf32>
    %139 = arith.mulf %134, %138 : vector<8x64xf32>
    %140 = arith.addf %136, %139 : vector<8x64xf32>
    %141 = math.tanh %140 : vector<8x64xf32>
    %cst_27 = arith.constant 1.000000e+00 : f32
    %142 = vector.broadcast %cst_27 : f32 to vector<8x64xf32>
    %143 = arith.subf %142, %135 : vector<8x64xf32>
    %144 = arith.mulf %143, %141 : vector<8x64xf32>
    %145 = arith.mulf %135, %111 : vector<8x64xf32>
    %146 = arith.addf %144, %145 : vector<8x64xf32>
    %147 = vector.extract_strided_slice %146 {offsets = [0, 0], sizes = [8, 32], strides = [1, 1]} : vector<8x64xf32> to vector<8x32xf32>
    %c24 = arith.constant 24 : index
    %c0_28 = arith.constant 0 : index
    %148 = vector.load %arg5[%c24, %c0_28] : memref<64x64xf32, #tpu.memory_space<vmem>>, vector<8x32xf32>
    tpu.vector_store %arg5[%c24, %c0_28], %147 {strides = array<i32>} : memref<64x64xf32, #tpu.memory_space<vmem>>, vector<8x32xf32>,
    %149 = vector.extract_strided_slice %146 {offsets = [0, 32], sizes = [8, 32], strides = [1, 1]} : vector<8x64xf32> to vector<8x32xf32>
    %c32_29 = arith.constant 32 : index
    %c32_30 = arith.constant 32 : index
    %150 = vector.load %arg5[%c32_29, %c32_30] : memref<64x64xf32, #tpu.memory_space<vmem>>, vector<8x32xf32>
    tpu.vector_store %arg5[%c32_29, %c32_30], %149 {strides = array<i32>} : memref<64x64xf32, #tpu.memory_space<vmem>>, vector<8x32xf32>,
    %151 = vector.extract_strided_slice %5 {offsets = [32, 0], sizes = [8, 96], strides = [1, 1]} : vector<64x192xf32> to vector<8x96xf32>
    %152 = vector.extract_strided_slice %5 {offsets = [24, 96], sizes = [8, 96], strides = [1, 1]} : vector<64x192xf32> to vector<8x96xf32>
    %153 = vector.extract_strided_slice %151 {offsets = [0, 0], sizes = [8, 32], strides = [1, 1]} : vector<8x96xf32> to vector<8x32xf32>
    %154 = vector.extract_strided_slice %152 {offsets = [0, 0], sizes = [8, 32], strides = [1, 1]} : vector<8x96xf32> to vector<8x32xf32>
    %155 = vector.extract_strided_slice %151 {offsets = [0, 32], sizes = [8, 32], strides = [1, 1]} : vector<8x96xf32> to vector<8x32xf32>
    %156 = vector.extract_strided_slice %152 {offsets = [0, 32], sizes = [8, 32], strides = [1, 1]} : vector<8x96xf32> to vector<8x32xf32>
    %157 = vector.extract_strided_slice %151 {offsets = [0, 64], sizes = [8, 32], strides = [1, 1]} : vector<8x96xf32> to vector<8x32xf32>
    %158 = vector.extract_strided_slice %152 {offsets = [0, 64], sizes = [8, 32], strides = [1, 1]} : vector<8x96xf32> to vector<8x32xf32>
    %159 = tpu.concatenate %153, %154, %155, %156, %157, %158 in 1 : vector<8x32xf32>, vector<8x32xf32>, vector<8x32xf32>, vector<8x32xf32>, vector<8x32xf32>, vector<8x32xf32> -> vector<8x192xf32>
    %cst_31 = arith.constant dense<0.000000e+00> : vector<8x192xf32>
    %160 = tpu.matmul %146, %6, %cst_31 {dimension_numbers = #tpu.dot_dimension_numbers<[1], [0], [0], [1], [0, 0, 1, 1], [], []>} : vector<8x64xf32>, vector<64x192xf32>, vector<8x192xf32> -> vector<8x192xf32>
    %161 = vector.extract_strided_slice %159 {offsets = [0, 0], sizes = [8, 128], strides = [1, 1]} : vector<8x192xf32> to vector<8x128xf32>
    %162 = vector.extract_strided_slice %160 {offsets = [0, 0], sizes = [8, 128], strides = [1, 1]} : vector<8x192xf32> to vector<8x128xf32>
    %163 = arith.addf %161, %162 : vector<8x128xf32>
    %164 = arith.negf %163 : vector<8x128xf32>
    %165 = math.exp %164 : vector<8x128xf32>
    %cst_32 = arith.constant 1.000000e+00 : f32
    %166 = vector.broadcast %cst_32 : f32 to vector<8x128xf32>
    %167 = arith.addf %166, %165 : vector<8x128xf32>
    %168 = arith.divf %166, %167 : vector<8x128xf32>
    %169 = vector.extract_strided_slice %168 {offsets = [0, 0], sizes = [8, 64], strides = [1, 1]} : vector<8x128xf32> to vector<8x64xf32>
    %170 = vector.extract_strided_slice %168 {offsets = [0, 64], sizes = [8, 64], strides = [1, 1]} : vector<8x128xf32> to vector<8x64xf32>
    %171 = vector.extract_strided_slice %159 {offsets = [0, 128], sizes = [8, 64], strides = [1, 1]} : vector<8x192xf32> to vector<8x64xf32>
    %172 = vector.extract_strided_slice %160 {offsets = [0, 128], sizes = [8, 64], strides = [1, 1]} : vector<8x192xf32> to vector<8x64xf32>
    %173 = arith.addf %172, %9 : vector<8x64xf32>
    %174 = arith.mulf %169, %173 : vector<8x64xf32>
    %175 = arith.addf %171, %174 : vector<8x64xf32>
    %176 = math.tanh %175 : vector<8x64xf32>
    %cst_33 = arith.constant 1.000000e+00 : f32
    %177 = vector.broadcast %cst_33 : f32 to vector<8x64xf32>
    %178 = arith.subf %177, %170 : vector<8x64xf32>
    %179 = arith.mulf %178, %176 : vector<8x64xf32>
    %180 = arith.mulf %170, %146 : vector<8x64xf32>
    %181 = arith.addf %179, %180 : vector<8x64xf32>
    %182 = vector.extract_strided_slice %181 {offsets = [0, 0], sizes = [8, 32], strides = [1, 1]} : vector<8x64xf32> to vector<8x32xf32>
    %c32_34 = arith.constant 32 : index
    %c0_35 = arith.constant 0 : index
    %183 = vector.load %arg5[%c32_34, %c0_35] : memref<64x64xf32, #tpu.memory_space<vmem>>, vector<8x32xf32>
    tpu.vector_store %arg5[%c32_34, %c0_35], %182 {strides = array<i32>} : memref<64x64xf32, #tpu.memory_space<vmem>>, vector<8x32xf32>,
    %184 = vector.extract_strided_slice %181 {offsets = [0, 32], sizes = [8, 32], strides = [1, 1]} : vector<8x64xf32> to vector<8x32xf32>
    %c24_36 = arith.constant 24 : index
    %c32_37 = arith.constant 32 : index
    %185 = vector.load %arg5[%c24_36, %c32_37] : memref<64x64xf32, #tpu.memory_space<vmem>>, vector<8x32xf32>
    tpu.vector_store %arg5[%c24_36, %c32_37], %184 {strides = array<i32>} : memref<64x64xf32, #tpu.memory_space<vmem>>, vector<8x32xf32>,
    %186 = vector.extract_strided_slice %5 {offsets = [40, 0], sizes = [8, 96], strides = [1, 1]} : vector<64x192xf32> to vector<8x96xf32>
    %187 = vector.extract_strided_slice %5 {offsets = [16, 96], sizes = [8, 96], strides = [1, 1]} : vector<64x192xf32> to vector<8x96xf32>
    %188 = vector.extract_strided_slice %186 {offsets = [0, 0], sizes = [8, 32], strides = [1, 1]} : vector<8x96xf32> to vector<8x32xf32>
    %189 = vector.extract_strided_slice %187 {offsets = [0, 0], sizes = [8, 32], strides = [1, 1]} : vector<8x96xf32> to vector<8x32xf32>
    %190 = vector.extract_strided_slice %186 {offsets = [0, 32], sizes = [8, 32], strides = [1, 1]} : vector<8x96xf32> to vector<8x32xf32>
    %191 = vector.extract_strided_slice %187 {offsets = [0, 32], sizes = [8, 32], strides = [1, 1]} : vector<8x96xf32> to vector<8x32xf32>
    %192 = vector.extract_strided_slice %186 {offsets = [0, 64], sizes = [8, 32], strides = [1, 1]} : vector<8x96xf32> to vector<8x32xf32>
    %193 = vector.extract_strided_slice %187 {offsets = [0, 64], sizes = [8, 32], strides = [1, 1]} : vector<8x96xf32> to vector<8x32xf32>
    %194 = tpu.concatenate %188, %189, %190, %191, %192, %193 in 1 : vector<8x32xf32>, vector<8x32xf32>, vector<8x32xf32>, vector<8x32xf32>, vector<8x32xf32>, vector<8x32xf32> -> vector<8x192xf32>
    %cst_38 = arith.constant dense<0.000000e+00> : vector<8x192xf32>
    %195 = tpu.matmul %181, %6, %cst_38 {dimension_numbers = #tpu.dot_dimension_numbers<[1], [0], [0], [1], [0, 0, 1, 1], [], []>} : vector<8x64xf32>, vector<64x192xf32>, vector<8x192xf32> -> vector<8x192xf32>
    %196 = vector.extract_strided_slice %194 {offsets = [0, 0], sizes = [8, 128], strides = [1, 1]} : vector<8x192xf32> to vector<8x128xf32>
    %197 = vector.extract_strided_slice %195 {offsets = [0, 0], sizes = [8, 128], strides = [1, 1]} : vector<8x192xf32> to vector<8x128xf32>
    %198 = arith.addf %196, %197 : vector<8x128xf32>
    %199 = arith.negf %198 : vector<8x128xf32>
    %200 = math.exp %199 : vector<8x128xf32>
    %cst_39 = arith.constant 1.000000e+00 : f32
    %201 = vector.broadcast %cst_39 : f32 to vector<8x128xf32>
    %202 = arith.addf %201, %200 : vector<8x128xf32>
    %203 = arith.divf %201, %202 : vector<8x128xf32>
    %204 = vector.extract_strided_slice %203 {offsets = [0, 0], sizes = [8, 64], strides = [1, 1]} : vector<8x128xf32> to vector<8x64xf32>
    %205 = vector.extract_strided_slice %203 {offsets = [0, 64], sizes = [8, 64], strides = [1, 1]} : vector<8x128xf32> to vector<8x64xf32>
    %206 = vector.extract_strided_slice %194 {offsets = [0, 128], sizes = [8, 64], strides = [1, 1]} : vector<8x192xf32> to vector<8x64xf32>
    %207 = vector.extract_strided_slice %195 {offsets = [0, 128], sizes = [8, 64], strides = [1, 1]} : vector<8x192xf32> to vector<8x64xf32>
    %208 = arith.addf %207, %9 : vector<8x64xf32>
    %209 = arith.mulf %204, %208 : vector<8x64xf32>
    %210 = arith.addf %206, %209 : vector<8x64xf32>
    %211 = math.tanh %210 : vector<8x64xf32>
    %cst_40 = arith.constant 1.000000e+00 : f32
    %212 = vector.broadcast %cst_40 : f32 to vector<8x64xf32>
    %213 = arith.subf %212, %205 : vector<8x64xf32>
    %214 = arith.mulf %213, %211 : vector<8x64xf32>
    %215 = arith.mulf %205, %181 : vector<8x64xf32>
    %216 = arith.addf %214, %215 : vector<8x64xf32>
    %217 = vector.extract_strided_slice %216 {offsets = [0, 0], sizes = [8, 32], strides = [1, 1]} : vector<8x64xf32> to vector<8x32xf32>
    %c40_41 = arith.constant 40 : index
    %c0_42 = arith.constant 0 : index
    %218 = vector.load %arg5[%c40_41, %c0_42] : memref<64x64xf32, #tpu.memory_space<vmem>>, vector<8x32xf32>
    tpu.vector_store %arg5[%c40_41, %c0_42], %217 {strides = array<i32>} : memref<64x64xf32, #tpu.memory_space<vmem>>, vector<8x32xf32>,
    %219 = vector.extract_strided_slice %216 {offsets = [0, 32], sizes = [8, 32], strides = [1, 1]} : vector<8x64xf32> to vector<8x32xf32>
    %c16_43 = arith.constant 16 : index
    %c32_44 = arith.constant 32 : index
    %220 = vector.load %arg5[%c16_43, %c32_44] : memref<64x64xf32, #tpu.memory_space<vmem>>, vector<8x32xf32>
    tpu.vector_store %arg5[%c16_43, %c32_44], %219 {strides = array<i32>} : memref<64x64xf32, #tpu.memory_space<vmem>>, vector<8x32xf32>,
    %221 = vector.extract_strided_slice %5 {offsets = [48, 0], sizes = [8, 96], strides = [1, 1]} : vector<64x192xf32> to vector<8x96xf32>
    %222 = vector.extract_strided_slice %5 {offsets = [8, 96], sizes = [8, 96], strides = [1, 1]} : vector<64x192xf32> to vector<8x96xf32>
    %223 = vector.extract_strided_slice %221 {offsets = [0, 0], sizes = [8, 32], strides = [1, 1]} : vector<8x96xf32> to vector<8x32xf32>
    %224 = vector.extract_strided_slice %222 {offsets = [0, 0], sizes = [8, 32], strides = [1, 1]} : vector<8x96xf32> to vector<8x32xf32>
    %225 = vector.extract_strided_slice %221 {offsets = [0, 32], sizes = [8, 32], strides = [1, 1]} : vector<8x96xf32> to vector<8x32xf32>
    %226 = vector.extract_strided_slice %222 {offsets = [0, 32], sizes = [8, 32], strides = [1, 1]} : vector<8x96xf32> to vector<8x32xf32>
    %227 = vector.extract_strided_slice %221 {offsets = [0, 64], sizes = [8, 32], strides = [1, 1]} : vector<8x96xf32> to vector<8x32xf32>
    %228 = vector.extract_strided_slice %222 {offsets = [0, 64], sizes = [8, 32], strides = [1, 1]} : vector<8x96xf32> to vector<8x32xf32>
    %229 = tpu.concatenate %223, %224, %225, %226, %227, %228 in 1 : vector<8x32xf32>, vector<8x32xf32>, vector<8x32xf32>, vector<8x32xf32>, vector<8x32xf32>, vector<8x32xf32> -> vector<8x192xf32>
    %cst_45 = arith.constant dense<0.000000e+00> : vector<8x192xf32>
    %230 = tpu.matmul %216, %6, %cst_45 {dimension_numbers = #tpu.dot_dimension_numbers<[1], [0], [0], [1], [0, 0, 1, 1], [], []>} : vector<8x64xf32>, vector<64x192xf32>, vector<8x192xf32> -> vector<8x192xf32>
    %231 = vector.extract_strided_slice %229 {offsets = [0, 0], sizes = [8, 128], strides = [1, 1]} : vector<8x192xf32> to vector<8x128xf32>
    %232 = vector.extract_strided_slice %230 {offsets = [0, 0], sizes = [8, 128], strides = [1, 1]} : vector<8x192xf32> to vector<8x128xf32>
    %233 = arith.addf %231, %232 : vector<8x128xf32>
    %234 = arith.negf %233 : vector<8x128xf32>
    %235 = math.exp %234 : vector<8x128xf32>
    %cst_46 = arith.constant 1.000000e+00 : f32
    %236 = vector.broadcast %cst_46 : f32 to vector<8x128xf32>
    %237 = arith.addf %236, %235 : vector<8x128xf32>
    %238 = arith.divf %236, %237 : vector<8x128xf32>
    %239 = vector.extract_strided_slice %238 {offsets = [0, 0], sizes = [8, 64], strides = [1, 1]} : vector<8x128xf32> to vector<8x64xf32>
    %240 = vector.extract_strided_slice %238 {offsets = [0, 64], sizes = [8, 64], strides = [1, 1]} : vector<8x128xf32> to vector<8x64xf32>
    %241 = vector.extract_strided_slice %229 {offsets = [0, 128], sizes = [8, 64], strides = [1, 1]} : vector<8x192xf32> to vector<8x64xf32>
    %242 = vector.extract_strided_slice %230 {offsets = [0, 128], sizes = [8, 64], strides = [1, 1]} : vector<8x192xf32> to vector<8x64xf32>
    %243 = arith.addf %242, %9 : vector<8x64xf32>
    %244 = arith.mulf %239, %243 : vector<8x64xf32>
    %245 = arith.addf %241, %244 : vector<8x64xf32>
    %246 = math.tanh %245 : vector<8x64xf32>
    %cst_47 = arith.constant 1.000000e+00 : f32
    %247 = vector.broadcast %cst_47 : f32 to vector<8x64xf32>
    %248 = arith.subf %247, %240 : vector<8x64xf32>
    %249 = arith.mulf %248, %246 : vector<8x64xf32>
    %250 = arith.mulf %240, %216 : vector<8x64xf32>
    %251 = arith.addf %249, %250 : vector<8x64xf32>
    %252 = vector.extract_strided_slice %251 {offsets = [0, 0], sizes = [8, 32], strides = [1, 1]} : vector<8x64xf32> to vector<8x32xf32>
    %c48_48 = arith.constant 48 : index
    %c0_49 = arith.constant 0 : index
    %253 = vector.load %arg5[%c48_48, %c0_49] : memref<64x64xf32, #tpu.memory_space<vmem>>, vector<8x32xf32>
    tpu.vector_store %arg5[%c48_48, %c0_49], %252 {strides = array<i32>} : memref<64x64xf32, #tpu.memory_space<vmem>>, vector<8x32xf32>,
    %254 = vector.extract_strided_slice %251 {offsets = [0, 32], sizes = [8, 32], strides = [1, 1]} : vector<8x64xf32> to vector<8x32xf32>
    %c8_50 = arith.constant 8 : index
    %c32_51 = arith.constant 32 : index
    %255 = vector.load %arg5[%c8_50, %c32_51] : memref<64x64xf32, #tpu.memory_space<vmem>>, vector<8x32xf32>
    tpu.vector_store %arg5[%c8_50, %c32_51], %254 {strides = array<i32>} : memref<64x64xf32, #tpu.memory_space<vmem>>, vector<8x32xf32>,
    %256 = vector.extract_strided_slice %5 {offsets = [56, 0], sizes = [8, 96], strides = [1, 1]} : vector<64x192xf32> to vector<8x96xf32>
    %257 = vector.extract_strided_slice %5 {offsets = [0, 96], sizes = [8, 96], strides = [1, 1]} : vector<64x192xf32> to vector<8x96xf32>
    %258 = vector.extract_strided_slice %256 {offsets = [0, 0], sizes = [8, 32], strides = [1, 1]} : vector<8x96xf32> to vector<8x32xf32>
    %259 = vector.extract_strided_slice %257 {offsets = [0, 0], sizes = [8, 32], strides = [1, 1]} : vector<8x96xf32> to vector<8x32xf32>
    %260 = vector.extract_strided_slice %256 {offsets = [0, 32], sizes = [8, 32], strides = [1, 1]} : vector<8x96xf32> to vector<8x32xf32>
    %261 = vector.extract_strided_slice %257 {offsets = [0, 32], sizes = [8, 32], strides = [1, 1]} : vector<8x96xf32> to vector<8x32xf32>
    %262 = vector.extract_strided_slice %256 {offsets = [0, 64], sizes = [8, 32], strides = [1, 1]} : vector<8x96xf32> to vector<8x32xf32>
    %263 = vector.extract_strided_slice %257 {offsets = [0, 64], sizes = [8, 32], strides = [1, 1]} : vector<8x96xf32> to vector<8x32xf32>
    %264 = tpu.concatenate %258, %259, %260, %261, %262, %263 in 1 : vector<8x32xf32>, vector<8x32xf32>, vector<8x32xf32>, vector<8x32xf32>, vector<8x32xf32>, vector<8x32xf32> -> vector<8x192xf32>
    %cst_52 = arith.constant dense<0.000000e+00> : vector<8x192xf32>
    %265 = tpu.matmul %251, %6, %cst_52 {dimension_numbers = #tpu.dot_dimension_numbers<[1], [0], [0], [1], [0, 0, 1, 1], [], []>} : vector<8x64xf32>, vector<64x192xf32>, vector<8x192xf32> -> vector<8x192xf32>
    %266 = vector.extract_strided_slice %264 {offsets = [0, 0], sizes = [8, 128], strides = [1, 1]} : vector<8x192xf32> to vector<8x128xf32>
    %267 = vector.extract_strided_slice %265 {offsets = [0, 0], sizes = [8, 128], strides = [1, 1]} : vector<8x192xf32> to vector<8x128xf32>
    %268 = arith.addf %266, %267 : vector<8x128xf32>
    %269 = arith.negf %268 : vector<8x128xf32>
    %270 = math.exp %269 : vector<8x128xf32>
    %cst_53 = arith.constant 1.000000e+00 : f32
    %271 = vector.broadcast %cst_53 : f32 to vector<8x128xf32>
    %272 = arith.addf %271, %270 : vector<8x128xf32>
    %273 = arith.divf %271, %272 : vector<8x128xf32>
    %274 = vector.extract_strided_slice %273 {offsets = [0, 0], sizes = [8, 64], strides = [1, 1]} : vector<8x128xf32> to vector<8x64xf32>
    %275 = vector.extract_strided_slice %273 {offsets = [0, 64], sizes = [8, 64], strides = [1, 1]} : vector<8x128xf32> to vector<8x64xf32>
    %276 = vector.extract_strided_slice %264 {offsets = [0, 128], sizes = [8, 64], strides = [1, 1]} : vector<8x192xf32> to vector<8x64xf32>
    %277 = vector.extract_strided_slice %265 {offsets = [0, 128], sizes = [8, 64], strides = [1, 1]} : vector<8x192xf32> to vector<8x64xf32>
    %278 = arith.addf %277, %9 : vector<8x64xf32>
    %279 = arith.mulf %274, %278 : vector<8x64xf32>
    %280 = arith.addf %276, %279 : vector<8x64xf32>
    %281 = math.tanh %280 : vector<8x64xf32>
    %cst_54 = arith.constant 1.000000e+00 : f32
    %282 = vector.broadcast %cst_54 : f32 to vector<8x64xf32>
    %283 = arith.subf %282, %275 : vector<8x64xf32>
    %284 = arith.mulf %283, %281 : vector<8x64xf32>
    %285 = arith.mulf %275, %251 : vector<8x64xf32>
    %286 = arith.addf %284, %285 : vector<8x64xf32>
    %287 = vector.extract_strided_slice %286 {offsets = [0, 0], sizes = [8, 32], strides = [1, 1]} : vector<8x64xf32> to vector<8x32xf32>
    %c56_55 = arith.constant 56 : index
    %c0_56 = arith.constant 0 : index
    %288 = vector.load %arg5[%c56_55, %c0_56] : memref<64x64xf32, #tpu.memory_space<vmem>>, vector<8x32xf32>
    tpu.vector_store %arg5[%c56_55, %c0_56], %287 {strides = array<i32>} : memref<64x64xf32, #tpu.memory_space<vmem>>, vector<8x32xf32>,
    %289 = vector.extract_strided_slice %286 {offsets = [0, 32], sizes = [8, 32], strides = [1, 1]} : vector<8x64xf32> to vector<8x32xf32>
    %c0_57 = arith.constant 0 : index
    %c32_58 = arith.constant 32 : index
    %290 = vector.load %arg5[%c0_57, %c32_58] : memref<64x64xf32, #tpu.memory_space<vmem>>, vector<8x32xf32>
    tpu.vector_store %arg5[%c0_57, %c32_58], %289 {strides = array<i32>} : memref<64x64xf32, #tpu.memory_space<vmem>>, vector<8x32xf32>,
    return
  }
}

</mosaic_0001>

<bundles_post_ra>
// kernel: encoder_forward.2
= control target key start
LH: loop header
LB: loop body
LE: loop exit
PB: predicated region body
PF: predicated region fallthrough
CT: control target
= control target key end

     0   :  { %vm38_vm0 = vcmask 130048   ;;  %v1025_v31 = vmov 0.0   ;;  %s1028_s21 = smov 32   ;;  %vm180_vm1 = vcmask 261120   ;;  %vm182_vm2 = vcmask 523264   ;;  %s1624_s1 = inlined_call_operand.vmem [shape: f32[16,192], index: 1, kind: input, shape index: {}]   ;;  %s1625_s0 = inlined_call_operand.vmem [shape: f32[64,16], index: 0, kind: input, shape index: {}]   ;;  %s1626_s2 = inlined_call_operand.vmem [shape: f32[1,192], index: 2, kind: input, shape index: {}]   ;;  %s1627_s3 = inlined_call_operand.vmem [shape: f32[64,192], index: 3, kind: input, shape index: {}]   ;;  %s1628_s4 = inlined_call_operand.vmem [shape: f32[1,64], index: 4, kind: input, shape index: {}]   ;;  %s1629_s5 = inlined_call_operand.vmem [shape: f32[64,64], index: 5, kind: output, shape index: {}]  }
   0x1   :  { %v30_v0 = vld [vmem:[%s1624_s1 + $0x10] sm:$0xff]  ;;  %v31_v1 = vld [vmem:[%s1624_s1 + $0x18] sm:$0xff]  ;;  %v28_v2 = vld [vmem:[%s1624_s1] sm:$0xff]  ;;  %vm184_vm3 = vcmask 785408   ;;  %vm267_vm8 = vcmask 523520  }
   0x2   :  { %77 = vmatpush.msra.mxu0 %v30_v0  ;;  %118 = vmatpush.msra.mxu1 %v31_v1  ;;  %v29_v3 = vld [vmem:[%s1624_s1 + $0x8] sm:$0xff]  ;;  %v20_v4 = vld [vmem:[%s1625_s0] sm:$0xff]  ;;  %v22_v6 = vld [vmem:[%s1625_s0 + $0x10] sm:$0xff] }
   0x3   :  { %v21_v5 = vld [vmem:[%s1625_s0 + $0x8] sm:$0xff]  ;;  %v23_v7 = vld [vmem:[%s1625_s0 + $0x18] sm:$0xff]  ;;  %v24_v8 = vld [vmem:[%s1625_s0 + $0x20] sm:$0xff] }
   0x4   :  { %78 = vmatpush.msra.mxu0 %v28_v2  ;;  %119 = vmatpush.msra.mxu1 %v29_v3  ;;  %v25_v9 = vld [vmem:[%s1625_s0 + $0x28] sm:$0xff]  ;;  %v26_v10 = vld [vmem:[%s1625_s0 + $0x30] sm:$0xff]  ;;  %v27_v11 = vld [vmem:[%s1625_s0 + $0x38] sm:$0xff] }
   0x5   :  { %934 = vmatmul.msk.f32.vlgmr.msra.gmra.mxu0 %vm38_vm0, %v20_v4  ;;  %942 = vmatmul.msk.f32.vlgmr.msra.gmra.mxu1 %vm38_vm0, %v20_v4  ;;  %v1114_v12 = vld [vmem:[%s1626_s2] sm:$0x3]  ;;  %v1127_v17 = vld [vmem:[%s1627_s3 + $0x70] sm:$0xff]  ;;  %v1205_v35 = vld [vmem:[%s1627_s3 + $0x78] sm:$0xff]  ;;  %s1027_s2 = smov 64  }
   0x6   :  { %v1117_v13 = vperm.slane %v1114_v12, 1  ;;  %v1132_v18 = vld [vmem:[%s1627_s3 + $0x60] sm:$0xff]  ;;  %198 = vmatpush.msra.mxu2 %v1127_v17  ;;  %587 = vmatpush.msrb.mxu0 %v1127_v17  ;;  %v1143_v21 = vld [vmem:[%s1627_s3 + $0x50] sm:$0xff]  ;;  %v1210_v36 = vld [vmem:[%s1627_s3 + $0x68] sm:$0xff]  ;;  %v34_v52 = vperm.slane %v1114_v12, 0 }
   0x7   :  { %v1152_v23 = vld [vmem:[%s1627_s3 + $0x40] sm:$0xff]  ;;  %v1158_v24 = vld [vmem:[%s1627_s3 + $0x30] sm:$0xff]  ;;  %218 = vmatpush.msra.mxu3 %v1205_v35  ;;  %607 = vmatpush.msrb.mxu1 %v1205_v35  ;;  %v1231_v40 = vld [vmem:[%s1627_s3 + $0x58] sm:$0xff] }
   0x8   :  { %199 = vmatpush.msra.mxu2 %v1132_v18  ;;  %588 = vmatpush.msrb.mxu0 %v1132_v18  ;;  %v1165_v25 = vld [vmem:[%s1627_s3 + $0x20] sm:$0xff]  ;;  %v1176_v28 = vld [vmem:[%s1627_s3 + $0x10] sm:$0xff]  ;;  %v1236_v41 = vld [vmem:[%s1627_s3 + $0x48] sm:$0xff] }
   0x9   :  { %v1185_v30 = vld [vmem:[%s1627_s3] sm:$0xff]  ;;  %219 = vmatpush.msra.mxu3 %v1210_v36  ;;  %608 = vmatpush.msrb.mxu1 %v1210_v36  ;;  %v1245_v42 = vld [vmem:[%s1627_s3 + $0x38] sm:$0xff]  ;;  %v1253_v43 = vld [vmem:[%s1627_s3 + $0x28] sm:$0xff] }
   0xa   :  { %200 = vmatpush.msra.mxu2 %v1143_v21  ;;  %589 = vmatpush.msrb.mxu0 %v1143_v21  ;;  %v1269_v47 = vld [vmem:[%s1627_s3 + $0x18] sm:$0xff]  ;;  %v1274_v48 = vld [vmem:[%s1627_s3 + $0x8] sm:$0xff]  ;;  %s1026_s3 = smov 96  }
   0xb   :  { %220 = vmatpush.msra.mxu3 %v1231_v40  ;;  %609 = vmatpush.msrb.mxu1 %v1231_v40 }
   0xc   :  { %201 = vmatpush.msra.mxu2 %v1152_v23  ;;  %590 = vmatpush.msrb.mxu0 %v1152_v23 }
   0xd   :  { %935 = vmatmul.msk.f32.gmra.mxu0 %vm38_vm0, %v21_v5  ;;  %943 = vmatmul.msk.f32.gmra.mxu1 %vm38_vm0, %v21_v5 }
   0xe   :  { %202 = vmatpush.msra.mxu2 %v1158_v24  ;;  %591 = vmatpush.msrb.mxu0 %v1158_v24 }
   0xf   :  { %221 = vmatpush.msra.mxu3 %v1236_v41  ;;  %610 = vmatpush.msrb.mxu1 %v1236_v41 }
  0x10   :  { %203 = vmatpush.msra.mxu2 %v1165_v25  ;;  %592 = vmatpush.msrb.mxu0 %v1165_v25 }
  0x11   :  { %222 = vmatpush.msra.mxu3 %v1245_v42  ;;  %611 = vmatpush.msrb.mxu1 %v1245_v42 }
  0x12   :  { %204 = vmatpush.msra.mxu2 %v1176_v28  ;;  %593 = vmatpush.msrb.mxu0 %v1176_v28 }
  0x13   :  { %223 = vmatpush.msra.mxu3 %v1253_v43  ;;  %612 = vmatpush.msrb.mxu1 %v1253_v43 }
  0x14   :  { %205 = vmatpush.msra.mxu2 %v1185_v30  ;;  %594 = vmatpush.msrb.mxu0 %v1185_v30 }
  0x15   :  { %936 = vmatmul.msk.f32.gmra.mxu0 %vm38_vm0, %v22_v6  ;;  %944 = vmatmul.msk.f32.gmra.mxu1 %vm38_vm0, %v22_v6 }
  0x16   :  { %206 = vmatmul.f32.vlgmr.msra.gmra.mxu2 %v1025_v31  ;;  %769 = vmatpush.msra.mxu0 %v1127_v17 }
  0x17   :  { %298 = vmatpush.msrb.mxu2 %v1127_v17  ;;  %224 = vmatpush.msra.mxu3 %v1269_v47 }
  0x18   :  { %770 = vmatpush.msra.mxu0 %v1132_v18  ;;  %613 = vmatpush.msrb.mxu1 %v1269_v47 }
  0x19   :  { %299 = vmatpush.msrb.mxu2 %v1132_v18  ;;  %225 = vmatpush.msra.mxu3 %v1274_v48 }
  0x1a   :  { %771 = vmatpush.msra.mxu0 %v1143_v21  ;;  %226 = vmatmul.f32.vlgmr.msra.gmra.mxu3 %v1025_v31 }
  0x1b   :  { %300 = vmatpush.msrb.mxu2 %v1143_v21  ;;  %614 = vmatpush.msrb.mxu1 %v1274_v48 }
  0x1c   :  { %772 = vmatpush.msra.mxu0 %v1152_v23  ;;  %318 = vmatpush.msrb.mxu3 %v1205_v35 }
  0x1d   :  { %937 = vmatmul.msk.f32.gmra.mxu0 %vm38_vm0, %v23_v7  ;;  %945 = vmatmul.msk.f32.gmra.mxu1 %vm38_vm0, %v23_v7 }
  0x1e   :  { %301 = vmatpush.msrb.mxu2 %v1152_v23  ;;  %773 = vmatpush.msra.mxu0 %v1158_v24 }
  0x1f   :  { %789 = vmatpush.msra.mxu1 %v1205_v35  ;;  %319 = vmatpush.msrb.mxu3 %v1210_v36 }
  0x20   :  { %302 = vmatpush.msrb.mxu2 %v1158_v24  ;;  %774 = vmatpush.msra.mxu0 %v1165_v25 }
  0x21   :  { %790 = vmatpush.msra.mxu1 %v1210_v36  ;;  %320 = vmatpush.msrb.mxu3 %v1231_v40 }
  0x22   :  { %303 = vmatpush.msrb.mxu2 %v1165_v25  ;;  %775 = vmatpush.msra.mxu0 %v1176_v28 }
  0x23   :  { %791 = vmatpush.msra.mxu1 %v1231_v40  ;;  %321 = vmatpush.msrb.mxu3 %v1236_v41 }
  0x24   :  { %304 = vmatpush.msrb.mxu2 %v1176_v28  ;;  %776 = vmatpush.msra.mxu0 %v1185_v30 }
  0x25   :  { %938 = vmatmul.msk.f32.gmra.mxu0 %vm38_vm0, %v24_v8  ;;  %946 = vmatmul.msk.f32.gmra.mxu1 %vm38_vm0, %v24_v8 }
  0x26   :  { %305 = vmatpush.msrb.mxu2 %v1185_v30  ;;  %792 = vmatpush.msra.mxu1 %v1236_v41 }
  0x27   :  { %322 = vmatpush.msrb.mxu3 %v1245_v42 }
  0x28   :  { %397 = vmatpush.msra.mxu2 %v1127_v17  ;;  %793 = vmatpush.msra.mxu1 %v1245_v42 }
  0x29   :  { %323 = vmatpush.msrb.mxu3 %v1253_v43 }
  0x2a   :  { %398 = vmatpush.msra.mxu2 %v1132_v18  ;;  %794 = vmatpush.msra.mxu1 %v1253_v43 }
  0x2b   :  { %324 = vmatpush.msrb.mxu3 %v1269_v47 }
  0x2c   :  { %399 = vmatpush.msra.mxu2 %v1143_v21  ;;  %795 = vmatpush.msra.mxu1 %v1269_v47 }
  0x2d   :  { %939 = vmatmul.msk.f32.gmra.mxu0 %vm38_vm0, %v25_v9  ;;  %947 = vmatmul.msk.f32.gmra.mxu1 %vm38_vm0, %v25_v9 }
  0x2e   :  { %400 = vmatpush.msra.mxu2 %v1152_v23  ;;  %325 = vmatpush.msrb.mxu3 %v1274_v48 }
  0x2f   :  { %796 = vmatpush.msra.mxu1 %v1274_v48 }
  0x30   :  { %401 = vmatpush.msra.mxu2 %v1158_v24  ;;  %417 = vmatpush.msra.mxu3 %v1205_v35 }
  0x32   :  { %402 = vmatpush.msra.mxu2 %v1165_v25  ;;  %418 = vmatpush.msra.mxu3 %v1210_v36 }
  0x34   :  { %403 = vmatpush.msra.mxu2 %v1176_v28  ;;  %419 = vmatpush.msra.mxu3 %v1231_v40 }
  0x35   :  { %940 = vmatmul.msk.f32.gmra.mxu0 %vm38_vm0, %v26_v10  ;;  %948 = vmatmul.msk.f32.gmra.mxu1 %vm38_vm0, %v26_v10 }
  0x36   :  { %404 = vmatpush.msra.mxu2 %v1185_v30  ;;  %420 = vmatpush.msra.mxu3 %v1236_v41 }
  0x38   :  { %421 = vmatpush.msra.mxu3 %v1245_v42 }
  0x3a   :  { %422 = vmatpush.msra.mxu3 %v1253_v43 }
  0x3c   :  { %423 = vmatpush.msra.mxu3 %v1269_v47 }
  0x3d   :  { %941 = vmatmul.msk.f32.gmra.mxu0 %vm38_vm0, %v27_v11  ;;  %949 = vmatmul.msk.f32.gmra.mxu1 %vm38_vm0, %v27_v11 }
  0x3e   :  { %424 = vmatpush.msra.mxu3 %v1274_v48 }
  0x82   :  { %v1119_v14 = vpop.f32.mrf.mxu0  ;;  %v121_v15 = vpop.f32.mrf.mxu1 }
  0x83   :  { %v1122_v16 = vadd.f32 %v121_v15, %v1117_v13  ;;  %v81_v57 = vadd.f32 %v1119_v14, %v34_v52 }
  0x8a   :  { %v1138_v19 = vpop.f32.mrf.mxu0  ;;  %v124_v20 = vpop.f32.mrf.mxu1 }
  0x8b   :  { %v1146_v22 = vadd.f32 %v124_v20, %v1117_v13  ;;  %v1323_v58 = vadd.f32 %v1138_v19, %v34_v52 }
  0x92   :  { %v1171_v26 = vpop.f32.mrf.mxu0  ;;  %v127_v27 = vpop.f32.mrf.mxu1 }
  0x93   :  { %v1179_v29 = vadd.f32 %v127_v27, %v1117_v13  ;;  %v1342_v61 = vadd.f32 %v1171_v26, %v34_v52 }
  0x99   :  { %v207_v3 = vpop.f32.mrf.mxu2 }
  0x9a   :  { %v1194_v32 = vpop.f32.mrf.mxu0  ;;  %v130_v33 = vpop.f32.mrf.mxu1 }
  0x9b   :  { %v1198_v34 = vadd.f32 %v130_v33, %v1117_v13  ;;  %v1352_v63 = vadd.f32 %v1194_v32, %v34_v52 }
  0x9d   :  { %v227_v15 = vpop.f32.mrf.mxu3 }
  0xa2   :  { %v1221_v37 = vpop.f32.mrf.mxu0  ;;  %v133_v38 = vpop.f32.mrf.mxu1 }
  0xa3   :  { %v1224_v39 = vadd.f32 %v133_v38, %v1117_v13  ;;  %v1347_v62 = vadd.f32 %v1221_v37, %v34_v52 }
  0xaa   :  { %v1256_v44 = vpop.f32.mrf.mxu0  ;;  %v136_v45 = vpop.f32.mrf.mxu1 }
  0xab   :  { %v1261_v46 = vadd.f32 %v136_v45, %v1117_v13  ;;  %v1337_v60 = vadd.f32 %v1256_v44, %v34_v52 }
  0xb2   :  { %v98_v49 = vpop.f32.mrf.mxu0  ;;  %v139_v50 = vpop.f32.mrf.mxu1 }
  0xb3   :  { %v1286_v51 = vadd.f32 %v139_v50, %v1117_v13  ;;  %v1325_v59 = vadd.f32 %v98_v49, %v34_v52 }
  0xba   :  { %v101_v53 = vpop.f32.mrf.mxu0  ;;  %v142_v54 = vpop.f32.mrf.mxu1 }
  0xbb   :  { %v1298_v55 = vadd.f32 %v101_v53, %v34_v52  ;;  %v1301_v56 = vadd.f32 %v142_v54, %v1117_v13  ;;  %v1367_v13 = vld [vmem:[%s1628_s4] ss:$0 sm:$0xff] }
  0xbc   :  { %v250_v31 = vadd.f32 %v1367_v13, %v227_v15 }
  0xbd   :  { %174 = vrot.lane.b32.xlu1 %v1301_v56, %s1026_s3  ;;  %166 = vrot.lane.b32.xlu0 %v1298_v55, %s1027_s2 }
  0xc5   :  { %177 = vrot.lane.b32.xlu1 %v81_v57, %s1027_s2  ;;  %170 = vrot.lane.b32.xlu0 %v81_v57, %s1028_s21 }
  0xcd   :  { %274 = vrot.lane.b32.xlu1 %v1323_v58, %s1028_s21  ;;  %270 = vrot.lane.b32.xlu0 %v1325_v59, %s1027_s2 }
  0xd5   :  { %281 = vrot.lane.b32.xlu0 %v1323_v58, %s1027_s2 }
  0xdd   :  { %369 = vrot.lane.b32.xlu0 %v1337_v60, %s1027_s2 }
  0xe5   :  { %380 = vrot.lane.b32.xlu0 %v1342_v61, %s1027_s2 }
  0xed   :  { %468 = vrot.lane.b32.xlu0 %v1347_v62, %s1027_s2 }
  0xf5   :  { %479 = vrot.lane.b32.xlu0 %v1352_v63, %s1027_s2 }
  0xfd   :  { %566 = vrot.lane.b32.xlu0 %v1347_v62, %s1028_s21 }
 0x12f   :  { %v1358_v0 = vpop.permute.xlu0 %166  ;;  %v175_v4 = vpop.permute.xlu1 %174 }
 0x130   :  { %v181_v1 = vsel %vm180_vm1, %v81_v57, %v1358_v0 }
 0x137   :  { %v171_v2 = vpop.permute.xlu0 %170  ;;  %v1370_v33 = vpop.permute.xlu1 %177 }
 0x138   :  { %v183_v5 = vsel %vm182_vm2, %v181_v1, %v171_v2  ;;  %v186_v45 = vsel %vm180_vm1, %v1370_v33, %v1301_v56 }
 0x139   :  { %v185_v6 = vsel %vm184_vm3, %v183_v5, %v175_v4 }
 0x13a   :  { %v230_v7 = vadd.f32 %v207_v3, %v185_v6 }
 0x13c   :  { %v950_v8 = vmul.f32 -1.442695, %v230_v7 }
 0x13e   :  { %977 = vpow2.f32 %v950_v8 }
 0x13f   :  { %v1408_v56 = vpop.permute.xlu0 %270  ;;  %v275_v3 = vpop.permute.xlu1 %274 }
 0x140   :  { %v284_v4 = vsel %vm180_vm1, %v1323_v58, %v1408_v56 }
 0x141   :  { %v285_v6 = vsel %vm182_vm2, %v284_v4, %v275_v3 }
 0x144   :  { %v978_v9 = vpop.eup %977 }
 0x145   :  { %v234_v10 = vadd.f32 1.0, %v978_v9 }
 0x147   :  { %979 = vrcp.f32 %v234_v10  ;;  %v246_v19 = vand.u32 2147483648, %v234_v10  ;;  %v244_v26 = vand.u32 2147483647, %v234_v10  ;;  %vm240_vm5 = vweird.f32 %v234_v10 }
 0x149   :  { %v247_v32 = vor.u32 1.1754944e-38, %v246_v19  ;;  %vm245_vm7 = vcmp.eq.f32.partialorder %v244_v26, 8.507059e+37 }
 0x14d   :  { %v980_v11 = vpop.eup %979 }
 0x14e   :  { %v236_v12 = vmul.f32 %v980_v11, %v234_v10  ;;  %vm241_vm4 = vweird.f32 %v980_v11 }
 0x14f   :  { %vm242_vm6 = vmor %vm240_vm5, %vm241_vm4 }
 0x150   :  { %v237_v14 = vsub.f32 1.0, %v236_v12 }
 0x152   :  { %v238_v20 = vmul.f32 %v980_v11, %v237_v14 }
 0x154   :  { %v239_v27 = vadd.f32 %v980_v11, %v238_v20 }
 0x156   :  { %v243_v37 = vsel %vm242_vm6, %v980_v11, %v239_v27 }
 0x157   :  { %v248_v38 = vsel %vm245_vm7, %v247_v32, %v243_v37  ;;  %v1415_v37 = vpop.permute.xlu0 %281 }
 0x158   :  { %v251_v44 = vmul.f32 %v250_v31, %v248_v38  ;;  %v254_v52 = vsub.f32 1.0, %v248_v38  ;;  %v260_v54 = vmul.f32 0.0, %v248_v38 }
 0x15a   :  { %v252_v49 = vadd.f32 %v251_v44, %v186_v45 }
 0x15c   :  { %981 = vtanh.f32 %v252_v49 }
 0x162   :  { %v982_v50 = vpop.eup %981 }
 0x163   :  { %256 = vrot.lane.b32.xlu2 %v982_v50, %s1027_s2  ;;  %v287_v50 = vsel %vm180_vm1, %v1415_v37, %v1286_v51 }
 0x1bd   :  { %v257_v53 = vpop.permute.xlu2 %256 }
 0x1be   :  { %v259_v57 = vmul.f32 %v257_v53, %v254_v52 }
 0x1c0   :  { %v1376_v1 = vadd.f32 %v260_v54, %v259_v57 }
 0x1c2   :  { %263 = vrot.lane.b32.xlu2 %v1376_v1, %s1027_s2 }
 0x1ca   :  { %278 = vrot.lane.b32.xlu2 %v1286_v51, %s1026_s3 }
 0x21c   :  { %v264_v2 = vpop.permute.xlu2 %263 }
 0x21d   :  { %266 = vst.msk [vmem:[%s1629_s5] sm:$0xff] %vm180_vm1, %v264_v2  ;;  %951 = vmatmul.msk.f32.vlgmr.msrb.gmra.mxu2 %vm182_vm2, %v264_v2  ;;  %952 = vmatmul.msk.f32.vlgmr.msrb.gmra.mxu3 %vm182_vm2, %v264_v2 }
 0x21e   :  { %268 = vst.msk [vmem:[%s1629_s5 + $0x38] sm:$0xff] %vm267_vm8, %v264_v2  ;;  %496 = vmatpush.msrb.mxu2 %v1127_v17  ;;  %516 = vmatpush.msrb.mxu3 %v1205_v35 }
 0x220   :  { %497 = vmatpush.msrb.mxu2 %v1132_v18  ;;  %517 = vmatpush.msrb.mxu3 %v1210_v36 }
 0x222   :  { %498 = vmatpush.msrb.mxu2 %v1143_v21  ;;  %518 = vmatpush.msrb.mxu3 %v1231_v40 }
 0x224   :  { %499 = vmatpush.msrb.mxu2 %v1152_v23  ;;  %519 = vmatpush.msrb.mxu3 %v1236_v41  ;;  %v279_v5 = vpop.permute.xlu2 %278 }
 0x225   :  { %v286_v7 = vsel %vm184_vm3, %v285_v6, %v279_v5 }
 0x226   :  { %500 = vmatpush.msrb.mxu2 %v1158_v24  ;;  %520 = vmatpush.msrb.mxu3 %v1245_v42 }
 0x228   :  { %501 = vmatpush.msrb.mxu2 %v1165_v25  ;;  %521 = vmatpush.msrb.mxu3 %v1253_v43 }
 0x22a   :  { %502 = vmatpush.msrb.mxu2 %v1176_v28  ;;  %522 = vmatpush.msrb.mxu3 %v1269_v47 }
 0x22c   :  { %503 = vmatpush.msrb.mxu2 %v1185_v30  ;;  %523 = vmatpush.msrb.mxu3 %v1274_v48 }
 0x2a0   :  { %v307_v8 = vpop.f32.mrf.mxu2  ;;  %v327_v58 = vpop.f32.mrf.mxu3 }
 0x2a1   :  { %v330_v9 = vadd.f32 %v307_v8, %v286_v7  ;;  %v350_v44 = vadd.f32 %v1367_v13, %v327_v58 }
 0x2a3   :  { %v953_v10 = vmul.f32 -1.442695, %v330_v9 }
 0x2a5   :  { %983 = vpow2.f32 %v953_v10 }
 0x2ab   :  { %v984_v11 = vpop.eup %983 }
 0x2ac   :  { %v334_v12 = vadd.f32 1.0, %v984_v11 }
 0x2ae   :  { %985 = vrcp.f32 %v334_v12  ;;  %v346_v20 = vand.u32 2147483648, %v334_v12  ;;  %v344_v27 = vand.u32 2147483647, %v334_v12  ;;  %vm340_vm10 = vweird.f32 %v334_v12 }
 0x2b0   :  { %v347_v32 = vor.u32 1.1754944e-38, %v346_v20  ;;  %vm345_vm12 = vcmp.eq.f32.partialorder %v344_v27, 8.507059e+37 }
 0x2b4   :  { %v986_v14 = vpop.eup %985 }
 0x2b5   :  { %v336_v15 = vmul.f32 %v986_v14, %v334_v12  ;;  %vm341_vm9 = vweird.f32 %v986_v14 }
 0x2b6   :  { %vm342_vm11 = vmor %vm340_vm10, %vm341_vm9 }
 0x2b7   :  { %v337_v19 = vsub.f32 1.0, %v336_v15 }
 0x2b9   :  { %v338_v26 = vmul.f32 %v986_v14, %v337_v19 }
 0x2bb   :  { %v339_v31 = vadd.f32 %v986_v14, %v338_v26 }
 0x2bd   :  { %v343_v38 = vsel %vm342_vm11, %v986_v14, %v339_v31 }
 0x2be   :  { %v348_v45 = vsel %vm345_vm12, %v347_v32, %v343_v38 }
 0x2bf   :  { %v351_v49 = vmul.f32 %v350_v44, %v348_v45  ;;  %v354_v54 = vsub.f32 1.0, %v348_v45  ;;  %v360_v2 = vmul.f32 %v348_v45, %v1376_v1  ;;  %v1457_v1 = vpop.permute.xlu0 %369 }
 0x2c0   :  { %v383_v7 = vsel %vm180_vm1, %v1342_v61, %v1457_v1 }
 0x2c1   :  { %v352_v52 = vadd.f32 %v351_v49, %v287_v50 }
 0x2c3   :  { %987 = vtanh.f32 %v352_v52 }
 0x2c7   :  { %v1464_v44 = vpop.permute.xlu0 %380 }
 0x2c9   :  { %v988_v53 = vpop.eup %987 }
 0x2ca   :  { %356 = vrot.lane.b32.xlu1 %v988_v53, %s1027_s2  ;;  %v386_v53 = vsel %vm180_vm1, %v1464_v44, %v1261_v46 }
 0x2d2   :  { %373 = vrot.lane.b32.xlu1 %v1342_v61, %s1028_s21 }
 0x33c   :  { %v357_v57 = vpop.permute.xlu1 %356 }
 0x33d   :  { %v359_v3 = vmul.f32 %v357_v57, %v354_v54 }
 0x33f   :  { %v1425_v4 = vadd.f32 %v360_v2, %v359_v3 }
 0x341   :  { %363 = vrot.lane.b32.xlu2 %v1425_v4, %s1027_s2 }
 0x344   :  { %v374_v5 = vpop.permute.xlu1 %373 }
 0x345   :  { %v384_v8 = vsel %vm182_vm2, %v383_v7, %v374_v5 }
 0x349   :  { %377 = vrot.lane.b32.xlu2 %v1261_v46, %s1026_s3 }
 0x39b   :  { %v364_v51 = vpop.permute.xlu2 %363 }
 0x39c   :  { %366 = vst.msk [vmem:[%s1629_s5 + $0x8] sm:$0xff] %vm180_vm1, %v364_v51  ;;  %954 = vmatmul.msk.f32.vlgmr.msra.gmra.mxu2 %vm182_vm2, %v364_v51  ;;  %955 = vmatmul.msk.f32.vlgmr.msra.gmra.mxu3 %vm182_vm2, %v364_v51 }
 0x39d   :  { %367 = vst.msk [vmem:[%s1629_s5 + $0x30] sm:$0xff] %vm267_vm8, %v364_v51  ;;  %678 = vmatpush.msra.mxu2 %v1127_v17  ;;  %698 = vmatpush.msra.mxu3 %v1205_v35 }
 0x39f   :  { %679 = vmatpush.msra.mxu2 %v1132_v18  ;;  %699 = vmatpush.msra.mxu3 %v1210_v36 }
 0x3a1   :  { %680 = vmatpush.msra.mxu2 %v1143_v21  ;;  %700 = vmatpush.msra.mxu3 %v1231_v40 }
 0x3a3   :  { %681 = vmatpush.msra.mxu2 %v1152_v23  ;;  %701 = vmatpush.msra.mxu3 %v1236_v41  ;;  %v378_v6 = vpop.permute.xlu2 %377 }
 0x3a4   :  { %v385_v9 = vsel %vm184_vm3, %v384_v8, %v378_v6 }
 0x3a5   :  { %682 = vmatpush.msra.mxu2 %v1158_v24  ;;  %702 = vmatpush.msra.mxu3 %v1245_v42 }
 0x3a7   :  { %683 = vmatpush.msra.mxu2 %v1165_v25  ;;  %703 = vmatpush.msra.mxu3 %v1253_v43 }
 0x3a9   :  { %684 = vmatpush.msra.mxu2 %v1176_v28  ;;  %704 = vmatpush.msra.mxu3 %v1269_v47 }
 0x3ab   :  { %685 = vmatpush.msra.mxu2 %v1185_v30  ;;  %705 = vmatpush.msra.mxu3 %v1274_v48 }
 0x41f   :  { %v406_v10 = vpop.f32.mrf.mxu2  ;;  %v426_v32 = vpop.f32.mrf.mxu3 }
 0x420   :  { %v429_v11 = vadd.f32 %v406_v10, %v385_v9  ;;  %v449_v49 = vadd.f32 %v1367_v13, %v426_v32 }
 0x422   :  { %v956_v12 = vmul.f32 -1.442695, %v429_v11 }
 0x424   :  { %989 = vpow2.f32 %v956_v12 }
 0x42a   :  { %v990_v14 = vpop.eup %989 }
 0x42b   :  { %v433_v15 = vadd.f32 1.0, %v990_v14 }
 0x42d   :  { %991 = vrcp.f32 %v433_v15  ;;  %v445_v27 = vand.u32 2147483648, %v433_v15  ;;  %v443_v31 = vand.u32 2147483647, %v433_v15  ;;  %vm439_vm14 = vweird.f32 %v433_v15 }
 0x42f   :  { %v446_v38 = vor.u32 1.1754944e-38, %v445_v27  ;;  %vm444_vm0 = vcmp.eq.f32.partialorder %v443_v31, 8.507059e+37 }
 0x433   :  { %v992_v19 = vpop.eup %991 }
 0x434   :  { %v435_v20 = vmul.f32 %v992_v19, %v433_v15  ;;  %vm440_vm13 = vweird.f32 %v992_v19 }
 0x435   :  { %vm441_vm15 = vmor %vm439_vm14, %vm440_vm13 }
 0x436   :  { %v436_v26 = vsub.f32 1.0, %v435_v20 }
 0x438   :  { %v437_v58 = vmul.f32 %v992_v19, %v436_v26 }
 0x43a   :  { %v438_v61 = vadd.f32 %v992_v19, %v437_v58 }
 0x43c   :  { %v442_v45 = vsel %vm441_vm15, %v992_v19, %v438_v61 }
 0x43d   :  { %v447_v50 = vsel %vm444_vm0, %v446_v38, %v442_v45 }
 0x43e   :  { %v450_v52 = vmul.f32 %v449_v49, %v447_v50  ;;  %v453_v2 = vsub.f32 1.0, %v447_v50  ;;  %v459_v51 = vmul.f32 %v447_v50, %v1425_v4 }
 0x440   :  { %v451_v54 = vadd.f32 %v450_v52, %v386_v53 }
 0x442   :  { %993 = vtanh.f32 %v451_v54 }
 0x448   :  { %v994_v57 = vpop.eup %993 }
 0x449   :  { %455 = vrot.lane.b32.xlu1 %v994_v57, %s1027_s2 }
 0x451   :  { %472 = vrot.lane.b32.xlu1 %v1352_v63, %s1028_s21 }
 0x4bb   :  { %v456_v3 = vpop.permute.xlu1 %455 }
 0x4bc   :  { %v458_v5 = vmul.f32 %v456_v3, %v453_v2 }
 0x4be   :  { %v1474_v6 = vadd.f32 %v459_v51, %v458_v5 }
 0x4c0   :  { %462 = vrot.lane.b32.xlu2 %v1474_v6, %s1027_s2 }
 0x4c8   :  { %476 = vrot.lane.b32.xlu2 %v1224_v39, %s1026_s3 }
 0x51a   :  { %v463_v46 = vpop.permute.xlu2 %462 }
 0x51b   :  { %465 = vst.msk [vmem:[%s1629_s5 + $0x10] sm:$0xff] %vm180_vm1, %v463_v46  ;;  %957 = vmatmul.msk.f32.vlgmr.msrb.gmra.mxu2 %vm182_vm2, %v463_v46  ;;  %958 = vmatmul.msk.f32.vlgmr.msrb.gmra.mxu3 %vm182_vm2, %v463_v46 }
 0x51c   :  { %466 = vst.msk [vmem:[%s1629_s5 + $0x28] sm:$0xff] %vm267_vm8, %v463_v46  ;;  %860 = vmatpush.msrb.mxu2 %v1127_v17  ;;  %880 = vmatpush.msrb.mxu3 %v1205_v35  ;;  %v1506_v17 = vpop.permute.xlu0 %468 }
 0x51e   :  { %861 = vmatpush.msrb.mxu2 %v1132_v18  ;;  %881 = vmatpush.msrb.mxu3 %v1210_v36  ;;  %v473_v18 = vpop.permute.xlu1 %472 }
 0x520   :  { %862 = vmatpush.msrb.mxu2 %v1143_v21  ;;  %882 = vmatpush.msrb.mxu3 %v1231_v40 }
 0x522   :  { %863 = vmatpush.msrb.mxu2 %v1152_v23  ;;  %883 = vmatpush.msrb.mxu3 %v1236_v41  ;;  %v477_v21 = vpop.permute.xlu2 %476  ;;  %v482_v23 = vsel %vm180_vm1, %v1352_v63, %v1506_v17 }
 0x524   :  { %864 = vmatpush.msrb.mxu2 %v1158_v24  ;;  %884 = vmatpush.msrb.mxu3 %v1245_v42  ;;  %v483_v24 = vsel %vm182_vm2, %v482_v23, %v473_v18  ;;  %v480_v9 = vpop.permute.xlu0 %479 }
 0x525   :  { %v485_v15 = vsel %vm180_vm1, %v480_v9, %v1224_v39  ;;  %v573_v45 = vsel %vm180_vm1, %v1347_v62, %v480_v9 }
 0x526   :  { %865 = vmatpush.msrb.mxu2 %v1165_v25  ;;  %885 = vmatpush.msrb.mxu3 %v1253_v43  ;;  %v484_v25 = vsel %vm184_vm3, %v483_v24, %v477_v21 }
 0x528   :  { %866 = vmatpush.msrb.mxu2 %v1176_v28  ;;  %886 = vmatpush.msrb.mxu3 %v1269_v47 }
 0x52a   :  { %867 = vmatpush.msrb.mxu2 %v1185_v30  ;;  %887 = vmatpush.msrb.mxu3 %v1274_v48 }
 0x52c   :  { %v567_v61 = vpop.permute.xlu0 %566 }
 0x52d   :  { %v574_v49 = vsel %vm182_vm2, %v573_v45, %v567_v61  ;;  %v667_v45 = vsel %vm180_vm1, %v1457_v1, %v1179_v29 }
 0x59e   :  { %v505_v35 = vpop.f32.mrf.mxu2  ;;  %v525_v7 = vpop.f32.mrf.mxu3 }
 0x59f   :  { %v528_v28 = vadd.f32 %v505_v35, %v484_v25  ;;  %v548_v11 = vadd.f32 %v1367_v13, %v525_v7  ;;  %v664_v7 = vsel %vm180_vm1, %v1337_v60, %v1464_v44 }
 0x5a1   :  { %v959_v36 = vmul.f32 -1.442695, %v528_v28 }
 0x5a3   :  { %995 = vpow2.f32 %v959_v36  ;;  %v576_v36 = vsel %vm180_vm1, %v1506_v17, %v1198_v34 }
 0x5a9   :  { %v996_v40 = vpop.eup %995 }
 0x5aa   :  { %v532_v30 = vadd.f32 1.0, %v996_v40 }
 0x5ac   :  { %997 = vrcp.f32 %v532_v30  ;;  %v544_v47 = vand.u32 2147483648, %v532_v30  ;;  %v542_v4 = vand.u32 2147483647, %v532_v30  ;;  %vm538_vm5 = vweird.f32 %v532_v30 }
 0x5ae   :  { %v545_v8 = vor.u32 1.1754944e-38, %v544_v47  ;;  %vm543_vm7 = vcmp.eq.f32.partialorder %v542_v4, 8.507059e+37 }
 0x5b2   :  { %v998_v41 = vpop.eup %997 }
 0x5b3   :  { %v534_v42 = vmul.f32 %v998_v41, %v532_v30  ;;  %vm539_vm4 = vweird.f32 %v998_v41 }
 0x5b4   :  { %vm540_vm6 = vmor %vm538_vm5, %vm539_vm4 }
 0x5b5   :  { %v535_v43 = vsub.f32 1.0, %v534_v42 }
 0x5b7   :  { %v536_v48 = vmul.f32 %v998_v41, %v535_v43 }
 0x5b9   :  { %v537_v63 = vadd.f32 %v998_v41, %v536_v48 }
 0x5bb   :  { %v541_v10 = vsel %vm540_vm6, %v998_v41, %v537_v63 }
 0x5bc   :  { %v546_v12 = vsel %vm543_vm7, %v545_v8, %v541_v10 }
 0x5bd   :  { %v549_v14 = vmul.f32 %v548_v11, %v546_v12  ;;  %v552_v26 = vsub.f32 1.0, %v546_v12  ;;  %v558_v58 = vmul.f32 %v546_v12, %v1474_v6 }
 0x5bf   :  { %v550_v19 = vadd.f32 %v549_v14, %v485_v15 }
 0x5c1   :  { %999 = vtanh.f32 %v550_v19 }
 0x5c7   :  { %v1000_v20 = vpop.eup %999 }
 0x5c8   :  { %554 = vrot.lane.b32.xlu1 %v1000_v20, %s1027_s2 }
 0x5d0   :  { %570 = vrot.lane.b32.xlu1 %v1198_v34, %s1026_s3 }
 0x5d8   :  { %657 = vrot.lane.b32.xlu1 %v1337_v60, %s1028_s21 }
 0x63a   :  { %v555_v27 = vpop.permute.xlu1 %554 }
 0x63b   :  { %v557_v31 = vmul.f32 %v555_v27, %v552_v26 }
 0x63d   :  { %v559_v32 = vadd.f32 %v558_v58, %v557_v31 }
 0x63f   :  { %561 = vrot.lane.b32.xlu2 %v559_v32, %s1027_s2 }
 0x642   :  { %v571_v38 = vpop.permute.xlu1 %570 }
 0x643   :  { %v575_v50 = vsel %vm184_vm3, %v574_v49, %v571_v38 }
 0x64a   :  { %v658_v34 = vpop.permute.xlu1 %657 }
 0x64b   :  { %v665_v63 = vsel %vm182_vm2, %v664_v7, %v658_v34 }
 0x699   :  { %v562_v39 = vpop.permute.xlu2 %561 }
 0x69a   :  { %564 = vst.msk [vmem:[%s1629_s5 + $0x18] sm:$0xff] %vm180_vm1, %v562_v39  ;;  %960 = vmatmul.msk.f32.vlgmr.msrb.gmra.mxu0 %vm182_vm2, %v562_v39  ;;  %961 = vmatmul.msk.f32.vlgmr.msrb.gmra.mxu1 %vm182_vm2, %v562_v39 }
 0x69b   :  { %565 = vst.msk [vmem:[%s1629_s5 + $0x20] sm:$0xff] %vm267_vm8, %v562_v39 }
 0x717   :  { %v596_v52 = vpop.f32.mrf.mxu0  ;;  %v616_v21 = vpop.f32.mrf.mxu1 }
 0x718   :  { %v619_v53 = vadd.f32 %v596_v52, %v575_v50  ;;  %v639_v25 = vadd.f32 %v1367_v13, %v616_v21 }
 0x71a   :  { %v962_v54 = vmul.f32 -1.442695, %v619_v53 }
 0x71c   :  { %1001 = vpow2.f32 %v962_v54 }
 0x722   :  { %v1002_v57 = vpop.eup %1001 }
 0x723   :  { %v623_v2 = vadd.f32 1.0, %v1002_v57 }
 0x725   :  { %1003 = vrcp.f32 %v623_v2  ;;  %v635_v6 = vand.u32 2147483648, %v623_v2  ;;  %v633_v18 = vand.u32 2147483647, %v623_v2  ;;  %vm629_vm10 = vweird.f32 %v623_v2 }
 0x727   :  { %v636_v23 = vor.u32 1.1754944e-38, %v635_v6  ;;  %vm634_vm12 = vcmp.eq.f32.partialorder %v633_v18, 8.507059e+37 }
 0x72b   :  { %v1004_v3 = vpop.eup %1003 }
 0x72c   :  { %v625_v51 = vmul.f32 %v1004_v3, %v623_v2  ;;  %vm630_vm9 = vweird.f32 %v1004_v3 }
 0x72d   :  { %vm631_vm11 = vmor %vm629_vm10, %vm630_vm9 }
 0x72e   :  { %v626_v5 = vsub.f32 1.0, %v625_v51  ;;  %v755_v51 = vsel %vm180_vm1, %v1325_v59, %v1415_v37 }
 0x730   :  { %v627_v46 = vmul.f32 %v1004_v3, %v626_v5 }
 0x732   :  { %v628_v62 = vadd.f32 %v1004_v3, %v627_v46 }
 0x734   :  { %v632_v24 = vsel %vm631_vm11, %v1004_v3, %v628_v62 }
 0x735   :  { %v637_v35 = vsel %vm634_vm12, %v636_v23, %v632_v24 }
 0x736   :  { %v640_v28 = vmul.f32 %v639_v25, %v637_v35  ;;  %v643_v41 = vsub.f32 1.0, %v637_v35  ;;  %v649_v43 = vmul.f32 %v637_v35, %v559_v32 }
 0x738   :  { %v641_v40 = vadd.f32 %v640_v28, %v576_v36 }
 0x73a   :  { %1005 = vtanh.f32 %v641_v40 }
 0x740   :  { %v1006_v30 = vpop.eup %1005 }
 0x741   :  { %645 = vrot.lane.b32.xlu2 %v1006_v30, %s1027_s2 }
 0x749   :  { %661 = vrot.lane.b32.xlu2 %v1179_v29, %s1026_s3 }
 0x751   :  { %748 = vrot.lane.b32.xlu2 %v1325_v59, %s1028_s21 }
 0x79b   :  { %v646_v42 = vpop.permute.xlu2 %645 }
 0x79c   :  { %v648_v47 = vmul.f32 %v646_v42, %v643_v41 }
 0x79e   :  { %v650_v48 = vadd.f32 %v649_v43, %v648_v47 }
 0x7a0   :  { %652 = vrot.lane.b32.xlu0 %v650_v48, %s1027_s2 }
 0x7a3   :  { %v662_v17 = vpop.permute.xlu2 %661 }
 0x7a4   :  { %v666_v8 = vsel %vm184_vm3, %v665_v63, %v662_v17 }
 0x7ab   :  { %v749_v29 = vpop.permute.xlu2 %748 }
 0x7ac   :  { %v756_v5 = vsel %vm182_vm2, %v755_v51, %v749_v29 }
 0x812   :  { %v653_v4 = vpop.permute.xlu0 %652 }
 0x813   :  { %655 = vst.msk [vmem:[%s1629_s5 + $0x20] sm:$0xff] %vm180_vm1, %v653_v4  ;;  %963 = vmatmul.msk.f32.vlgmr.msra.gmra.mxu2 %vm182_vm2, %v653_v4  ;;  %964 = vmatmul.msk.f32.vlgmr.msra.gmra.mxu3 %vm182_vm2, %v653_v4 }
 0x814   :  { %656 = vst.msk [vmem:[%s1629_s5 + $0x18] sm:$0xff] %vm267_vm8, %v653_v4 }
 0x896   :  { %v687_v9 = vpop.f32.mrf.mxu2  ;;  %v707_v31 = vpop.f32.mrf.mxu3 }
 0x897   :  { %v710_v10 = vadd.f32 %v687_v9, %v666_v8  ;;  %v730_v39 = vadd.f32 %v1367_v13, %v707_v31 }
 0x899   :  { %v965_v11 = vmul.f32 -1.442695, %v710_v10 }
 0x89b   :  { %1007 = vpow2.f32 %v965_v11  ;;  %v846_v11 = vsel %vm180_vm1, %v1298_v55, %v1370_v33 }
 0x8a1   :  { %v1008_v12 = vpop.eup %1007 }
 0x8a2   :  { %v714_v14 = vadd.f32 1.0, %v1008_v12 }
 0x8a4   :  { %1009 = vrcp.f32 %v714_v14  ;;  %v726_v26 = vand.u32 2147483648, %v714_v14  ;;  %v724_v58 = vand.u32 2147483647, %v714_v14  ;;  %vm720_vm14 = vweird.f32 %v714_v14 }
 0x8a6   :  { %v727_v44 = vor.u32 1.1754944e-38, %v726_v26  ;;  %vm725_vm0 = vcmp.eq.f32.partialorder %v724_v58, 8.507059e+37 }
 0x8aa   :  { %v1010_v15 = vpop.eup %1009 }
 0x8ab   :  { %v716_v19 = vmul.f32 %v1010_v15, %v714_v14  ;;  %vm721_vm13 = vweird.f32 %v1010_v15 }
 0x8ac   :  { %vm722_vm15 = vmor %vm720_vm14, %vm721_vm13 }
 0x8ad   :  { %v717_v20 = vsub.f32 1.0, %v716_v19 }
 0x8af   :  { %v718_v27 = vmul.f32 %v1010_v15, %v717_v20 }
 0x8b1   :  { %v719_v60 = vadd.f32 %v1010_v15, %v718_v27 }
 0x8b3   :  { %v723_v32 = vsel %vm722_vm15, %v1010_v15, %v719_v60 }
 0x8b4   :  { %v728_v61 = vsel %vm725_vm0, %v727_v44, %v723_v32 }
 0x8b5   :  { %v731_v38 = vmul.f32 %v730_v39, %v728_v61  ;;  %v734_v52 = vsub.f32 1.0, %v728_v61  ;;  %v740_v54 = vmul.f32 %v728_v61, %v650_v48  ;;  %v758_v48 = vsel %vm180_vm1, %v1408_v56, %v1146_v22 }
 0x8b7   :  { %v732_v49 = vadd.f32 %v731_v38, %v667_v45 }
 0x8b9   :  { %1011 = vtanh.f32 %v732_v49 }
 0x8bf   :  { %v1012_v50 = vpop.eup %1011 }
 0x8c0   :  { %736 = vrot.lane.b32.xlu0 %v1012_v50, %s1027_s2 }
 0x8c8   :  { %752 = vrot.lane.b32.xlu0 %v1146_v22, %s1026_s3 }
 0x8d0   :  { %839 = vrot.lane.b32.xlu0 %v1298_v55, %s1028_s21 }
 0x932   :  { %v737_v53 = vpop.permute.xlu0 %736 }
 0x933   :  { %v739_v57 = vmul.f32 %v737_v53, %v734_v52  ;;  %v849_v52 = vsel %vm180_vm1, %v1358_v0, %v1122_v16 }
 0x935   :  { %v741_v2 = vadd.f32 %v740_v54, %v739_v57 }
 0x937   :  { %743 = vrot.lane.b32.xlu1 %v741_v2, %s1027_s2 }
 0x93a   :  { %v753_v1 = vpop.permute.xlu0 %752 }
 0x93b   :  { %v757_v6 = vsel %vm184_vm3, %v756_v5, %v753_v1 }
 0x942   :  { %v840_v22 = vpop.permute.xlu0 %839 }
 0x943   :  { %v847_v12 = vsel %vm182_vm2, %v846_v11, %v840_v22 }
 0x9a9   :  { %v744_v3 = vpop.permute.xlu1 %743 }
 0x9aa   :  { %746 = vst.msk [vmem:[%s1629_s5 + $0x28] sm:$0xff] %vm180_vm1, %v744_v3  ;;  %966 = vmatmul.msk.f32.vlgmr.msra.gmra.mxu0 %vm182_vm2, %v744_v3  ;;  %967 = vmatmul.msk.f32.vlgmr.msra.gmra.mxu1 %vm182_vm2, %v744_v3 }
 0x9ab   :  { %747 = vst.msk [vmem:[%s1629_s5 + $0x10] sm:$0xff] %vm267_vm8, %v744_v3 }
 0xa27   :  { %v778_v46 = vpop.f32.mrf.mxu0  ;;  %v798_v30 = vpop.f32.mrf.mxu1 }
 0xa28   :  { %v801_v18 = vadd.f32 %v778_v46, %v757_v6  ;;  %v821_v42 = vadd.f32 %v1367_v13, %v798_v30 }
 0xa2a   :  { %v968_v21 = vmul.f32 -1.442695, %v801_v18 }
 0xa2c   :  { %1013 = vpow2.f32 %v968_v21 }
 0xa32   :  { %v1014_v62 = vpop.eup %1013 }
 0xa33   :  { %v805_v23 = vadd.f32 1.0, %v1014_v62 }
 0xa35   :  { %1015 = vrcp.f32 %v805_v23  ;;  %v817_v28 = vand.u32 2147483648, %v805_v23  ;;  %v815_v40 = vand.u32 2147483647, %v805_v23  ;;  %vm811_vm5 = vweird.f32 %v805_v23 }
 0xa37   :  { %v818_v37 = vor.u32 1.1754944e-38, %v817_v28  ;;  %vm816_vm7 = vcmp.eq.f32.partialorder %v815_v40, 8.507059e+37 }
 0xa3b   :  { %v1016_v24 = vpop.eup %1015 }
 0xa3c   :  { %v807_v25 = vmul.f32 %v1016_v24, %v805_v23  ;;  %vm812_vm4 = vweird.f32 %v1016_v24 }
 0xa3d   :  { %vm813_vm6 = vmor %vm811_vm5, %vm812_vm4 }
 0xa3e   :  { %v808_v35 = vsub.f32 1.0, %v807_v25 }
 0xa40   :  { %v809_v36 = vmul.f32 %v1016_v24, %v808_v35 }
 0xa42   :  { %v810_v59 = vadd.f32 %v1016_v24, %v809_v36 }
 0xa44   :  { %v814_v41 = vsel %vm813_vm6, %v1016_v24, %v810_v59 }
 0xa45   :  { %v819_v43 = vsel %vm816_vm7, %v818_v37, %v814_v41 }
 0xa46   :  { %v822_v47 = vmul.f32 %v821_v42, %v819_v43  ;;  %v825_v17 = vsub.f32 1.0, %v819_v43  ;;  %v831_v63 = vmul.f32 %v819_v43, %v741_v2 }
 0xa48   :  { %v823_v4 = vadd.f32 %v822_v47, %v758_v48 }
 0xa4a   :  { %1017 = vtanh.f32 %v823_v4 }
 0xa50   :  { %v1018_v34 = vpop.eup %1017 }
 0xa51   :  { %827 = vrot.lane.b32.xlu1 %v1018_v34, %s1027_s2 }
 0xa59   :  { %843 = vrot.lane.b32.xlu1 %v1122_v16, %s1026_s3 }
 0xac3   :  { %v828_v7 = vpop.permute.xlu1 %827 }
 0xac4   :  { %v830_v8 = vmul.f32 %v828_v7, %v825_v17 }
 0xac6   :  { %v832_v9 = vadd.f32 %v831_v63, %v830_v8 }
 0xac8   :  { %834 = vrot.lane.b32.xlu2 %v832_v9, %s1027_s2 }
 0xacb   :  { %v844_v56 = vpop.permute.xlu1 %843 }
 0xacc   :  { %v848_v14 = vsel %vm184_vm3, %v847_v12, %v844_v56 }
 0xb22   :  { %v835_v10 = vpop.permute.xlu2 %834 }
 0xb23   :  { %837 = vst.msk [vmem:[%s1629_s5 + $0x30] sm:$0xff] %vm180_vm1, %v835_v10  ;;  %969 = vmatmul.msk.f32.vlgmr.msrb.gmra.mxu2 %vm182_vm2, %v835_v10  ;;  %970 = vmatmul.msk.f32.vlgmr.msrb.gmra.mxu3 %vm182_vm2, %v835_v10 }
 0xb24   :  { %838 = vst.msk [vmem:[%s1629_s5 + $0x8] sm:$0xff] %vm267_vm8, %v835_v10 }
 0xba6   :  { %v869_v15 = vpop.f32.mrf.mxu2  ;;  %v889_v61 = vpop.f32.mrf.mxu3 }
 0xba7   :  { %v892_v19 = vadd.f32 %v869_v15, %v848_v14  ;;  %v912_v45 = vadd.f32 %v1367_v13, %v889_v61 }
 0xba9   :  { %v971_v20 = vmul.f32 -1.442695, %v892_v19 }
 0xbab   :  { %1019 = vpow2.f32 %v971_v20 }
 0xbb1   :  { %v1020_v26 = vpop.eup %1019 }
 0xbb2   :  { %v896_v27 = vadd.f32 1.0, %v1020_v26 }
 0xbb4   :  { %1021 = vrcp.f32 %v896_v27  ;;  %v908_v44 = vand.u32 2147483648, %v896_v27  ;;  %v906_v39 = vand.u32 2147483647, %v896_v27  ;;  %vm902_vm10 = vweird.f32 %v896_v27 }
 0xbb6   :  { %v909_v33 = vor.u32 1.1754944e-38, %v908_v44  ;;  %vm907_vm3 = vcmp.eq.f32.partialorder %v906_v39, 8.507059e+37 }
 0xbba   :  { %v1022_v58 = vpop.eup %1021 }
 0xbbb   :  { %v898_v31 = vmul.f32 %v1022_v58, %v896_v27  ;;  %vm903_vm9 = vweird.f32 %v1022_v58 }
 0xbbc   :  { %vm904_vm2 = vmor %vm902_vm10, %vm903_vm9 }
 0xbbd   :  { %v899_v60 = vsub.f32 1.0, %v898_v31 }
 0xbbf   :  { %v900_v32 = vmul.f32 %v1022_v58, %v899_v60 }
 0xbc1   :  { %v901_v55 = vadd.f32 %v1022_v58, %v900_v32 }
 0xbc3   :  { %v905_v38 = vsel %vm904_vm2, %v1022_v58, %v901_v55 }
 0xbc4   :  { %v910_v49 = vsel %vm907_vm3, %v909_v33, %v905_v38 }
 0xbc5   :  { %v913_v50 = vmul.f32 %v912_v45, %v910_v49  ;;  %v916_v57 = vsub.f32 1.0, %v910_v49  ;;  %v922_v3 = vmul.f32 %v910_v49, %v832_v9 }
 0xbc7   :  { %v914_v53 = vadd.f32 %v913_v50, %v849_v52 }
 0xbc9   :  { %1023 = vtanh.f32 %v914_v53 }
 0xbcf   :  { %v1024_v54 = vpop.eup %1023 }
 0xbd0   :  { %918 = vrot.lane.b32.xlu2 %v1024_v54, %s1027_s2 }
 0xc2a   :  { %v919_v2 = vpop.permute.xlu2 %918 }
 0xc2b   :  { %v921_v29 = vmul.f32 %v919_v2, %v916_v57 }
 0xc2d   :  { %v923_v1 = vadd.f32 %v922_v3, %v921_v29 }
 0xc2f   :  { %925 = vrot.lane.b32.xlu0 %v923_v1, %s1027_s2 }
 0xca1   :  { %v926_v51 = vpop.permute.xlu0 %925 }
 0xca2   :  { %928 = vst.msk [vmem:[%s1629_s5 + $0x38] sm:$0xff] %vm180_vm1, %v926_v51 }
 0xca3   :  { %929 = vst.msk [vmem:[%s1629_s5] sm:$0xff] %vm267_vm8, %v926_v51 }

// kernel: encoder_forward.3
= control target key start
LH: loop header
LB: loop body
LE: loop exit
PB: predicated region body
PF: predicated region fallthrough
CT: control target
= control target key end

     0   :  { %vm58_vm0 = vcmask 523264   ;;  %v1088_v43 = vmov 0.0   ;;  %s1090_s15 = smov 64   ;;  %s1091_s16 = smov 32   ;;  %vm200_vm1 = vcmask 261120   ;;  %vm203_vm2 = vcmask 785408   ;;  %s1770_s1 = inlined_call_operand.vmem [shape: f32[64,192], index: 1, kind: input, shape index: {}]   ;;  %s1771_s0 = inlined_call_operand.vmem [shape: f32[64,64], index: 0, kind: input, shape index: {}]   ;;  %s1772_s2 = inlined_call_operand.vmem [shape: f32[1,192], index: 2, kind: input, shape index: {}]   ;;  %s1773_s3 = inlined_call_operand.vmem [shape: f32[64,192], index: 3, kind: input, shape index: {}]   ;;  %s1774_s4 = inlined_call_operand.vmem [shape: f32[1,64], index: 4, kind: input, shape index: {}]   ;;  %s1775_s7 = inlined_call_operand.vmem [shape: f32[64,64], index: 7, kind: output, shape index: {0}]   ;;  %s1776_s5 = inlined_call_operand.vmem [shape: f32[64,32], index: 5, kind: input, shape index: {}]   ;;  %s1777_s6 = inlined_call_operand.vmem [shape: f32[1,32], index: 6, kind: input, shape index: {}]   ;;  %s1778_s8 = inlined_call_operand.vmem [shape: f32[8,32], index: 8, kind: output, shape index: {1}]  }
   0x1   :  { %v50_v0 = vld [vmem:[%s1770_s1 + $0x70] sm:$0xff]  ;;  %v51_v1 = vld [vmem:[%s1770_s1 + $0x78] sm:$0xff]  ;;  %v48_v2 = vld [vmem:[%s1770_s1 + $0x60] sm:$0xff]  ;;  %vm286_vm7 = vcmask 523520  }
   0x2   :  { %91 = vmatpush.msra.mxu0 %v50_v0  ;;  %132 = vmatpush.msra.mxu1 %v51_v1  ;;  %v49_v3 = vld [vmem:[%s1770_s1 + $0x68] sm:$0xff]  ;;  %v46_v4 = vld [vmem:[%s1770_s1 + $0x50] sm:$0xff]  ;;  %v47_v5 = vld [vmem:[%s1770_s1 + $0x58] sm:$0xff] }
   0x3   :  { %v44_v6 = vld [vmem:[%s1770_s1 + $0x40] sm:$0xff]  ;;  %v45_v7 = vld [vmem:[%s1770_s1 + $0x48] sm:$0xff]  ;;  %v42_v8 = vld [vmem:[%s1770_s1 + $0x30] sm:$0xff] }
   0x4   :  { %92 = vmatpush.msra.mxu0 %v48_v2  ;;  %133 = vmatpush.msra.mxu1 %v49_v3  ;;  %v43_v9 = vld [vmem:[%s1770_s1 + $0x38] sm:$0xff]  ;;  %v40_v10 = vld [vmem:[%s1770_s1 + $0x20] sm:$0xff]  ;;  %v41_v11 = vld [vmem:[%s1770_s1 + $0x28] sm:$0xff] }
   0x5   :  { %v38_v12 = vld [vmem:[%s1770_s1 + $0x10] sm:$0xff]  ;;  %v39_v13 = vld [vmem:[%s1770_s1 + $0x18] sm:$0xff]  ;;  %v36_v14 = vld [vmem:[%s1770_s1] sm:$0xff] }
   0x6   :  { %93 = vmatpush.msra.mxu0 %v46_v4  ;;  %134 = vmatpush.msra.mxu1 %v47_v5  ;;  %v37_v15 = vld [vmem:[%s1770_s1 + $0x8] sm:$0xff]  ;;  %v28_v16 = vld [vmem:[%s1771_s0] sm:$0xff]  ;;  %v30_v18 = vld [vmem:[%s1771_s0 + $0x10] sm:$0xff] }
   0x7   :  { %v29_v17 = vld [vmem:[%s1771_s0 + $0x8] sm:$0xff]  ;;  %v31_v19 = vld [vmem:[%s1771_s0 + $0x18] sm:$0xff]  ;;  %v32_v20 = vld [vmem:[%s1771_s0 + $0x20] sm:$0xff] }
   0x8   :  { %94 = vmatpush.msra.mxu0 %v44_v6  ;;  %135 = vmatpush.msra.mxu1 %v45_v7  ;;  %v33_v21 = vld [vmem:[%s1771_s0 + $0x28] sm:$0xff]  ;;  %v34_v22 = vld [vmem:[%s1771_s0 + $0x30] sm:$0xff]  ;;  %v35_v23 = vld [vmem:[%s1771_s0 + $0x38] sm:$0xff] }
   0x9   :  { %v1228_v24 = vld [vmem:[%s1772_s2] sm:$0x3]  ;;  %v1241_v29 = vld [vmem:[%s1773_s3 + $0x70] sm:$0xff]  ;;  %v1319_v47 = vld [vmem:[%s1773_s3 + $0x78] sm:$0xff] }
   0xa   :  { %95 = vmatpush.msra.mxu0 %v42_v8  ;;  %136 = vmatpush.msra.mxu1 %v43_v9  ;;  %v1231_v25 = vperm.slane %v1228_v24, 1  ;;  %v1246_v30 = vld [vmem:[%s1773_s3 + $0x60] sm:$0xff]  ;;  %v1257_v33 = vld [vmem:[%s1773_s3 + $0x50] sm:$0xff]  ;;  %v1324_v48 = vld [vmem:[%s1773_s3 + $0x68] sm:$0xff]  ;;  %v54_v0 = vperm.slane %v1228_v24, 0 }
   0xb   :  { %217 = vmatpush.msra.mxu2 %v1241_v29  ;;  %v1266_v35 = vld [vmem:[%s1773_s3 + $0x40] sm:$0xff]  ;;  %v1272_v36 = vld [vmem:[%s1773_s3 + $0x30] sm:$0xff]  ;;  %237 = vmatpush.msra.mxu3 %v1319_v47  ;;  %v1345_v52 = vld [vmem:[%s1773_s3 + $0x58] sm:$0xff] }
   0xc   :  { %96 = vmatpush.msra.mxu0 %v40_v10  ;;  %137 = vmatpush.msra.mxu1 %v41_v11  ;;  %v1279_v37 = vld [vmem:[%s1773_s3 + $0x20] sm:$0xff]  ;;  %v1290_v40 = vld [vmem:[%s1773_s3 + $0x10] sm:$0xff]  ;;  %v1350_v53 = vld [vmem:[%s1773_s3 + $0x48] sm:$0xff] }
   0xd   :  { %218 = vmatpush.msra.mxu2 %v1246_v30  ;;  %v1299_v42 = vld [vmem:[%s1773_s3] sm:$0xff]  ;;  %238 = vmatpush.msra.mxu3 %v1324_v48  ;;  %v1359_v54 = vld [vmem:[%s1773_s3 + $0x38] sm:$0xff]  ;;  %v1367_v55 = vld [vmem:[%s1773_s3 + $0x28] sm:$0xff] }
   0xe   :  { %97 = vmatpush.msra.mxu0 %v38_v12  ;;  %138 = vmatpush.msra.mxu1 %v39_v13  ;;  %v1383_v59 = vld [vmem:[%s1773_s3 + $0x18] sm:$0xff]  ;;  %v1388_v60 = vld [vmem:[%s1773_s3 + $0x8] sm:$0xff]  ;;  %s1089_s3 = smov 96  }
   0xf   :  { %219 = vmatpush.msra.mxu2 %v1257_v33  ;;  %239 = vmatpush.msra.mxu3 %v1345_v52 }
  0x10   :  { %98 = vmatpush.msra.mxu0 %v36_v14  ;;  %139 = vmatpush.msra.mxu1 %v37_v15 }
  0x11   :  { %993 = vmatmul.msk.f32.vlgmr.msra.gmra.mxu0 %vm58_vm0, %v28_v16  ;;  %1001 = vmatmul.msk.f32.vlgmr.msra.gmra.mxu1 %vm58_vm0, %v28_v16 }
  0x12   :  { %606 = vmatpush.msrb.mxu0 %v1241_v29  ;;  %220 = vmatpush.msra.mxu2 %v1266_v35 }
  0x13   :  { %626 = vmatpush.msrb.mxu1 %v1319_v47  ;;  %240 = vmatpush.msra.mxu3 %v1350_v53 }
  0x14   :  { %607 = vmatpush.msrb.mxu0 %v1246_v30  ;;  %221 = vmatpush.msra.mxu2 %v1272_v36 }
  0x15   :  { %627 = vmatpush.msrb.mxu1 %v1324_v48  ;;  %241 = vmatpush.msra.mxu3 %v1359_v54 }
  0x16   :  { %608 = vmatpush.msrb.mxu0 %v1257_v33  ;;  %222 = vmatpush.msra.mxu2 %v1279_v37 }
  0x17   :  { %628 = vmatpush.msrb.mxu1 %v1345_v52  ;;  %242 = vmatpush.msra.mxu3 %v1367_v55 }
  0x18   :  { %609 = vmatpush.msrb.mxu0 %v1266_v35  ;;  %223 = vmatpush.msra.mxu2 %v1290_v40 }
  0x19   :  { %994 = vmatmul.msk.f32.gmra.mxu0 %vm58_vm0, %v29_v17  ;;  %1002 = vmatmul.msk.f32.gmra.mxu1 %vm58_vm0, %v29_v17 }
  0x1a   :  { %610 = vmatpush.msrb.mxu0 %v1272_v36  ;;  %224 = vmatpush.msra.mxu2 %v1299_v42 }
  0x1b   :  { %225 = vmatmul.f32.vlgmr.msra.gmra.mxu2 %v1088_v43  ;;  %629 = vmatpush.msrb.mxu1 %v1350_v53 }
  0x1c   :  { %611 = vmatpush.msrb.mxu0 %v1279_v37  ;;  %317 = vmatpush.msrb.mxu2 %v1241_v29 }
  0x1d   :  { %630 = vmatpush.msrb.mxu1 %v1359_v54  ;;  %243 = vmatpush.msra.mxu3 %v1383_v59 }
  0x1e   :  { %612 = vmatpush.msrb.mxu0 %v1290_v40  ;;  %318 = vmatpush.msrb.mxu2 %v1246_v30 }
  0x1f   :  { %631 = vmatpush.msrb.mxu1 %v1367_v55  ;;  %244 = vmatpush.msra.mxu3 %v1388_v60 }
  0x20   :  { %613 = vmatpush.msrb.mxu0 %v1299_v42  ;;  %319 = vmatpush.msrb.mxu2 %v1257_v33 }
  0x21   :  { %995 = vmatmul.msk.f32.gmra.mxu0 %vm58_vm0, %v30_v18  ;;  %1003 = vmatmul.msk.f32.gmra.mxu1 %vm58_vm0, %v30_v18 }
  0x22   :  { %788 = vmatpush.msra.mxu0 %v1241_v29  ;;  %320 = vmatpush.msrb.mxu2 %v1266_v35 }
  0x23   :  { %632 = vmatpush.msrb.mxu1 %v1383_v59  ;;  %245 = vmatmul.f32.vlgmr.msra.gmra.mxu3 %v1088_v43 }
  0x24   :  { %789 = vmatpush.msra.mxu0 %v1246_v30  ;;  %321 = vmatpush.msrb.mxu2 %v1272_v36 }
  0x25   :  { %633 = vmatpush.msrb.mxu1 %v1388_v60  ;;  %337 = vmatpush.msrb.mxu3 %v1319_v47 }
  0x26   :  { %790 = vmatpush.msra.mxu0 %v1257_v33  ;;  %322 = vmatpush.msrb.mxu2 %v1279_v37 }
  0x27   :  { %808 = vmatpush.msra.mxu1 %v1319_v47  ;;  %338 = vmatpush.msrb.mxu3 %v1324_v48 }
  0x28   :  { %791 = vmatpush.msra.mxu0 %v1266_v35  ;;  %323 = vmatpush.msrb.mxu2 %v1290_v40 }
  0x29   :  { %996 = vmatmul.msk.f32.gmra.mxu0 %vm58_vm0, %v31_v19  ;;  %1004 = vmatmul.msk.f32.gmra.mxu1 %vm58_vm0, %v31_v19 }
  0x2a   :  { %792 = vmatpush.msra.mxu0 %v1272_v36  ;;  %324 = vmatpush.msrb.mxu2 %v1299_v42 }
  0x2b   :  { %809 = vmatpush.msra.mxu1 %v1324_v48  ;;  %339 = vmatpush.msrb.mxu3 %v1345_v52 }
  0x2c   :  { %793 = vmatpush.msra.mxu0 %v1279_v37  ;;  %416 = vmatpush.msra.mxu2 %v1241_v29 }
  0x2d   :  { %810 = vmatpush.msra.mxu1 %v1345_v52  ;;  %340 = vmatpush.msrb.mxu3 %v1350_v53 }
  0x2e   :  { %794 = vmatpush.msra.mxu0 %v1290_v40  ;;  %417 = vmatpush.msra.mxu2 %v1246_v30 }
  0x2f   :  { %811 = vmatpush.msra.mxu1 %v1350_v53  ;;  %341 = vmatpush.msrb.mxu3 %v1359_v54 }
  0x30   :  { %795 = vmatpush.msra.mxu0 %v1299_v42  ;;  %418 = vmatpush.msra.mxu2 %v1257_v33 }
  0x31   :  { %997 = vmatmul.msk.f32.gmra.mxu0 %vm58_vm0, %v32_v20  ;;  %1005 = vmatmul.msk.f32.gmra.mxu1 %vm58_vm0, %v32_v20 }
  0x32   :  { %419 = vmatpush.msra.mxu2 %v1266_v35  ;;  %812 = vmatpush.msra.mxu1 %v1359_v54 }
  0x33   :  { %342 = vmatpush.msrb.mxu3 %v1367_v55 }
  0x34   :  { %420 = vmatpush.msra.mxu2 %v1272_v36  ;;  %813 = vmatpush.msra.mxu1 %v1367_v55 }
  0x35   :  { %343 = vmatpush.msrb.mxu3 %v1383_v59 }
  0x36   :  { %421 = vmatpush.msra.mxu2 %v1279_v37  ;;  %814 = vmatpush.msra.mxu1 %v1383_v59 }
  0x37   :  { %344 = vmatpush.msrb.mxu3 %v1388_v60 }
  0x38   :  { %422 = vmatpush.msra.mxu2 %v1290_v40  ;;  %815 = vmatpush.msra.mxu1 %v1388_v60 }
  0x39   :  { %998 = vmatmul.msk.f32.gmra.mxu0 %vm58_vm0, %v33_v21  ;;  %1006 = vmatmul.msk.f32.gmra.mxu1 %vm58_vm0, %v33_v21 }
  0x3a   :  { %423 = vmatpush.msra.mxu2 %v1299_v42  ;;  %436 = vmatpush.msra.mxu3 %v1319_v47 }
  0x3c   :  { %437 = vmatpush.msra.mxu3 %v1324_v48 }
  0x3e   :  { %438 = vmatpush.msra.mxu3 %v1345_v52 }
  0x40   :  { %439 = vmatpush.msra.mxu3 %v1350_v53 }
  0x41   :  { %999 = vmatmul.msk.f32.gmra.mxu0 %vm58_vm0, %v34_v22  ;;  %1007 = vmatmul.msk.f32.gmra.mxu1 %vm58_vm0, %v34_v22 }
  0x42   :  { %440 = vmatpush.msra.mxu3 %v1359_v54 }
  0x44   :  { %441 = vmatpush.msra.mxu3 %v1367_v55 }
  0x46   :  { %442 = vmatpush.msra.mxu3 %v1383_v59 }
  0x48   :  { %443 = vmatpush.msra.mxu3 %v1388_v60 }
  0x49   :  { %1000 = vmatmul.msk.f32.gmra.mxu0 %vm58_vm0, %v35_v23  ;;  %1008 = vmatmul.msk.f32.gmra.mxu1 %vm58_vm0, %v35_v23 }
  0x8e   :  { %v1233_v26 = vpop.f32.mrf.mxu0  ;;  %v141_v27 = vpop.f32.mrf.mxu1 }
  0x8f   :  { %v1236_v28 = vadd.f32 %v141_v27, %v1231_v25  ;;  %v101_v5 = vadd.f32 %v1233_v26, %v54_v0 }
  0x96   :  { %v1252_v31 = vpop.f32.mrf.mxu0  ;;  %v144_v32 = vpop.f32.mrf.mxu1 }
  0x97   :  { %v1260_v34 = vadd.f32 %v144_v32, %v1231_v25  ;;  %v1437_v6 = vadd.f32 %v1252_v31, %v54_v0 }
  0x9e   :  { %v1285_v38 = vpop.f32.mrf.mxu0  ;;  %v147_v39 = vpop.f32.mrf.mxu1 }
  0x9f   :  { %v1293_v41 = vadd.f32 %v147_v39, %v1231_v25  ;;  %v1456_v9 = vadd.f32 %v1285_v38, %v54_v0  ;;  %v226_v15 = vpop.f32.mrf.mxu2 }
  0xa6   :  { %v1308_v44 = vpop.f32.mrf.mxu0  ;;  %v150_v45 = vpop.f32.mrf.mxu1 }
  0xa7   :  { %v1312_v46 = vadd.f32 %v150_v45, %v1231_v25  ;;  %v1466_v11 = vadd.f32 %v1308_v44, %v54_v0  ;;  %v246_v27 = vpop.f32.mrf.mxu3 }
  0xae   :  { %v1335_v49 = vpop.f32.mrf.mxu0  ;;  %v153_v50 = vpop.f32.mrf.mxu1 }
  0xaf   :  { %v1338_v51 = vadd.f32 %v153_v50, %v1231_v25  ;;  %v1461_v10 = vadd.f32 %v1335_v49, %v54_v0 }
  0xb6   :  { %v1370_v56 = vpop.f32.mrf.mxu0  ;;  %v156_v57 = vpop.f32.mrf.mxu1 }
  0xb7   :  { %v1375_v58 = vadd.f32 %v156_v57, %v1231_v25  ;;  %v1451_v8 = vadd.f32 %v1370_v56, %v54_v0 }
  0xbe   :  { %v118_v61 = vpop.f32.mrf.mxu0  ;;  %v159_v62 = vpop.f32.mrf.mxu1 }
  0xbf   :  { %v1400_v63 = vadd.f32 %v159_v62, %v1231_v25  ;;  %v1439_v7 = vadd.f32 %v118_v61, %v54_v0 }
  0xc6   :  { %v121_v1 = vpop.f32.mrf.mxu0  ;;  %v162_v2 = vpop.f32.mrf.mxu1 }
  0xc7   :  { %v1412_v3 = vadd.f32 %v121_v1, %v54_v0  ;;  %v1415_v4 = vadd.f32 %v162_v2, %v1231_v25  ;;  %v1481_v25 = vld [vmem:[%s1774_s4] ss:$0 sm:$0xff] }
  0xc8   :  { %v269_v43 = vadd.f32 %v1481_v25, %v246_v27 }
  0xc9   :  { %194 = vrot.lane.b32.xlu1 %v1415_v4, %s1089_s3  ;;  %186 = vrot.lane.b32.xlu0 %v1412_v3, %s1090_s15 }
  0xd1   :  { %197 = vrot.lane.b32.xlu1 %v101_v5, %s1090_s15  ;;  %190 = vrot.lane.b32.xlu0 %v101_v5, %s1091_s16 }
  0xd9   :  { %293 = vrot.lane.b32.xlu1 %v1437_v6, %s1091_s16  ;;  %289 = vrot.lane.b32.xlu0 %v1439_v7, %s1090_s15 }
  0xe1   :  { %300 = vrot.lane.b32.xlu0 %v1437_v6, %s1090_s15 }
  0xe9   :  { %388 = vrot.lane.b32.xlu0 %v1451_v8, %s1090_s15 }
  0xf1   :  { %399 = vrot.lane.b32.xlu0 %v1456_v9, %s1090_s15 }
  0xf9   :  { %487 = vrot.lane.b32.xlu0 %v1461_v10, %s1090_s15 }
 0x101   :  { %498 = vrot.lane.b32.xlu0 %v1466_v11, %s1090_s15 }
 0x109   :  { %585 = vrot.lane.b32.xlu0 %v1461_v10, %s1091_s16 }
 0x13b   :  { %v1472_v12 = vpop.permute.xlu0 %186  ;;  %v195_v16 = vpop.permute.xlu1 %194 }
 0x13c   :  { %v201_v13 = vsel %vm200_vm1, %v101_v5, %v1472_v12 }
 0x143   :  { %v191_v14 = vpop.permute.xlu0 %190  ;;  %v1484_v45 = vpop.permute.xlu1 %197 }
 0x144   :  { %v202_v17 = vsel %vm58_vm0, %v201_v13, %v191_v14  ;;  %v205_v57 = vsel %vm200_vm1, %v1484_v45, %v1415_v4 }
 0x145   :  { %v204_v18 = vsel %vm203_vm2, %v202_v17, %v195_v16 }
 0x146   :  { %v249_v19 = vadd.f32 %v226_v15, %v204_v18 }
 0x148   :  { %v1009_v20 = vmul.f32 -1.442695, %v249_v19 }
 0x14a   :  { %1038 = vpow2.f32 %v1009_v20 }
 0x14b   :  { %v1522_v4 = vpop.permute.xlu0 %289  ;;  %v294_v15 = vpop.permute.xlu1 %293 }
 0x14c   :  { %v303_v16 = vsel %vm200_vm1, %v1437_v6, %v1522_v4 }
 0x14d   :  { %v304_v18 = vsel %vm58_vm0, %v303_v16, %v294_v15 }
 0x150   :  { %v1039_v21 = vpop.eup %1038 }
 0x151   :  { %v253_v22 = vadd.f32 1.0, %v1039_v21 }
 0x153   :  { %1040 = vrcp.f32 %v253_v22  ;;  %v265_v31 = vand.u32 2147483648, %v253_v22  ;;  %v263_v38 = vand.u32 2147483647, %v253_v22  ;;  %vm259_vm4 = vweird.f32 %v253_v22 }
 0x155   :  { %v266_v44 = vor.u32 1.1754944e-38, %v265_v31  ;;  %vm264_vm6 = vcmp.eq.f32.partialorder %v263_v38, 8.507059e+37 }
 0x159   :  { %v1041_v23 = vpop.eup %1040 }
 0x15a   :  { %v255_v24 = vmul.f32 %v1041_v23, %v253_v22  ;;  %vm260_vm3 = vweird.f32 %v1041_v23 }
 0x15b   :  { %vm261_vm5 = vmor %vm259_vm4, %vm260_vm3 }
 0x15c   :  { %v256_v26 = vsub.f32 1.0, %v255_v24 }
 0x15e   :  { %v257_v32 = vmul.f32 %v1041_v23, %v256_v26 }
 0x160   :  { %v258_v39 = vadd.f32 %v1041_v23, %v257_v32 }
 0x162   :  { %v262_v49 = vsel %vm261_vm5, %v1041_v23, %v258_v39 }
 0x163   :  { %v267_v50 = vsel %vm264_vm6, %v266_v44, %v262_v49  ;;  %v1529_v49 = vpop.permute.xlu0 %300 }
 0x164   :  { %v270_v56 = vmul.f32 %v269_v43, %v267_v50  ;;  %v273_v0 = vsub.f32 1.0, %v267_v50  ;;  %v279_v2 = vmul.f32 0.0, %v267_v50 }
 0x166   :  { %v271_v61 = vadd.f32 %v270_v56, %v205_v57 }
 0x168   :  { %1042 = vtanh.f32 %v271_v61 }
 0x16e   :  { %v1043_v62 = vpop.eup %1042 }
 0x16f   :  { %275 = vrot.lane.b32.xlu2 %v1043_v62, %s1090_s15  ;;  %v306_v62 = vsel %vm200_vm1, %v1529_v49, %v1400_v63 }
 0x1c9   :  { %v276_v1 = vpop.permute.xlu2 %275 }
 0x1ca   :  { %v278_v5 = vmul.f32 %v276_v1, %v273_v0 }
 0x1cc   :  { %v1490_v13 = vadd.f32 %v279_v2, %v278_v5 }
 0x1ce   :  { %282 = vrot.lane.b32.xlu2 %v1490_v13, %s1090_s15 }
 0x1d6   :  { %297 = vrot.lane.b32.xlu2 %v1400_v63, %s1089_s3 }
 0x228   :  { %v283_v14 = vpop.permute.xlu2 %282 }
 0x229   :  { %285 = vst.msk [vmem:[%s1775_s7] sm:$0xff] %vm200_vm1, %v283_v14  ;;  %1010 = vmatmul.msk.f32.vlgmr.msrb.gmra.mxu2 %vm58_vm0, %v283_v14  ;;  %1011 = vmatmul.msk.f32.vlgmr.msrb.gmra.mxu3 %vm58_vm0, %v283_v14 }
 0x22a   :  { %287 = vst.msk [vmem:[%s1775_s7 + $0x38] sm:$0xff] %vm286_vm7, %v283_v14  ;;  %515 = vmatpush.msrb.mxu2 %v1241_v29  ;;  %535 = vmatpush.msrb.mxu3 %v1319_v47 }
 0x22c   :  { %516 = vmatpush.msrb.mxu2 %v1246_v30  ;;  %536 = vmatpush.msrb.mxu3 %v1324_v48 }
 0x22e   :  { %517 = vmatpush.msrb.mxu2 %v1257_v33  ;;  %537 = vmatpush.msrb.mxu3 %v1345_v52 }
 0x230   :  { %518 = vmatpush.msrb.mxu2 %v1266_v35  ;;  %538 = vmatpush.msrb.mxu3 %v1350_v53  ;;  %v298_v17 = vpop.permute.xlu2 %297 }
 0x231   :  { %v305_v19 = vsel %vm203_vm2, %v304_v18, %v298_v17 }
 0x232   :  { %519 = vmatpush.msrb.mxu2 %v1272_v36  ;;  %539 = vmatpush.msrb.mxu3 %v1359_v54 }
 0x234   :  { %520 = vmatpush.msrb.mxu2 %v1279_v37  ;;  %540 = vmatpush.msrb.mxu3 %v1367_v55 }
 0x236   :  { %521 = vmatpush.msrb.mxu2 %v1290_v40  ;;  %541 = vmatpush.msrb.mxu3 %v1383_v59 }
 0x238   :  { %522 = vmatpush.msrb.mxu2 %v1299_v42  ;;  %542 = vmatpush.msrb.mxu3 %v1388_v60 }
 0x2ac   :  { %v326_v20 = vpop.f32.mrf.mxu2  ;;  %v346_v6 = vpop.f32.mrf.mxu3 }
 0x2ad   :  { %v349_v21 = vadd.f32 %v326_v20, %v305_v19  ;;  %v369_v56 = vadd.f32 %v1481_v25, %v346_v6 }
 0x2af   :  { %v1012_v22 = vmul.f32 -1.442695, %v349_v21 }
 0x2b1   :  { %1044 = vpow2.f32 %v1012_v22 }
 0x2b7   :  { %v1045_v23 = vpop.eup %1044 }
 0x2b8   :  { %v353_v24 = vadd.f32 1.0, %v1045_v23 }
 0x2ba   :  { %1046 = vrcp.f32 %v353_v24  ;;  %v365_v32 = vand.u32 2147483648, %v353_v24  ;;  %v363_v39 = vand.u32 2147483647, %v353_v24  ;;  %vm359_vm9 = vweird.f32 %v353_v24 }
 0x2bc   :  { %v366_v44 = vor.u32 1.1754944e-38, %v365_v32  ;;  %vm364_vm11 = vcmp.eq.f32.partialorder %v363_v39, 8.507059e+37 }
 0x2c0   :  { %v1047_v26 = vpop.eup %1046 }
 0x2c1   :  { %v355_v27 = vmul.f32 %v1047_v26, %v353_v24  ;;  %vm360_vm8 = vweird.f32 %v1047_v26 }
 0x2c2   :  { %vm361_vm10 = vmor %vm359_vm9, %vm360_vm8 }
 0x2c3   :  { %v356_v31 = vsub.f32 1.0, %v355_v27 }
 0x2c5   :  { %v357_v38 = vmul.f32 %v1047_v26, %v356_v31 }
 0x2c7   :  { %v358_v43 = vadd.f32 %v1047_v26, %v357_v38 }
 0x2c9   :  { %v362_v50 = vsel %vm361_vm10, %v1047_v26, %v358_v43 }
 0x2ca   :  { %v367_v57 = vsel %vm364_vm11, %v366_v44, %v362_v50 }
 0x2cb   :  { %v370_v61 = vmul.f32 %v369_v56, %v367_v57  ;;  %v373_v2 = vsub.f32 1.0, %v367_v57  ;;  %v379_v14 = vmul.f32 %v367_v57, %v1490_v13  ;;  %v1571_v13 = vpop.permute.xlu0 %388 }
 0x2cc   :  { %v402_v19 = vsel %vm200_vm1, %v1456_v9, %v1571_v13 }
 0x2cd   :  { %v371_v0 = vadd.f32 %v370_v61, %v306_v62 }
 0x2cf   :  { %1048 = vtanh.f32 %v371_v0 }
 0x2d3   :  { %v1578_v56 = vpop.permute.xlu0 %399 }
 0x2d5   :  { %v1049_v1 = vpop.eup %1048 }
 0x2d6   :  { %375 = vrot.lane.b32.xlu1 %v1049_v1, %s1090_s15  ;;  %v405_v1 = vsel %vm200_vm1, %v1578_v56, %v1375_v58 }
 0x2de   :  { %392 = vrot.lane.b32.xlu1 %v1456_v9, %s1091_s16 }
 0x348   :  { %v376_v5 = vpop.permute.xlu1 %375 }
 0x349   :  { %v378_v15 = vmul.f32 %v376_v5, %v373_v2 }
 0x34b   :  { %v1539_v16 = vadd.f32 %v379_v14, %v378_v15 }
 0x34d   :  { %382 = vrot.lane.b32.xlu2 %v1539_v16, %s1090_s15 }
 0x350   :  { %v393_v17 = vpop.permute.xlu1 %392 }
 0x351   :  { %v403_v20 = vsel %vm58_vm0, %v402_v19, %v393_v17 }
 0x355   :  { %396 = vrot.lane.b32.xlu2 %v1375_v58, %s1089_s3 }
 0x3a7   :  { %v383_v63 = vpop.permute.xlu2 %382 }
 0x3a8   :  { %385 = vst.msk [vmem:[%s1775_s7 + $0x8] sm:$0xff] %vm200_vm1, %v383_v63  ;;  %1013 = vmatmul.msk.f32.vlgmr.msra.gmra.mxu2 %vm58_vm0, %v383_v63  ;;  %1014 = vmatmul.msk.f32.vlgmr.msra.gmra.mxu3 %vm58_vm0, %v383_v63 }
 0x3a9   :  { %386 = vst.msk [vmem:[%s1775_s7 + $0x30] sm:$0xff] %vm286_vm7, %v383_v63  ;;  %697 = vmatpush.msra.mxu2 %v1241_v29  ;;  %717 = vmatpush.msra.mxu3 %v1319_v47 }
 0x3ab   :  { %698 = vmatpush.msra.mxu2 %v1246_v30  ;;  %718 = vmatpush.msra.mxu3 %v1324_v48 }
 0x3ad   :  { %699 = vmatpush.msra.mxu2 %v1257_v33  ;;  %719 = vmatpush.msra.mxu3 %v1345_v52 }
 0x3af   :  { %700 = vmatpush.msra.mxu2 %v1266_v35  ;;  %720 = vmatpush.msra.mxu3 %v1350_v53  ;;  %v397_v18 = vpop.permute.xlu2 %396 }
 0x3b0   :  { %v404_v21 = vsel %vm203_vm2, %v403_v20, %v397_v18 }
 0x3b1   :  { %701 = vmatpush.msra.mxu2 %v1272_v36  ;;  %721 = vmatpush.msra.mxu3 %v1359_v54 }
 0x3b3   :  { %702 = vmatpush.msra.mxu2 %v1279_v37  ;;  %722 = vmatpush.msra.mxu3 %v1367_v55 }
 0x3b5   :  { %703 = vmatpush.msra.mxu2 %v1290_v40  ;;  %723 = vmatpush.msra.mxu3 %v1383_v59 }
 0x3b7   :  { %704 = vmatpush.msra.mxu2 %v1299_v42  ;;  %724 = vmatpush.msra.mxu3 %v1388_v60 }
 0x42b   :  { %v425_v22 = vpop.f32.mrf.mxu2  ;;  %v445_v44 = vpop.f32.mrf.mxu3 }
 0x42c   :  { %v448_v23 = vadd.f32 %v425_v22, %v404_v21  ;;  %v468_v61 = vadd.f32 %v1481_v25, %v445_v44 }
 0x42e   :  { %v1015_v24 = vmul.f32 -1.442695, %v448_v23 }
 0x430   :  { %1050 = vpow2.f32 %v1015_v24 }
 0x436   :  { %v1051_v26 = vpop.eup %1050 }
 0x437   :  { %v452_v27 = vadd.f32 1.0, %v1051_v26 }
 0x439   :  { %1052 = vrcp.f32 %v452_v27  ;;  %v464_v39 = vand.u32 2147483648, %v452_v27  ;;  %v462_v43 = vand.u32 2147483647, %v452_v27  ;;  %vm458_vm13 = vweird.f32 %v452_v27 }
 0x43b   :  { %v465_v50 = vor.u32 1.1754944e-38, %v464_v39  ;;  %vm463_vm15 = vcmp.eq.f32.partialorder %v462_v43, 8.507059e+37 }
 0x43f   :  { %v1053_v31 = vpop.eup %1052 }
 0x440   :  { %v454_v32 = vmul.f32 %v1053_v31, %v452_v27  ;;  %vm459_vm12 = vweird.f32 %v1053_v31 }
 0x441   :  { %vm460_vm14 = vmor %vm458_vm13, %vm459_vm12 }
 0x442   :  { %v455_v38 = vsub.f32 1.0, %v454_v32 }
 0x444   :  { %v456_v6 = vmul.f32 %v1053_v31, %v455_v38 }
 0x446   :  { %v457_v9 = vadd.f32 %v1053_v31, %v456_v6 }
 0x448   :  { %v461_v57 = vsel %vm460_vm14, %v1053_v31, %v457_v9 }
 0x449   :  { %v466_v62 = vsel %vm463_vm15, %v465_v50, %v461_v57 }
 0x44a   :  { %v469_v0 = vmul.f32 %v468_v61, %v466_v62  ;;  %v472_v14 = vsub.f32 1.0, %v466_v62  ;;  %v478_v63 = vmul.f32 %v466_v62, %v1539_v16 }
 0x44c   :  { %v470_v2 = vadd.f32 %v469_v0, %v405_v1 }
 0x44e   :  { %1054 = vtanh.f32 %v470_v2 }
 0x454   :  { %v1055_v5 = vpop.eup %1054 }
 0x455   :  { %474 = vrot.lane.b32.xlu1 %v1055_v5, %s1090_s15 }
 0x45d   :  { %491 = vrot.lane.b32.xlu1 %v1466_v11, %s1091_s16 }
 0x4c7   :  { %v475_v15 = vpop.permute.xlu1 %474 }
 0x4c8   :  { %v477_v17 = vmul.f32 %v475_v15, %v472_v14 }
 0x4ca   :  { %v1588_v18 = vadd.f32 %v478_v63, %v477_v17 }
 0x4cc   :  { %481 = vrot.lane.b32.xlu2 %v1588_v18, %s1090_s15 }
 0x4d4   :  { %495 = vrot.lane.b32.xlu2 %v1338_v51, %s1089_s3 }
 0x526   :  { %v482_v58 = vpop.permute.xlu2 %481 }
 0x527   :  { %484 = vst.msk [vmem:[%s1775_s7 + $0x10] sm:$0xff] %vm200_vm1, %v482_v58  ;;  %1016 = vmatmul.msk.f32.vlgmr.msrb.gmra.mxu2 %vm58_vm0, %v482_v58  ;;  %1017 = vmatmul.msk.f32.vlgmr.msrb.gmra.mxu3 %vm58_vm0, %v482_v58 }
 0x528   :  { %485 = vst.msk [vmem:[%s1775_s7 + $0x28] sm:$0xff] %vm286_vm7, %v482_v58  ;;  %879 = vmatpush.msrb.mxu2 %v1241_v29  ;;  %899 = vmatpush.msrb.mxu3 %v1319_v47  ;;  %v1620_v29 = vpop.permute.xlu0 %487 }
 0x52a   :  { %880 = vmatpush.msrb.mxu2 %v1246_v30  ;;  %900 = vmatpush.msrb.mxu3 %v1324_v48  ;;  %v492_v30 = vpop.permute.xlu1 %491 }
 0x52c   :  { %881 = vmatpush.msrb.mxu2 %v1257_v33  ;;  %901 = vmatpush.msrb.mxu3 %v1345_v52 }
 0x52e   :  { %882 = vmatpush.msrb.mxu2 %v1266_v35  ;;  %902 = vmatpush.msrb.mxu3 %v1350_v53  ;;  %v496_v33 = vpop.permute.xlu2 %495  ;;  %v501_v35 = vsel %vm200_vm1, %v1466_v11, %v1620_v29 }
 0x530   :  { %883 = vmatpush.msrb.mxu2 %v1272_v36  ;;  %903 = vmatpush.msrb.mxu3 %v1359_v54  ;;  %v502_v36 = vsel %vm58_vm0, %v501_v35, %v492_v30  ;;  %v499_v21 = vpop.permute.xlu0 %498 }
 0x531   :  { %v504_v27 = vsel %vm200_vm1, %v499_v21, %v1338_v51  ;;  %v592_v57 = vsel %vm200_vm1, %v1461_v10, %v499_v21 }
 0x532   :  { %884 = vmatpush.msrb.mxu2 %v1279_v37  ;;  %904 = vmatpush.msrb.mxu3 %v1367_v55  ;;  %v503_v37 = vsel %vm203_vm2, %v502_v36, %v496_v33 }
 0x534   :  { %885 = vmatpush.msrb.mxu2 %v1290_v40  ;;  %905 = vmatpush.msrb.mxu3 %v1383_v59 }
 0x536   :  { %886 = vmatpush.msrb.mxu2 %v1299_v42  ;;  %906 = vmatpush.msrb.mxu3 %v1388_v60 }
 0x538   :  { %v586_v9 = vpop.permute.xlu0 %585 }
 0x539   :  { %v593_v61 = vsel %vm58_vm0, %v592_v57, %v586_v9  ;;  %v686_v57 = vsel %vm200_vm1, %v1571_v13, %v1293_v41 }
 0x5aa   :  { %v524_v47 = vpop.f32.mrf.mxu2  ;;  %v544_v19 = vpop.f32.mrf.mxu3 }
 0x5ab   :  { %v547_v40 = vadd.f32 %v524_v47, %v503_v37  ;;  %v567_v23 = vadd.f32 %v1481_v25, %v544_v19  ;;  %v683_v19 = vsel %vm200_vm1, %v1451_v8, %v1578_v56 }
 0x5ad   :  { %v1018_v48 = vmul.f32 -1.442695, %v547_v40 }
 0x5af   :  { %1056 = vpow2.f32 %v1018_v48  ;;  %v595_v48 = vsel %vm200_vm1, %v1620_v29, %v1312_v46 }
 0x5b5   :  { %v1057_v52 = vpop.eup %1056 }
 0x5b6   :  { %v551_v42 = vadd.f32 1.0, %v1057_v52 }
 0x5b8   :  { %1058 = vrcp.f32 %v551_v42  ;;  %v563_v59 = vand.u32 2147483648, %v551_v42  ;;  %v561_v16 = vand.u32 2147483647, %v551_v42  ;;  %vm557_vm4 = vweird.f32 %v551_v42 }
 0x5ba   :  { %v564_v20 = vor.u32 1.1754944e-38, %v563_v59  ;;  %vm562_vm6 = vcmp.eq.f32.partialorder %v561_v16, 8.507059e+37 }
 0x5be   :  { %v1059_v53 = vpop.eup %1058 }
 0x5bf   :  { %v553_v54 = vmul.f32 %v1059_v53, %v551_v42  ;;  %vm558_vm3 = vweird.f32 %v1059_v53 }
 0x5c0   :  { %vm559_vm5 = vmor %vm557_vm4, %vm558_vm3 }
 0x5c1   :  { %v554_v55 = vsub.f32 1.0, %v553_v54 }
 0x5c3   :  { %v555_v60 = vmul.f32 %v1059_v53, %v554_v55 }
 0x5c5   :  { %v556_v11 = vadd.f32 %v1059_v53, %v555_v60 }
 0x5c7   :  { %v560_v22 = vsel %vm559_vm5, %v1059_v53, %v556_v11 }
 0x5c8   :  { %v565_v24 = vsel %vm562_vm6, %v564_v20, %v560_v22 }
 0x5c9   :  { %v568_v26 = vmul.f32 %v567_v23, %v565_v24  ;;  %v571_v38 = vsub.f32 1.0, %v565_v24  ;;  %v577_v6 = vmul.f32 %v565_v24, %v1588_v18 }
 0x5cb   :  { %v569_v31 = vadd.f32 %v568_v26, %v504_v27 }
 0x5cd   :  { %1060 = vtanh.f32 %v569_v31 }
 0x5d3   :  { %v1061_v32 = vpop.eup %1060 }
 0x5d4   :  { %573 = vrot.lane.b32.xlu1 %v1061_v32, %s1090_s15 }
 0x5dc   :  { %589 = vrot.lane.b32.xlu1 %v1312_v46, %s1089_s3 }
 0x5e4   :  { %676 = vrot.lane.b32.xlu1 %v1451_v8, %s1091_s16 }
 0x646   :  { %v574_v39 = vpop.permute.xlu1 %573 }
 0x647   :  { %v576_v43 = vmul.f32 %v574_v39, %v571_v38 }
 0x649   :  { %v578_v44 = vadd.f32 %v577_v6, %v576_v43 }
 0x64b   :  { %580 = vrot.lane.b32.xlu2 %v578_v44, %s1090_s15 }
 0x64e   :  { %v590_v50 = vpop.permute.xlu1 %589 }
 0x64f   :  { %v594_v62 = vsel %vm203_vm2, %v593_v61, %v590_v50 }
 0x656   :  { %v677_v46 = vpop.permute.xlu1 %676 }
 0x657   :  { %v684_v11 = vsel %vm58_vm0, %v683_v19, %v677_v46 }
 0x6a5   :  { %v581_v51 = vpop.permute.xlu2 %580 }
 0x6a6   :  { %583 = vst.msk [vmem:[%s1775_s7 + $0x18] sm:$0xff] %vm200_vm1, %v581_v51  ;;  %1019 = vmatmul.msk.f32.vlgmr.msrb.gmra.mxu0 %vm58_vm0, %v581_v51  ;;  %1020 = vmatmul.msk.f32.vlgmr.msrb.gmra.mxu1 %vm58_vm0, %v581_v51 }
 0x6a7   :  { %584 = vst.msk [vmem:[%s1775_s7 + $0x20] sm:$0xff] %vm286_vm7, %v581_v51 }
 0x723   :  { %v615_v0 = vpop.f32.mrf.mxu0  ;;  %v635_v33 = vpop.f32.mrf.mxu1 }
 0x724   :  { %v638_v1 = vadd.f32 %v615_v0, %v594_v62  ;;  %v658_v37 = vadd.f32 %v1481_v25, %v635_v33 }
 0x726   :  { %v1021_v2 = vmul.f32 -1.442695, %v638_v1 }
 0x728   :  { %1062 = vpow2.f32 %v1021_v2 }
 0x72e   :  { %v1063_v5 = vpop.eup %1062 }
 0x72f   :  { %v642_v14 = vadd.f32 1.0, %v1063_v5 }
 0x731   :  { %1064 = vrcp.f32 %v642_v14  ;;  %v654_v18 = vand.u32 2147483648, %v642_v14  ;;  %v652_v30 = vand.u32 2147483647, %v642_v14  ;;  %vm648_vm9 = vweird.f32 %v642_v14 }
 0x733   :  { %v655_v35 = vor.u32 1.1754944e-38, %v654_v18  ;;  %vm653_vm11 = vcmp.eq.f32.partialorder %v652_v30, 8.507059e+37 }
 0x737   :  { %v1065_v15 = vpop.eup %1064 }
 0x738   :  { %v644_v63 = vmul.f32 %v1065_v15, %v642_v14  ;;  %vm649_vm8 = vweird.f32 %v1065_v15 }
 0x739   :  { %vm650_vm10 = vmor %vm648_vm9, %vm649_vm8 }
 0x73a   :  { %v645_v17 = vsub.f32 1.0, %v644_v63  ;;  %v774_v63 = vsel %vm200_vm1, %v1439_v7, %v1529_v49 }
 0x73c   :  { %v646_v58 = vmul.f32 %v1065_v15, %v645_v17 }
 0x73e   :  { %v647_v10 = vadd.f32 %v1065_v15, %v646_v58 }
 0x740   :  { %v651_v36 = vsel %vm650_vm10, %v1065_v15, %v647_v10 }
 0x741   :  { %v656_v47 = vsel %vm653_vm11, %v655_v35, %v651_v36 }
 0x742   :  { %v659_v40 = vmul.f32 %v658_v37, %v656_v47  ;;  %v662_v53 = vsub.f32 1.0, %v656_v47  ;;  %v668_v55 = vmul.f32 %v656_v47, %v578_v44 }
 0x744   :  { %v660_v52 = vadd.f32 %v659_v40, %v595_v48 }
 0x746   :  { %1066 = vtanh.f32 %v660_v52 }
 0x74c   :  { %v1067_v42 = vpop.eup %1066 }
 0x74d   :  { %664 = vrot.lane.b32.xlu2 %v1067_v42, %s1090_s15 }
 0x755   :  { %680 = vrot.lane.b32.xlu2 %v1293_v41, %s1089_s3 }
 0x75d   :  { %767 = vrot.lane.b32.xlu2 %v1439_v7, %s1091_s16 }
 0x7a7   :  { %v665_v54 = vpop.permute.xlu2 %664 }
 0x7a8   :  { %v667_v59 = vmul.f32 %v665_v54, %v662_v53 }
 0x7aa   :  { %v669_v60 = vadd.f32 %v668_v55, %v667_v59 }
 0x7ac   :  { %671 = vrot.lane.b32.xlu0 %v669_v60, %s1090_s15 }
 0x7af   :  { %v681_v29 = vpop.permute.xlu2 %680 }
 0x7b0   :  { %v685_v20 = vsel %vm203_vm2, %v684_v11, %v681_v29 }
 0x7b7   :  { %v768_v41 = vpop.permute.xlu2 %767 }
 0x7b8   :  { %v775_v17 = vsel %vm58_vm0, %v774_v63, %v768_v41  ;;  %v950_v41 = vld [vmem:[%s1776_s5 + $0x8] sm:$0xff] }
 0x81e   :  { %v672_v16 = vpop.permute.xlu0 %671 }
 0x81f   :  { %674 = vst.msk [vmem:[%s1775_s7 + $0x20] sm:$0xff] %vm200_vm1, %v672_v16  ;;  %1022 = vmatmul.msk.f32.vlgmr.msra.gmra.mxu2 %vm58_vm0, %v672_v16  ;;  %1023 = vmatmul.msk.f32.vlgmr.msra.gmra.mxu3 %vm58_vm0, %v672_v16 }
 0x820   :  { %675 = vst.msk [vmem:[%s1775_s7 + $0x18] sm:$0xff] %vm286_vm7, %v672_v16 }
 0x8a2   :  { %v706_v21 = vpop.f32.mrf.mxu2  ;;  %v726_v43 = vpop.f32.mrf.mxu3 }
 0x8a3   :  { %v729_v22 = vadd.f32 %v706_v21, %v685_v20  ;;  %v749_v51 = vadd.f32 %v1481_v25, %v726_v43 }
 0x8a5   :  { %v1024_v23 = vmul.f32 -1.442695, %v729_v22 }
 0x8a7   :  { %1068 = vpow2.f32 %v1024_v23  ;;  %v865_v23 = vsel %vm200_vm1, %v1412_v3, %v1484_v45 }
 0x8ad   :  { %v1069_v24 = vpop.eup %1068 }
 0x8ae   :  { %v733_v26 = vadd.f32 1.0, %v1069_v24 }
 0x8b0   :  { %1070 = vrcp.f32 %v733_v26  ;;  %v745_v38 = vand.u32 2147483648, %v733_v26  ;;  %v743_v6 = vand.u32 2147483647, %v733_v26  ;;  %vm739_vm13 = vweird.f32 %v733_v26 }
 0x8b2   :  { %v746_v56 = vor.u32 1.1754944e-38, %v745_v38  ;;  %vm744_vm15 = vcmp.eq.f32.partialorder %v743_v6, 8.507059e+37 }
 0x8b6   :  { %v1071_v27 = vpop.eup %1070 }
 0x8b7   :  { %v735_v31 = vmul.f32 %v1071_v27, %v733_v26  ;;  %vm740_vm12 = vweird.f32 %v1071_v27 }
 0x8b8   :  { %vm741_vm14 = vmor %vm739_vm13, %vm740_vm12 }
 0x8b9   :  { %v736_v32 = vsub.f32 1.0, %v735_v31 }
 0x8bb   :  { %v737_v39 = vmul.f32 %v1071_v27, %v736_v32 }
 0x8bd   :  { %v738_v8 = vadd.f32 %v1071_v27, %v737_v39 }
 0x8bf   :  { %v742_v44 = vsel %vm741_vm14, %v1071_v27, %v738_v8 }
 0x8c0   :  { %v747_v9 = vsel %vm744_vm15, %v746_v56, %v742_v44 }
 0x8c1   :  { %v750_v50 = vmul.f32 %v749_v51, %v747_v9  ;;  %v753_v0 = vsub.f32 1.0, %v747_v9  ;;  %v759_v2 = vmul.f32 %v747_v9, %v669_v60  ;;  %v777_v60 = vsel %vm200_vm1, %v1522_v4, %v1260_v34 }
 0x8c3   :  { %v751_v61 = vadd.f32 %v750_v50, %v686_v57 }
 0x8c5   :  { %1072 = vtanh.f32 %v751_v61 }
 0x8cb   :  { %v1073_v62 = vpop.eup %1072 }
 0x8cc   :  { %755 = vrot.lane.b32.xlu0 %v1073_v62, %s1090_s15 }
 0x8d4   :  { %771 = vrot.lane.b32.xlu0 %v1260_v34, %s1089_s3 }
 0x8dc   :  { %858 = vrot.lane.b32.xlu0 %v1412_v3, %s1091_s16 }
 0x93e   :  { %v756_v1 = vpop.permute.xlu0 %755 }
 0x93f   :  { %v758_v5 = vmul.f32 %v756_v1, %v753_v0  ;;  %v868_v0 = vsel %vm200_vm1, %v1472_v12, %v1236_v28  ;;  %v952_v12 = vld [vmem:[%s1776_s5 + $0x18] sm:$0xff] }
 0x941   :  { %v760_v14 = vadd.f32 %v759_v2, %v758_v5  ;;  %v956_v5 = vld [vmem:[%s1776_s5 + $0x38] sm:$0xff] }
 0x942   :  { %971 = vmatpush.msrb.mxu0 %v956_v5 }
 0x943   :  { %762 = vrot.lane.b32.xlu1 %v760_v14, %s1090_s15 }
 0x946   :  { %v772_v13 = vpop.permute.xlu0 %771 }
 0x947   :  { %v776_v18 = vsel %vm203_vm2, %v775_v17, %v772_v13  ;;  %v949_v13 = vld [vmem:[%s1776_s5] sm:$0xff] }
 0x94e   :  { %v859_v34 = vpop.permute.xlu0 %858 }
 0x94f   :  { %v866_v24 = vsel %vm58_vm0, %v865_v23, %v859_v34 }
 0x9b5   :  { %v763_v15 = vpop.permute.xlu1 %762 }
 0x9b6   :  { %765 = vst.msk [vmem:[%s1775_s7 + $0x28] sm:$0xff] %vm200_vm1, %v763_v15  ;;  %1025 = vmatmul.msk.f32.vlgmr.msra.gmra.mxu0 %vm58_vm0, %v763_v15  ;;  %1026 = vmatmul.msk.f32.vlgmr.msra.gmra.mxu1 %vm58_vm0, %v763_v15 }
 0x9b7   :  { %766 = vst.msk [vmem:[%s1775_s7 + $0x10] sm:$0xff] %vm286_vm7, %v763_v15  ;;  %v951_v15 = vld [vmem:[%s1776_s5 + $0x10] sm:$0xff] }
 0xa33   :  { %v797_v58 = vpop.f32.mrf.mxu0  ;;  %v817_v42 = vpop.f32.mrf.mxu1 }
 0xa34   :  { %v820_v30 = vadd.f32 %v797_v58, %v776_v18  ;;  %v840_v54 = vadd.f32 %v1481_v25, %v817_v42 }
 0xa36   :  { %v1027_v33 = vmul.f32 -1.442695, %v820_v30 }
 0xa38   :  { %1074 = vpow2.f32 %v1027_v33 }
 0xa3e   :  { %v1075_v10 = vpop.eup %1074 }
 0xa3f   :  { %v824_v35 = vadd.f32 1.0, %v1075_v10  ;;  %v1037_v10 = vld [vmem:[%s1777_s6] ss:$0 sm:$0xff] }
 0xa41   :  { %1076 = vrcp.f32 %v824_v35  ;;  %v836_v40 = vand.u32 2147483648, %v824_v35  ;;  %v834_v52 = vand.u32 2147483647, %v824_v35  ;;  %vm830_vm4 = vweird.f32 %v824_v35 }
 0xa43   :  { %v837_v49 = vor.u32 1.1754944e-38, %v836_v40  ;;  %vm835_vm6 = vcmp.eq.f32.partialorder %v834_v52, 8.507059e+37 }
 0xa47   :  { %v1077_v36 = vpop.eup %1076 }
 0xa48   :  { %v826_v37 = vmul.f32 %v1077_v36, %v824_v35  ;;  %vm831_vm3 = vweird.f32 %v1077_v36 }
 0xa49   :  { %vm832_vm5 = vmor %vm830_vm4, %vm831_vm3 }
 0xa4a   :  { %v827_v47 = vsub.f32 1.0, %v826_v37 }
 0xa4c   :  { %v828_v48 = vmul.f32 %v1077_v36, %v827_v47 }
 0xa4e   :  { %v829_v7 = vadd.f32 %v1077_v36, %v828_v48 }
 0xa50   :  { %v833_v53 = vsel %vm832_vm5, %v1077_v36, %v829_v7 }
 0xa51   :  { %v838_v55 = vsel %vm835_vm6, %v837_v49, %v833_v53 }
 0xa52   :  { %v841_v59 = vmul.f32 %v840_v54, %v838_v55  ;;  %v844_v29 = vsub.f32 1.0, %v838_v55  ;;  %v850_v11 = vmul.f32 %v838_v55, %v760_v14  ;;  %v955_v14 = vld [vmem:[%s1776_s5 + $0x30] sm:$0xff] }
 0xa53   :  { %972 = vmatpush.msrb.mxu0 %v955_v14 }
 0xa54   :  { %v842_v16 = vadd.f32 %v841_v59, %v777_v60 }
 0xa56   :  { %1078 = vtanh.f32 %v842_v16 }
 0xa5c   :  { %v1079_v46 = vpop.eup %1078 }
 0xa5d   :  { %846 = vrot.lane.b32.xlu1 %v1079_v46, %s1090_s15 }
 0xa65   :  { %862 = vrot.lane.b32.xlu1 %v1236_v28, %s1089_s3  ;;  %v953_v28 = vld [vmem:[%s1776_s5 + $0x20] sm:$0xff] }
 0xacf   :  { %v847_v19 = vpop.permute.xlu1 %846 }
 0xad0   :  { %v849_v20 = vmul.f32 %v847_v19, %v844_v29 }
 0xad2   :  { %v851_v21 = vadd.f32 %v850_v11, %v849_v20 }
 0xad4   :  { %853 = vrot.lane.b32.xlu2 %v851_v21, %s1090_s15 }
 0xad7   :  { %v863_v4 = vpop.permute.xlu1 %862 }
 0xad8   :  { %v867_v26 = vsel %vm203_vm2, %v866_v24, %v863_v4 }
 0xb2e   :  { %v854_v22 = vpop.permute.xlu2 %853 }
 0xb2f   :  { %856 = vst.msk [vmem:[%s1775_s7 + $0x30] sm:$0xff] %vm200_vm1, %v854_v22  ;;  %1028 = vmatmul.msk.f32.vlgmr.msrb.gmra.mxu2 %vm58_vm0, %v854_v22  ;;  %1029 = vmatmul.msk.f32.vlgmr.msrb.gmra.mxu3 %vm58_vm0, %v854_v22 }
 0xb30   :  { %857 = vst.msk [vmem:[%s1775_s7 + $0x8] sm:$0xff] %vm286_vm7, %v854_v22 }
 0xbb2   :  { %v888_v27 = vpop.f32.mrf.mxu2  ;;  %v908_v9 = vpop.f32.mrf.mxu3 }
 0xbb3   :  { %v911_v31 = vadd.f32 %v888_v27, %v867_v26  ;;  %v931_v57 = vadd.f32 %v1481_v25, %v908_v9  ;;  %v954_v25 = vld [vmem:[%s1776_s5 + $0x28] sm:$0xff] }
 0xbb4   :  { %973 = vmatpush.msrb.mxu0 %v954_v25 }
 0xbb5   :  { %v1030_v32 = vmul.f32 -1.442695, %v911_v31 }
 0xbb6   :  { %974 = vmatpush.msrb.mxu0 %v953_v28 }
 0xbb7   :  { %1080 = vpow2.f32 %v1030_v32 }
 0xbb8   :  { %975 = vmatpush.msrb.mxu0 %v952_v12 }
 0xbba   :  { %976 = vmatpush.msrb.mxu0 %v951_v15 }
 0xbbc   :  { %977 = vmatpush.msrb.mxu0 %v950_v41 }
 0xbbd   :  { %v1081_v38 = vpop.eup %1080 }
 0xbbe   :  { %v915_v39 = vadd.f32 1.0, %v1081_v38  ;;  %978 = vmatpush.msrb.mxu0 %v949_v13 }
 0xbc0   :  { %1082 = vrcp.f32 %v915_v39  ;;  %v927_v56 = vand.u32 2147483648, %v915_v39  ;;  %v925_v51 = vand.u32 2147483647, %v915_v39  ;;  %vm921_vm9 = vweird.f32 %v915_v39 }
 0xbc2   :  { %v928_v45 = vor.u32 1.1754944e-38, %v927_v56  ;;  %vm926_vm2 = vcmp.eq.f32.partialorder %v925_v51, 8.507059e+37 }
 0xbc6   :  { %v1083_v6 = vpop.eup %1082 }
 0xbc7   :  { %v917_v43 = vmul.f32 %v1083_v6, %v915_v39  ;;  %vm922_vm8 = vweird.f32 %v1083_v6 }
 0xbc8   :  { %vm923_vm10 = vmor %vm921_vm9, %vm922_vm8 }
 0xbc9   :  { %v918_v8 = vsub.f32 1.0, %v917_v43 }
 0xbcb   :  { %v919_v44 = vmul.f32 %v1083_v6, %v918_v8 }
 0xbcd   :  { %v920_v3 = vadd.f32 %v1083_v6, %v919_v44 }
 0xbcf   :  { %v924_v50 = vsel %vm923_vm10, %v1083_v6, %v920_v3 }
 0xbd0   :  { %v929_v61 = vsel %vm926_vm2, %v928_v45, %v924_v50 }
 0xbd1   :  { %v932_v62 = vmul.f32 %v931_v57, %v929_v61  ;;  %v935_v63 = vsub.f32 1.0, %v929_v61  ;;  %v941_v18 = vmul.f32 %v929_v61, %v851_v21 }
 0xbd3   :  { %v933_v1 = vadd.f32 %v932_v62, %v868_v0 }
 0xbd5   :  { %1084 = vtanh.f32 %v933_v1 }
 0xbdb   :  { %v1085_v2 = vpop.eup %1084 }
 0xbdc   :  { %937 = vrot.lane.b32.xlu2 %v1085_v2, %s1090_s15 }
 0xc36   :  { %v938_v17 = vpop.permute.xlu2 %937 }
 0xc37   :  { %v940_v58 = vmul.f32 %v938_v17, %v935_v63 }
 0xc39   :  { %v942_v30 = vadd.f32 %v941_v18, %v940_v58 }
 0xc3b   :  { %944 = vrot.lane.b32.xlu0 %v942_v30, %s1090_s15 }
 0xcad   :  { %v945_v33 = vpop.permute.xlu0 %944 }
 0xcae   :  { %947 = vst.msk [vmem:[%s1775_s7 + $0x38] sm:$0xff] %vm200_vm1, %v945_v33  ;;  %1031 = vmatmul.msk.f32.vlgmr.msrb.gmra.mxu0 %vm58_vm0, %v945_v33 }
 0xcaf   :  { %948 = vst.msk [vmem:[%s1775_s7] sm:$0xff] %vm286_vm7, %v945_v33 }
 0xd2b   :  { %v980_v35 = vpop.f32.mrf.mxu0 }
 0xd2c   :  { %v981_v36 = vadd.f32 %v1037_v10, %v980_v35 }
 0xd2e   :  { %1086 = vtanh.f32 %v981_v36 }
 0xd34   :  { %v1087_v37 = vpop.eup %1086 }
 0xd35   :  { %984 = vst.msk [vmem:[%s1778_s8] sm:$0xff] %vm200_vm1, %v1087_v37 }

</bundles_post_ra>
